<compile_context>
chip_gen: v6e
topology: v6e:2x2x1
jax: 0.10.0
libtpu: 0.0.40
codegen_flags: <defaults>
</compile_context>

<pallas_src>
import functools

import jax
import jax.numpy as jnp
from jax.experimental import pallas as pl
from jax.experimental.pallas import tpu as pltpu


def _pixel_shuffle3d_kernel(x_ref, o_ref, *, r, wb, precision):
    # x_ref: (TG, r*r, TD, H, W)   axis-1 index = rh*r + rw
    # o_ref: (TG, TD, H, r*r*W)    lane index  = rh*(W*r) + w*r + rw
    tg, _, td, h, w = x_ref.shape
    wr = w * r
    rows = tg * td * h

    # 0/1 lane-interleave matrices, built once per step from iota (no HBM stream, no
    # double-buffered constant input).  Cached per (chunk_width, rw) so the trace reuses them.
    pmats = {}

    def perm(wc, rw):
        key = (wc, rw)
        if key not in pmats:
            src = jax.lax.broadcasted_iota(jnp.int32, (wc, wc * r), 0)
            lane = jax.lax.broadcasted_iota(jnp.int32, (wc, wc * r), 1)
            pmats[key] = (lane == src * r + rw).astype(x_ref.dtype)
        return pmats[key]

    for rh in range(r):
        # Column-block the contraction: each MXU pass sees <= wb source lanes, so the
        # permutation costs O(wb*r) flops per output element independent of W, and the f32
        # accumulator working set stays bounded.
        for c0 in range(0, w, wb):
            wc = min(wb, w - c0)
            acc = None
            for rw in range(r):
                # (TG, TD, H, wc) -> (rows, wc): leading-dims merge only (free when H is a
                # sublane multiple), 128-aligned static lane slice.
                x2 = x_ref[:, rh * r + rw, :, :, c0:c0 + wc].reshape(rows, wc)
                # Exact lane interleave on the (otherwise idle) MXU.
                y2 = jnp.dot(x2, perm(wc, rw),
                             preferred_element_type=jnp.float32,
                             precision=precision)
                acc = y2 if acc is None else acc + y2
            lo = rh * wr + c0 * r
            o_ref[:, :, :, lo:lo + wc * r] = (
                acc.reshape(tg, td, h, wc * r).astype(o_ref.dtype))


def _vmem_capacity_bytes():
    """Physical VMEM per TensorCore, with a conservative fallback (v7x = 64 MiB)."""
    try:
        info = pltpu.get_tpu_info()
        for attr in ("vmem_capacity_bytes", "vmem_size_bytes"):
            v = getattr(info, attr, None)
            if v:
                return int(v)
    except Exception:
        pass
    return 64 * 1024 * 1024


def _choose_tiles(g, d, r, h, w, itemsize, wb, budget):
    """Pick (TG, TD): double-buffered in/out slabs + f32 intermediates + permutation constants
    must fit `budget`; target ~2 MiB input slabs (measured >=85% of HBM roofline)."""
    per_gd = (r * r) * h * w * itemsize        # one (group, depth) input slab; output is equal
    wbe = min(w, wb)

    def working_set(tg, td):
        slab = tg * td * per_gd
        rows = tg * td * h
        acc = 3 * rows * wbe * r * 4           # acc + matmul result + source chunk (f32 bound)
        pmat = 2 * r * wbe * wbe * r * itemsize
        return 4 * slab + acc + pmat           # 2x double-buffered input + output slabs

    target = 2 * 1024 * 1024
    td = max(1, min(d, target // max(per_gd, 1)))
    tg = 1
    if td >= d:                                # whole depth fits: fuse groups too
        td = d
        tg = max(1, min(g, target // max(per_gd * d, 1)))
    while working_set(tg, td) > budget and (tg > 1 or td > 1):
        if tg > 1:
            tg = (tg + 1) // 2
        else:
            td = (td + 1) // 2
    return tg, td


def _reference(x, scale):
    """Pure-JAX transcription of the PyTorch PixelShuffle3d.forward."""
    b, c, d, h, w = x.shape
    n_out = c // scale ** 3
    v = x.reshape(b, n_out, scale, scale, scale, d, h, w)
    out = jnp.transpose(v, (0, 1, 5, 2, 6, 3, 7, 4))
    return out.reshape(b, n_out, d * scale, h * scale, w * scale)


def pixel_shuffle_3d(x, scale):
    """3-D pixel shuffle. x: (B, C, D, H, W) -> (B, C // scale**3, D*s, H*s, W*s)."""
    b, c, d, h, w = x.shape
    r = int(scale)
    assert c % (r ** 3) == 0, "channels must be divisible by scale**3"
    n_out = c // (r ** 3)
    if r == 1:
        return x.reshape(b, n_out, d, h, w)
    if not jnp.issubdtype(x.dtype, jnp.floating):
        # TODO(synk): no exact integer MXU path (v7x has no int MXU at all); fall back to the
        # XLA transpose for non-float dtypes.
        return _reference(x, r)

    g = b * n_out
    wr = w * r
    itemsize = jnp.dtype(x.dtype).itemsize

    # Free (layout-preserving) views of the input and of the output we produce.
    x_v = x.reshape(g, r, r * r, d, h, w)      # (g, rd, rh*r+rw, d, h, w)
    out_view_shape = (g, d, r, h, r * wr)      # (g, d, rd, h, rh*Wr + w*r + rw)

    # Column-block width for the MXU interleave (128-lane aligned slices).
    wb = min(w, 128)

    # Generation-aware VMEM budgeting + matching compiler limit (feedback #1/#2).
    vmem_cap = _vmem_capacity_bytes()
    budget = min(24 * 1024 * 1024, (2 * vmem_cap) // 5)
    vmem_limit = max(16 * 1024 * 1024, min(vmem_cap - 8 * 1024 * 1024, 2 * budget))
    tg, td = _choose_tiles(g, d, r, h, w, itemsize, wb, budget)

    grid = (pl.cdiv(g, tg), r, pl.cdiv(d, td))   # no divisibility constraint on g or d

    # f32 goes through HIGHEST (3-way bf16 split per operand) so the 0/1 permutation is
    # value-exact; bf16 is exact in a single pass.
    precision = None if x.dtype == jnp.bfloat16 else jax.lax.Precision.HIGHEST
    kernel = functools.partial(_pixel_shuffle3d_kernel, r=r, wb=wb, precision=precision)

    passes = 6 if precision == jax.lax.Precision.HIGHEST else 1
    cost = pl.CostEstimate(
        flops=int(2 * wb * r * passes) * int(x.size),
        transcendentals=0,
        bytes_accessed=int(2 * x.size * itemsize))

    out_view = pl.pallas_call(
        kernel,
        out_shape=jax.ShapeDtypeStruct(out_view_shape, x.dtype),
        grid_spec=pltpu.PrefetchScalarGridSpec(
            num_scalar_prefetch=0,
            grid=grid,
            in_specs=[
                pl.BlockSpec((tg, None, r * r, td, h, w),
                             lambda gi, rdi, dti: (gi, rdi, 0, dti, 0, 0)),
            ],
            out_specs=pl.BlockSpec((tg, td, None, h, r * wr),
                                   lambda gi, rdi, dti: (gi, dti, rdi, 0, 0)),
        ),
        compiler_params=pltpu.CompilerParams(
            dimension_semantics=("parallel", "parallel", "parallel"),
            vmem_limit_bytes=int(vmem_limit)),
        cost_estimate=cost,
    )(x_v)

    # Free reshape back to the natural NCDHW output layout.
    return out_view.reshape(b, n_out, d * r, h * r, w * r)


if __name__ == "__main__":
    scale = 2
    B, C, D, H, W = 2, 16, 4, 8, 64      # C divisible by scale**3; W*scale = 128 (lane-dense)

    key = jax.random.PRNGKey(0)
    x = jax.random.normal(key, (B, C, D, H, W), dtype=jnp.float32)

    shuffle = jax.jit(pixel_shuffle_3d, static_argnames=("scale",))
    out = jax.block_until_ready(shuffle(x, scale=scale))

    ref = _reference(x, scale)
    assert out.shape == ref.shape, (out.shape, ref.shape)
    assert jnp.allclose(out, ref, atol=1e-6, rtol=1e-6), "mismatch vs reference"

    print("KERNEL_OK")
</pallas_src>

<mosaic_0001>
module attributes {stable_mosaic.version = 11 : i64} {
  func.func @_pixel_shuffle3d_kernel(%arg0: i32, %arg1: i32, %arg2: i32, %arg3: memref<4x1x4x4x8x64xf32, #tpu.memory_space<vmem>>, %arg4: memref<4x4x1x8x256xf32, #tpu.memory_space<vmem>>) attributes {dimension_semantics = [#tpu.dimension_semantics<parallel>, #tpu.dimension_semantics<parallel>, #tpu.dimension_semantics<parallel>], iteration_bounds = array<i64: 1, 2, 1>, scalar_prefetch = 0 : i64, scratch_operands = 0 : i64, tpu.core_type = #tpu.core_type<tc>, window_params = [{transform_indices = @transform_0, window_bounds = array<i64: 4, 1, 4, 4, 8, 64>}, {transform_indices = @transform_1, window_bounds = array<i64: 4, 4, 1, 8, 256>}]} {
    %c0 = arith.constant 0 : index
    %c0_0 = arith.constant 0 : index
    %c0_1 = arith.constant 0 : index
    %c0_2 = arith.constant 0 : index
    %c0_3 = arith.constant 0 : index
    %c0_4 = arith.constant 0 : index
    %0 = vector.load %arg3[%c0, %c0_0, %c0_1, %c0_2, %c0_3, %c0_4] : memref<4x1x4x4x8x64xf32, #tpu.memory_space<vmem>>, vector<4x1x1x4x8x64xf32>
    %1 = vector.shape_cast %0 : vector<4x1x1x4x8x64xf32> to vector<4x4x8x64xf32>
    %2 = vector.shape_cast %1 : vector<4x4x8x64xf32> to vector<128x64xf32>
    %3 = tpu.iota {dimensions = array<i32: 0>} : vector<64x128xi32>
    %4 = tpu.iota {dimensions = array<i32: 1>} : vector<64x128xi32>
    %c2_i32 = arith.constant 2 : i32
    %5 = vector.broadcast %c2_i32 : i32 to vector<64x128xi32>
    %6 = arith.muli %3, %5 : vector<64x128xi32>
    %c0_i32 = arith.constant 0 : i32
    %7 = vector.broadcast %c0_i32 : i32 to vector<64x128xi32>
    %8 = arith.addi %6, %7 : vector<64x128xi32>
    %9 = arith.cmpi eq, %4, %8 : vector<64x128xi32>
    %10 = arith.extui %9 : vector<64x128xi1> to vector<64x128xi32>
    %11 = arith.sitofp %10 : vector<64x128xi32> to vector<64x128xf32>
    %cst = arith.constant dense<0.000000e+00> : vector<128x128xf32>
    %12 = tpu.matmul %2, %11, %cst {dimension_numbers = #tpu.dot_dimension_numbers<[1], [0], [0], [1], [0, 0, 1, 1], [], []>, precision = #tpu.contract_precision<fp32>} : vector<128x64xf32>, vector<64x128xf32>, vector<128x128xf32> -> vector<128x128xf32>
    %c0_5 = arith.constant 0 : index
    %c0_6 = arith.constant 0 : index
    %c1 = arith.constant 1 : index
    %c0_7 = arith.constant 0 : index
    %c0_8 = arith.constant 0 : index
    %c0_9 = arith.constant 0 : index
    %13 = vector.load %arg3[%c0_5, %c0_6, %c1, %c0_7, %c0_8, %c0_9] : memref<4x1x4x4x8x64xf32, #tpu.memory_space<vmem>>, vector<4x1x1x4x8x64xf32>
    %14 = vector.shape_cast %13 : vector<4x1x1x4x8x64xf32> to vector<4x4x8x64xf32>
    %15 = vector.shape_cast %14 : vector<4x4x8x64xf32> to vector<128x64xf32>
    %16 = tpu.iota {dimensions = array<i32: 0>} : vector<64x128xi32>
    %17 = tpu.iota {dimensions = array<i32: 1>} : vector<64x128xi32>
    %c2_i32_10 = arith.constant 2 : i32
    %18 = vector.broadcast %c2_i32_10 : i32 to vector<64x128xi32>
    %19 = arith.muli %16, %18 : vector<64x128xi32>
    %c1_i32 = arith.constant 1 : i32
    %20 = vector.broadcast %c1_i32 : i32 to vector<64x128xi32>
    %21 = arith.addi %19, %20 : vector<64x128xi32>
    %22 = arith.cmpi eq, %17, %21 : vector<64x128xi32>
    %23 = arith.extui %22 : vector<64x128xi1> to vector<64x128xi32>
    %24 = arith.sitofp %23 : vector<64x128xi32> to vector<64x128xf32>
    %cst_11 = arith.constant dense<0.000000e+00> : vector<128x128xf32>
    %25 = tpu.matmul %15, %24, %cst_11 {dimension_numbers = #tpu.dot_dimension_numbers<[1], [0], [0], [1], [0, 0, 1, 1], [], []>, precision = #tpu.contract_precision<fp32>} : vector<128x64xf32>, vector<64x128xf32>, vector<128x128xf32> -> vector<128x128xf32>
    %26 = arith.addf %12, %25 : vector<128x128xf32>
    %27 = vector.shape_cast %26 : vector<128x128xf32> to vector<4x4x8x128xf32>
    %c0_12 = arith.constant 0 : index
    %c0_13 = arith.constant 0 : index
    %c0_14 = arith.constant 0 : index
    %c0_15 = arith.constant 0 : index
    %c0_16 = arith.constant 0 : index
    %28 = vector.load %arg4[%c0_12, %c0_13, %c0_14, %c0_15, %c0_16] : memref<4x4x1x8x256xf32, #tpu.memory_space<vmem>>, vector<4x4x1x8x128xf32>
    %29 = vector.shape_cast %28 : vector<4x4x1x8x128xf32> to vector<4x4x8x128xf32>
    %30 = vector.shape_cast %27 : vector<4x4x8x128xf32> to vector<4x4x1x8x128xf32>
    tpu.vector_store %arg4[%c0_12, %c0_13, %c0_14, %c0_15, %c0_16], %30 {strides = array<i32>} : memref<4x4x1x8x256xf32, #tpu.memory_space<vmem>>, vector<4x4x1x8x128xf32>,
    %c0_17 = arith.constant 0 : index
    %c0_18 = arith.constant 0 : index
    %c2 = arith.constant 2 : index
    %c0_19 = arith.constant 0 : index
    %c0_20 = arith.constant 0 : index
    %c0_21 = arith.constant 0 : index
    %31 = vector.load %arg3[%c0_17, %c0_18, %c2, %c0_19, %c0_20, %c0_21] : memref<4x1x4x4x8x64xf32, #tpu.memory_space<vmem>>, vector<4x1x1x4x8x64xf32>
    %32 = vector.shape_cast %31 : vector<4x1x1x4x8x64xf32> to vector<4x4x8x64xf32>
    %33 = vector.shape_cast %32 : vector<4x4x8x64xf32> to vector<128x64xf32>
    %cst_22 = arith.constant dense<0.000000e+00> : vector<128x128xf32>
    %34 = tpu.matmul %33, %11, %cst_22 {dimension_numbers = #tpu.dot_dimension_numbers<[1], [0], [0], [1], [0, 0, 1, 1], [], []>, precision = #tpu.contract_precision<fp32>} : vector<128x64xf32>, vector<64x128xf32>, vector<128x128xf32> -> vector<128x128xf32>
    %c0_23 = arith.constant 0 : index
    %c0_24 = arith.constant 0 : index
    %c3 = arith.constant 3 : index
    %c0_25 = arith.constant 0 : index
    %c0_26 = arith.constant 0 : index
    %c0_27 = arith.constant 0 : index
    %35 = vector.load %arg3[%c0_23, %c0_24, %c3, %c0_25, %c0_26, %c0_27] : memref<4x1x4x4x8x64xf32, #tpu.memory_space<vmem>>, vector<4x1x1x4x8x64xf32>
    %36 = vector.shape_cast %35 : vector<4x1x1x4x8x64xf32> to vector<4x4x8x64xf32>
    %37 = vector.shape_cast %36 : vector<4x4x8x64xf32> to vector<128x64xf32>
    %cst_28 = arith.constant dense<0.000000e+00> : vector<128x128xf32>
    %38 = tpu.matmul %37, %24, %cst_28 {dimension_numbers = #tpu.dot_dimension_numbers<[1], [0], [0], [1], [0, 0, 1, 1], [], []>, precision = #tpu.contract_precision<fp32>} : vector<128x64xf32>, vector<64x128xf32>, vector<128x128xf32> -> vector<128x128xf32>
    %39 = arith.addf %34, %38 : vector<128x128xf32>
    %40 = vector.shape_cast %39 : vector<128x128xf32> to vector<4x4x8x128xf32>
    %c0_29 = arith.constant 0 : index
    %c0_30 = arith.constant 0 : index
    %c0_31 = arith.constant 0 : index
    %c0_32 = arith.constant 0 : index
    %c128 = arith.constant 128 : index
    %41 = vector.load %arg4[%c0_29, %c0_30, %c0_31, %c0_32, %c128] : memref<4x4x1x8x256xf32, #tpu.memory_space<vmem>>, vector<4x4x1x8x128xf32>
    %42 = vector.shape_cast %41 : vector<4x4x1x8x128xf32> to vector<4x4x8x128xf32>
    %43 = vector.shape_cast %40 : vector<4x4x8x128xf32> to vector<4x4x1x8x128xf32>
    tpu.vector_store %arg4[%c0_29, %c0_30, %c0_31, %c0_32, %c128], %43 {strides = array<i32>} : memref<4x4x1x8x256xf32, #tpu.memory_space<vmem>>, vector<4x4x1x8x128xf32>,
    return
  }
  func.func @transform_0(%arg0: i32, %arg1: i32, %arg2: i32) -> (i32, i32, i32, i32, i32, i32) {
    %c0_i32 = arith.constant 0 : i32
    %c0_i32_0 = arith.constant 0 : i32
    %c0_i32_1 = arith.constant 0 : i32
    %c0_i32_2 = arith.constant 0 : i32
    return %arg0, %arg1, %c0_i32, %arg2, %c0_i32_0, %c0_i32_1 : i32, i32, i32, i32, i32, i32
  }
  func.func @transform_1(%arg0: i32, %arg1: i32, %arg2: i32) -> (i32, i32, i32, i32, i32) {
    %c0_i32 = arith.constant 0 : i32
    %c0_i32_0 = arith.constant 0 : i32
    %c0_i32_1 = arith.constant 0 : i32
    return %arg0, %arg2, %arg1, %c0_i32, %c0_i32_0 : i32, i32, i32, i32, i32
  }
}

</mosaic_0001>

<bundles_post_ra>
// kernel: pixel_shuffle_3d.1
= control target key start
LH: loop header
LB: loop body
LE: loop exit
PB: predicated region body
PF: predicated region fallthrough
CT: control target
= control target key end

     0   :  { %6 = vsyncpa [#allocation3], 0  ;;  %s10260_s0 = inlined_call_operand.hbm [shape: f32[4,2,4,4,8,64], index: 0, kind: input, shape index: {}]   ;;  %s10261_s1 = inlined_call_operand.vmem [shape: f32[4,4,2,8,256], index: 1, kind: output, shape index: {}]  }
   0x1   :  { %8 = vsyncpa [#allocation3 + $0x1], 0  ;;  %s7315_s6 = smov 0   ;;  %s7317_s7 = smov 0  }
   0x2   :  { %s7319_s8 = smov 0   ;;  %s7321_s9 = smov 0  }
   0x3   :  { %s7323_s10 = smov 0   ;;  %s7325_s11 = smov 0  }
   0x4 LB: > { %s5465_s12 = sadd.s32 4294967295, %s7295_s11   ;;  %s29_s13 = sadd.s32 1, %s7291_s10  ;;  %s7295_s11 = sphi %s7325_s11, %s14_s11   ;;  %s7291_s10 = sphi %s7323_s10, %s10941_s10   ;;  %s7287_s9 = sphi %s7321_s9, %s10940_s9   ;;  %s7283_s8 = sphi %s7319_s8, %s10939_s8   ;;  %s7279_s7 = sphi %s7317_s7, %s10938_s7   ;;  %s7275_s6 = sphi %s7315_s6, %s10937_s6  }
   0x5   : > { %p31_p0 = scmp.ge.s32.totalorder %s29_s13, 2  ;;  %s44_s14 = sadd.s32 1, %s7283_s8 }
   0x6   : > { %p51_p1 = scmp.ne.s32.totalorder %s7283_s8, %s7279_s7  ;;  %p52_p2 = scmp.eq.s32.totalorder %s7295_s11, 0 }
   0x7   : > { %s10943_s13 = smov (%p31_p0, %s29_s13), 0  ;;  %p57_p4 = scmp.ne.s32.totalorder %s7279_s7, %s7275_s6 }
   0x8   : > { %p7351_p3 = por %p52_p2, %p51_p1  ;;  %s38_s16 = ssub.s32 %s7291_s10, %s10943_s13 }
   0x9   : > { %p58_p5 = scmp.eq.s32.totalorder %s5465_s12, 0  ;;  %p42_p6 = scmp.eq.s32.totalorder %s38_s16, 0 }
   0xa   : > { %p85_p7 = scmp.eq.s32.totalorder %s5465_s12, 1  ;;  %p5468_p10 = scmp.ge.s32.totalorder %s7295_s11, 2 }
   0xb   : > { %p7358_p8 = por %p58_p5, %p57_p4 }
   0xc   : > { %s7363_s18 = scalar_select %p42_p6, %s7283_s8, %s44_s14  }
   0xd   : > { %p7365_p9 = por %p85_p7, %p51_p1  ;;  %107 = sbr.rel (%p5468_p10) target bundleno = 31 (0x1f), region = 16 }
  0x12   : > { %s111_s20 = sand.u32 1, %s7283_s8   ;;  %s5642_s21 = sshll.u32 %s7291_s10, 11 }
  0x13   : > { %s5469_s22 = sshll.u32 %s111_s20, 9  ;;  %s126_s25 = scalar_lea.hbm %s10260_s0, %s5642_s21 }
  0x14   : > { %s7180_s26 = scalar_select %p7351_p3, [#allocation0], [#allocation7] }
  0x15   : > { %s115_s27 = scalar_lea.vmem [#allocation2], %s5469_s22  ;;  %s7297_s30 = smov 4096  }
  0x16   : > { %s139_s28 = sshll.u32 %s115_s27, 4  ;;  %s131_s29 = sld [smem:[%s7180_s26]]   ;;  %s140_s28 = int_to_ptr.vmem [resolvable:$true] %s139_s28 }
  0x17   : > { %7181 = sst [smem:[#allocation6]] (%p7351_p3), %s7297_s30  ;;  %s7298_s2 = smov 2048  }
  0x18   : > { %7182 = sst [smem:[#allocation6 + $0x1]] (%p7351_p3), %s7298_s2  ;;  %s7299_s3 = smov 16  }
  0x19   : > { %7183 = sst [smem:[#allocation6 + $0x2]] (%p7351_p3), %s7299_s3  ;;  %s7300_s4 = smov 128  }
  0x1a   : > { %7184 = sst [smem:[#allocation6 + $0x3]] (%p7351_p3), %s7300_s4  ;;  %s7301_s6 = smov 8  }
  0x1b   : > { %7185 = sst [smem:[#allocation6 + $0x4]] (%p7351_p3), %s7300_s4  ;;  %s112_s14 = scalar_lea.sflag [#allocation3], %s111_s20 }
  0x1c   : > { %s5472_s5 = sshll.u32 %s131_s29, 26  ;;  %7186 = sst [smem:[#allocation6 + $0x5]] (%p7351_p3), %s7301_s6 }
  0x1d   : > { %s5473_s12 = sadd.s32 134217728, %s5472_s5  ;;  %s7302_s16 = smov 131072  }
  0x1e   : > { %7187 = dma.general (%p7351_p3), %s126_s25, 8192, %s140_s28, %s112_s14, %s7302_s16, [#allocation6], %s5473_s12, 0  }
  0x1f PF: > { %p5474_p11 = scmp.ge.s32.totalorder %s7295_s11, 1  ;;  %p160_p12 = scmp.lt.s32.totalorder %s7295_s11, 3 }
  0x21   : > { %p161_p13 = pnand %p5474_p11, %p160_p12 }
  0x23   : > { %164 = sbr.rel (%p161_p13) target bundleno = 671 (0x29f), region = 24 }
  0x28   : > { %s7394_s21 = sand.u32 1, %s7279_s7  }
  0x29   : > { %s5475_s22 = sshll.u32 %s7394_s21, 9  ;;  %s167_s23 = scalar_lea.sflag [#allocation3], %s7394_s21 }
  0x2a   : > { %s7398_s24 = scalar_lea.vmem [#allocation2], %s5475_s22 }
  0x2b   : > { %7270 = dma.done.wait (%p7358_p8), %s167_s23, 8192  }
  0x2c   : > { %7272 = vsyncadd (%p7358_p8), %s167_s23, 4294959104  ;;  %v208_v0 = vlaneseq  ;;  %vm10327_vm0 = vcmask 523264   ;;  %v10478_v15 = vmov 0  ;;  %v10481_v24 = vmov 0  ;;  %v5485_v28 = vld [vmem:[%s7398_s24 + $0x20] sm:$0xff]  ;;  %v5486_v39 = vld [vmem:[%s7398_s24 + $0x28] sm:$0xff] }
  0x2d   : > { %v10484_v25 = vmov 0  ;;  %v10275_v29 = vmov 1.0   ;;  %v10487_v30 = vmov 0  ;;  %v10490_v31 = vmov 0  ;;  %v5487_v49 = vld [vmem:[%s7398_s24 + $0x30] sm:$0xff]  ;;  %v5488_v62 = vld [vmem:[%s7398_s24 + $0x38] sm:$0xff] }
  0x2e   : > { %v209_v1 = vshrl.u32 %v208_v0, 7  ;;  %v7404_v2 = vand.u32 127, %v208_v0  ;;  %v10263_v32 = vmov 0.0   ;;  %v10493_v35 = vmov 0  ;;  %s5476_s15 = sshll.u32 %s7394_s21, 8  ;;  %s5643_s20 = sshll.u32 (%p7365_p9), %s7287_s9, 4 }
  0x2f   : > { %v10497_v37 = vmov 0  ;;  %v10501_v42 = vmov 0  ;;  %v302_v43 = vsel %vm10327_vm0, %v5485_v28, 0  ;;  %v10508_v50 = vmov 0  ;;  %s9859_s17 = scalar_lea.vmem [#allocation4], %s5476_s15  ;;  %s10179_s27 = scalar_lea.vmem (%p7365_p9), %s10261_s1, %s5643_s20 }
  0x30   : > { %v7406_v3 = vadd.s32 56, %v209_v1  ;;  %v7408_v4 = vadd.s32 48, %v209_v1  ;;  %v7410_v5 = vadd.s32 40, %v209_v1  ;;  %v7412_v6 = vadd.s32 32, %v209_v1 }
  0x31   : > { %v7414_v7 = vadd.s32 24, %v209_v1  ;;  %v7416_v8 = vadd.s32 16, %v209_v1  ;;  %v7418_v9 = vadd.s32 8, %v209_v1  ;;  %v219_v10 = vmul.u32 2, %v209_v1 }
  0x32   : > { %v10273_v11 = vmul.u32 2, %v7406_v3  ;;  %v10272_v12 = vmul.u32 2, %v7408_v4  ;;  %v7520_v48 = vand.u32 4294901760, %v302_v43  ;;  %v305_v52 = vsel %vm10327_vm0, %v5486_v39, 0 }
  0x33   : > { %v10271_v13 = vmul.u32 2, %v7410_v5  ;;  %v10270_v14 = vmul.u32 2, %v7412_v6  ;;  %vm7425_vm1 = vcmp.eq.s32.totalorder %v7404_v2, %v219_v10  ;;  %v268_v23 = vadd.s32 1, %v219_v10 }
  0x34   : > { %v10479_v15 = vsel %vm7425_vm1, 4294967295, %v10478_v15  ;;  %v275_v16 = vadd.s32 1, %v10273_v11  ;;  %v274_v17 = vadd.s32 1, %v10272_v12  ;;  %v10269_v18 = vmul.u32 2, %v7414_v7  ;;  %10507 = vst [vmem:[#allocation22_spill] sm:$0xff] %v7520_v48  ;;  %6276 = vmatprep.mubr.f32.mxu1 %v7520_v48 }
  0x35   : > { %10480 = vst [vmem:[#allocation9_spill] sm:$0xff] %v10479_v15  ;;  %v10268_v19 = vmul.u32 2, %v7416_v8  ;;  %v273_v20 = vadd.s32 1, %v10271_v13  ;;  %v272_v21 = vadd.s32 1, %v10270_v14  ;;  %v10267_v22 = vmul.u32 2, %v7418_v9  ;;  %v5492_v14 = vld [vmem:[%s7398_s24 + $0xb8] sm:$0xff] }
  0x36   : > { %vm7441_vm2 = vcmp.eq.s32.totalorder %v7404_v2, %v275_v16  ;;  %vm7446_vm3 = vcmp.eq.s32.totalorder %v7404_v2, %v274_v17  ;;  %v271_v26 = vadd.s32 1, %v10269_v18  ;;  %vm7501_vm8 = vcmp.eq.s32.totalorder %v7404_v2, %v268_v23  ;;  %v5493_v13 = vld [vmem:[%s7398_s24 + $0x120] sm:$0xff] }
  0x37   : > { %v10482_v24 = vsel %vm7441_vm2, 4294967295, %v10481_v24  ;;  %v10485_v25 = vsel %vm7446_vm3, 4294967295, %v10484_v25  ;;  %v270_v27 = vadd.s32 1, %v10268_v19  ;;  %6220 = vmatprep.subr.msk.mxu0 %vm7441_vm2, %v10275_v29  ;;  %vm7459_vm4 = vcmp.eq.s32.totalorder %v7404_v2, %v273_v20 }
  0x38   : > { %10483 = vst [vmem:[#allocation10_spill] sm:$0xff] %v10482_v24  ;;  %10486 = vst [vmem:[#allocation11_spill] sm:$0xff] %v10485_v25  ;;  %v10488_v30 = vsel %vm7459_vm4, 4294967295, %v10487_v30  ;;  %vm7464_vm5 = vcmp.eq.s32.totalorder %v7404_v2, %v272_v21  ;;  %v5508_v33 = vsel %vm7441_vm2, 1.0, %v10263_v32  ;;  %v5507_v34 = vsel %vm7446_vm3, 1.0, %v10263_v32  ;;  %6221 = vmatpush3.msk.msra.mxu0 %vm7441_vm2, %v10275_v29 }
  0x39   : > { %10489 = vst [vmem:[#allocation12_spill] sm:$0xff] %v10488_v30  ;;  %v10491_v31 = vsel %vm7464_vm5, 4294967295, %v10490_v31  ;;  %vm7478_vm6 = vcmp.eq.s32.totalorder %v7404_v2, %v271_v26  ;;  %v7482_v36 = vsub.f32 %v5508_v33, %v5508_v33  ;;  %vm7485_vm7 = vcmp.eq.s32.totalorder %v7404_v2, %v270_v27  ;;  %6222 = vmatprep.subr.msk.mxu0 %vm7446_vm3, %v10275_v29 }
  0x3a   : > { %10492 = vst [vmem:[#allocation13_spill] sm:$0xff] %v10491_v31  ;;  %v10494_v35 = vsel %vm7478_vm6, 4294967295, %v10493_v35  ;;  %v10498_v37 = vsel %vm7485_vm7, 4294967295, %v10497_v37  ;;  %v7489_v38 = vsub.f32 %v5507_v34, %v5507_v34  ;;  %v269_v40 = vadd.s32 1, %v10267_v22  ;;  %6223 = vmatpush3.msk.msra.mxu0 %vm7446_vm3, %v10275_v29  ;;  %v203_v31 = vld [vmem:[%s7398_s24 + $0x118] sm:$0xff] }
  0x3b   : > { %10495 = vst [vmem:[#allocation14_spill] sm:$0xff] %v10494_v35  ;;  %10496 = vst [vmem:[#allocation15_spill] sm:$0xff] %v7482_v36  ;;  %v5506_v41 = vsel %vm7459_vm4, 1.0, %v10263_v32  ;;  %v10502_v42 = vsel %vm7501_vm8, 4294967295, %v10501_v42  ;;  %v5505_v44 = vsel %vm7464_vm5, 1.0, %v10263_v32  ;;  %v7513_v45 = vand.u32 4294901760, %v7482_v36  ;;  %6224 = vmatprep.subr.msk.mxu0 %vm7459_vm4, %v10275_v29 }
  0x3c   : > { %10499 = vst [vmem:[#allocation16_spill] sm:$0xff] %v10498_v37  ;;  %10500 = vst [vmem:[#allocation17_spill] sm:$0xff] %v7489_v38  ;;  %v7516_v46 = vand.u32 4294901760, %v7489_v38  ;;  %v7518_v47 = vsub.f32 %v5506_v41, %v5506_v41  ;;  %vm7527_vm9 = vcmp.eq.s32.totalorder %v7404_v2, %v269_v40  ;;  %v7531_v51 = vsub.f32 %v5505_v44, %v5505_v44  ;;  %v5489_v41 = vld [vmem:[%s7398_s24 + $0xa0] sm:$0xff] }
  0x3d   : > { %10503 = vst [vmem:[#allocation18_spill] sm:$0xff] %v10502_v42  ;;  %10504 = vst [vmem:[#allocation19_spill] sm:$0xff] %v7513_v45  ;;  %v10509_v50 = vsel %vm7527_vm9, 4294967295, %v10508_v50  ;;  %v5504_v53 = vsel %vm7478_vm6, 1.0, %v10263_v32  ;;  %6225 = vmatpush3.msk.msra.mxu0 %vm7459_vm4, %v10275_v29  ;;  %v602_v54 = vsub.f32 %v7482_v36, %v7513_v45  ;;  %v7548_v57 = vsub.f32 %v302_v43, %v7520_v48 }
  0x3e   : > { %10505 = vst [vmem:[#allocation20_spill] sm:$0xff] %v7516_v46  ;;  %10506 = vst [vmem:[#allocation21_spill] sm:$0xff] %v7518_v47  ;;  %v609_v55 = vsub.f32 %v7489_v38, %v7516_v46  ;;  %v7545_v56 = vand.u32 4294901760, %v7518_v47  ;;  %6226 = vmatprep.subr.msk.mxu0 %vm7464_vm5, %v10275_v29  ;;  %v7555_v58 = vand.u32 4294901760, %v7531_v51  ;;  %v7557_v59 = vand.u32 4294901760, %v305_v52 }
  0x3f   : > { %10510 = vst [vmem:[#allocation23_spill] sm:$0xff] %v10509_v50  ;;  %10511 = vst [vmem:[#allocation24_spill] sm:$0xff] %v7531_v51  ;;  %v7559_v60 = vsub.f32 %v5504_v53, %v5504_v53  ;;  %v308_v61 = vsel %vm10327_vm0, %v5487_v49, 0  ;;  %6227 = vmatpush3.msk.msra.mxu0 %vm7464_vm5, %v10275_v29  ;;  %v7566_v63 = vand.u32 4294901760, %v602_v54  ;;  %v10265_v10 = vand.u32 4294901760, %v7548_v57  ;;  %v202_v50 = vld [vmem:[%s7398_s24 + $0x110] sm:$0xff] }
  0x40   : > { %10512 = vst [vmem:[#allocation25_spill] sm:$0xff] %v7545_v56  ;;  %10513 = vst [vmem:[#allocation26_spill] sm:$0xff] %v7555_v58  ;;  %v7568_v0 = vand.u32 4294901760, %v609_v55  ;;  %v616_v1 = vsub.f32 %v7518_v47, %v7545_v56  ;;  %6228 = vmatprep.subr.msk.mxu0 %vm7478_vm6, %v10275_v29  ;;  %v623_v16 = vsub.f32 %v7531_v51, %v7555_v58  ;;  %v7584_v21 = vand.u32 4294901760, %v308_v61 }
  0x41   : > { %10514 = vst [vmem:[#allocation27_spill] sm:$0xff] %v7557_v59  ;;  %10515 = vst [vmem:[#allocation28_spill] sm:$0xff] %v7559_v60  ;;  %v7579_v17 = vsub.f32 %v305_v52, %v7557_v59  ;;  %v7582_v20 = vand.u32 4294901760, %v7559_v60  ;;  %6229 = vmatpush3.msk.msra.mxu0 %vm7478_vm6, %v10275_v29  ;;  %6260 = vmatprep.subr.mxu1 %v7566_v63  ;;  %v425_v26 = vsub.f32 %v7548_v57, %v10265_v10 }
  0x42   : > { %10516 = vst [vmem:[#allocation29_spill] sm:$0xff] %v7566_v63  ;;  %10517 = vst [vmem:[#allocation30_spill] sm:$0xff] %v7568_v0  ;;  %v7590_v23 = vand.u32 4294901760, %v616_v1  ;;  %v5503_v27 = vsel %vm7485_vm7, 1.0, %v10263_v32  ;;  %v311_v28 = vsel %vm10327_vm0, %v5488_v62, 0  ;;  %6230 = vmatprep.subr.msk.mxu0 %vm7485_vm7, %v10275_v29  ;;  %6261 = vmatpush3.msra.mxu1 %v7566_v63  ;;  %v7603_v33 = vand.u32 4294901760, %v623_v16 }
  0x43   : > { %10518 = vst [vmem:[#allocation31_spill] sm:$0xff] %v7582_v20  ;;  %10519 = vst [vmem:[#allocation32_spill] sm:$0xff] %v7584_v21  ;;  %v10262_v34 = vand.u32 4294901760, %v7579_v17  ;;  %v630_v39 = vsub.f32 %v7559_v60, %v7582_v20  ;;  %v7609_v40 = vsub.f32 %v308_v61, %v7584_v21  ;;  %6231 = vmatpush3.msk.msra.mxu0 %vm7485_vm7, %v10275_v29  ;;  %6262 = vmatprep.subr.mxu1 %v7568_v0  ;;  %v5490_v62 = vld [vmem:[%s7398_s24 + $0xa8] sm:$0xff] }
  0x44   : > { %10520 = vst [vmem:[#allocation33_spill] sm:$0xff] %v7590_v23  ;;  %10521 = vst [vmem:[#allocation34_spill] sm:$0xff] %v7603_v33  ;;  %v426_v43 = vand.u32 4294901760, %v425_v26  ;;  %v7616_v44 = vsub.f32 %v5503_v27, %v5503_v27  ;;  %v7618_v49 = vand.u32 4294901760, %v311_v28  ;;  %v5502_v52 = vsel %vm7527_vm9, 1.0, %v10263_v32  ;;  %6232 = vmatprep.subr.msk.mxu0 %vm7527_vm9, %v10275_v29  ;;  %6263 = vmatpush3.msra.mxu1 %v7568_v0 }
  0x45   : > { %v435_v53 = vsub.f32 %v7579_v17, %v10262_v34  ;;  %v7630_v54 = vand.u32 4294901760, %v630_v39  ;;  %v10266_v55 = vand.u32 4294901760, %v7609_v40  ;;  %v7633_v61 = vsub.f32 %v5502_v52, %v5502_v52  ;;  %6233 = vmatpush3.msk.msra.mxu0 %vm7527_vm9, %v10275_v29  ;;  %6264 = vmatprep.subr.mxu1 %v7590_v23  ;;  %v5491_v34 = vld [vmem:[%s7398_s24 + $0xb0] sm:$0xff] }
  0x46   : > { %10522 = vst [vmem:[#allocation35_spill] sm:$0xff] %v7616_v44  ;;  %10523 = vst [vmem:[#allocation36_spill] sm:$0xff] %v7618_v49  ;;  %v7641_v1 = vand.u32 4294901760, %v7616_v44  ;;  %v7644_v16 = vsub.f32 %v311_v28, %v7618_v49  ;;  %v314_v26 = vsel %vm10327_vm0, %v5489_v41, 0  ;;  %v5501_v27 = vsel %vm7501_vm8, 1.0, %v10263_v32  ;;  %6234 = vmatprep.subr.msk.mxu0 %vm7501_vm8, %v10275_v29  ;;  %6265 = vmatpush3.msra.mxu1 %v7590_v23 }
  0x47   : > { %10524 = vst [vmem:[#allocation37_spill] sm:$0xff] %v7630_v54  ;;  %10525 = vst [vmem:[#allocation38_spill] sm:$0xff] %v7633_v61  ;;  %v436_v39 = vand.u32 4294901760, %v435_v53  ;;  %v445_v52 = vsub.f32 %v7609_v40, %v10266_v55  ;;  %v7658_v28 = vand.u32 4294901760, %v7633_v61  ;;  %v7660_v41 = vand.u32 4294901760, %v314_v26  ;;  %6235 = vmatpush3.msk.msra.mxu0 %vm7501_vm8, %v10275_v29  ;;  %6236 = vmatprep.mubr.f32.mxu0 %v426_v43  ;;  %v5495_v29 = vld [vmem:[%s7398_s24 + $0x130] sm:$0xff] }
  0x48   : > { %10526 = vst [vmem:[#allocation39_spill] sm:$0xff] %v7641_v1  ;;  %v637_v53 = vsub.f32 %v7616_v44, %v7641_v1  ;;  %v10274_v32 = vand.u32 4294901760, %v7644_v16  ;;  %v7669_v10 = vsub.f32 %v5501_v27, %v5501_v27  ;;  %v317_v55 = vsel %vm10327_vm0, %v5490_v62, 0  ;;  %6266 = vmatprep.subr.mxu1 %v7603_v33  ;;  %6300 = vmatprep.subr.mxu0 %v7482_v36 }
  0x49   : > { %10527 = vst [vmem:[#allocation40_spill] sm:$0xff] %v7658_v28  ;;  %6237 = vmatmul.mubr.f32.vlgmr.msra.gmra.mxu0 %v436_v39  ;;  %v446_v22 = vand.u32 4294901760, %v445_v52  ;;  %v644_v19 = vsub.f32 %v7633_v61, %v7658_v28  ;;  %v7676_v18 = vsub.f32 %v314_v26, %v7660_v41  ;;  %v7678_v43 = vand.u32 4294901760, %v317_v55  ;;  %6267 = vmatpush3.msra.mxu1 %v7603_v33 }
  0x4a   : > { %10528 = vst [vmem:[#allocation41_spill] sm:$0xff] %v7669_v10  ;;  %v7683_v27 = vand.u32 4294901760, %v637_v53  ;;  %v455_v62 = vsub.f32 %v7644_v16, %v10274_v32  ;;  %v7689_v39 = vand.u32 4294901760, %v7669_v10  ;;  %v320_v26 = vsel %vm10327_vm0, %v5491_v34, 0  ;;  %6268 = vmatprep.subr.mxu1 %v7630_v54  ;;  %v5494_v32 = vld [vmem:[%s7398_s24 + $0x128] sm:$0xff]  ;;  %6301 = vmatpush3.msra.mxu0 %v7482_v36  ;;  %v5496_v36 = vld [vmem:[%s7398_s24 + $0x138] sm:$0xff] }
  0x4b   : > { %6239 = vmatprep.mubr.f32.mxu0 %v446_v22  ;;  %v7694_v52 = vand.u32 4294901760, %v644_v19  ;;  %v10285_v12 = vand.u32 4294901760, %v7676_v18  ;;  %v7698_v53 = vsub.f32 %v317_v55, %v7678_v43  ;;  %v7700_v11 = vand.u32 4294901760, %v320_v26  ;;  %6269 = vmatpush3.msra.mxu1 %v7630_v54 }
  0x4c   : > { %10529 = vst [vmem:[#allocation42_spill] sm:$0xff] %v7683_v27  ;;  %10530 = vst [vmem:[#allocation43_spill] sm:$0xff] %v7689_v39  ;;  %v456_v33 = vand.u32 4294901760, %v455_v62  ;;  %v651_v34 = vsub.f32 %v7669_v10, %v7689_v39  ;;  %v323_v19 = vsel %vm10327_vm0, %v5492_v14, 0  ;;  %v326_v22 = vsel %vm10327_vm0, %v5493_v13, 0  ;;  %6270 = vmatprep.subr.mxu1 %v7683_v27  ;;  %6302 = vmatprep.subr.mxu0 %v7489_v38 }
  0x4d   : > { %10531 = vst [vmem:[#allocation44_spill] sm:$0xff] %v7694_v52  ;;  %v465_v55 = vsub.f32 %v7676_v18, %v10285_v12  ;;  %v7716_v54 = vsub.f32 %v320_v26, %v7700_v11  ;;  %v7719_v62 = vand.u32 4294901760, %v323_v19  ;;  %6271 = vmatpush3.msra.mxu1 %v7683_v27  ;;  %v7725_v14 = vand.u32 4294901760, %v326_v22  ;;  %6303 = vmatpush3.msra.mxu0 %v7489_v38  ;;  %v5498_v27 = vld [vmem:[%s7398_s24 + $0x1a8] sm:$0xff] }
  0x4e   : > { %6240 = vmatmul.mubr.f32.gmra.mxu0 %v456_v33  ;;  %v7723_v13 = vand.u32 4294901760, %v651_v34  ;;  %v329_v12 = vsel %vm10327_vm0, %v5494_v32, 0  ;;  %v332_v23 = vsel %vm10327_vm0, %v5495_v29, 0  ;;  %6272 = vmatprep.subr.mxu1 %v7694_v52  ;;  %v10533_v0 = vand.u32 4294901760, %v7698_v53  ;;  %v5497_v34 = vld [vmem:[%s7398_s24 + $0x1a0] sm:$0xff] }
  0x4f   : > { %v466_v26 = vand.u32 4294901760, %v465_v55  ;;  %v10300_v15 = vand.u32 4294901760, %v7716_v54  ;;  %v7735_v33 = vsub.f32 %v323_v19, %v7719_v62  ;;  %6273 = vmatpush3.msra.mxu1 %v7694_v52  ;;  %v7741_v29 = vsub.f32 %v326_v22, %v7725_v14  ;;  %6304 = vmatprep.subr.mxu0 %v7518_v47 }
  0x50   : > { %10532 = vst [vmem:[#allocation45_spill] sm:$0xff] %v7723_v13  ;;  %v475_v63 = vsub.f32 %v7698_v53, %v10533_v0  ;;  %v7744_v32 = vand.u32 4294901760, %v329_v12  ;;  %v7746_v55 = vand.u32 4294901760, %v332_v23  ;;  %v335_v0 = vsel %vm10327_vm0, %v5496_v36, 0  ;;  %6274 = vmatprep.subr.mxu1 %v7723_v13  ;;  %6305 = vmatpush3.msra.mxu0 %v7518_v47  ;;  %v5499_v47 = vld [vmem:[%s7398_s24 + $0x1b0] sm:$0xff] }
  0x51   : > { %6242 = vmatprep.mubr.f32.mxu0 %v466_v26  ;;  %v485_v38 = vsub.f32 %v7716_v54, %v10300_v15  ;;  %v10307_v22 = vand.u32 4294901760, %v7735_v33  ;;  %v7754_v52 = vand.u32 4294901760, %v335_v0  ;;  %6275 = vmatpush3.msra.mxu1 %v7723_v13  ;;  %v338_v26 = vsel %vm10327_vm0, %v5497_v34, 0 }
  0x52   : > { %v476_v19 = vand.u32 4294901760, %v475_v63  ;;  %v7760_v36 = vsub.f32 %v329_v12, %v7744_v32  ;;  %v7764_v63 = vsub.f32 %v332_v23, %v7746_v55  ;;  %6277 = vmatmul.mubr.f32.vlgmr.msra.gmra.mxu1 %v7557_v59  ;;  %v7774_v12 = vand.u32 4294901760, %v338_v26  ;;  %6306 = vmatprep.subr.mxu0 %v7531_v51 }
  0x53   : > { %v486_v15 = vand.u32 4294901760, %v485_v38  ;;  %v495_v13 = vsub.f32 %v7735_v33, %v10307_v22  ;;  %v7772_v48 = vsub.f32 %v335_v0, %v7754_v52  ;;  %v10534_v39 = vmov 1.0   ;;  %6279 = vmatprep.mubr.f32.mxu1 %v7584_v21  ;;  %6307 = vmatpush3.msra.mxu0 %v7531_v51 }
  0x54   : > { %6243 = vmatmul.mubr.f32.gmra.mxu0 %v476_v19  ;;  %6340 = vmatprep.subr.msk.mxu1 %vm7441_vm2, %v10534_v39  ;;  %v10535_v23 = vand.u32 4294901760, %v7741_v29  ;;  %v10318_v34 = vand.u32 4294901760, %v7760_v36  ;;  %v341_v0 = vsel %vm10327_vm0, %v5498_v27, 0  ;;  %v7792_v21 = vsub.f32 %v338_v26, %v7774_v12 }
  0x55   : > { %6341 = vmatpush3.msk.msra.mxu1 %vm7441_vm2, %v10534_v39  ;;  %6245 = vmatprep.mubr.f32.mxu0 %v486_v15  ;;  %v496_v22 = vand.u32 4294901760, %v495_v13  ;;  %v10321_v59 = vand.u32 4294901760, %v7772_v48  ;;  %v7794_v28 = vand.u32 4294901760, %v341_v0  ;;  %v10536_v15 = vand.u32 4294901760, %v7764_v63 }
  0x56   : > { %v505_v38 = vsub.f32 %v7741_v29, %v10535_v23  ;;  %v5500_v23 = vld [vmem:[%s7398_s24 + $0x1b8] sm:$0xff]  ;;  %6342 = vmatprep.subr.msk.mxu1 %vm7446_vm3, %v10534_v39  ;;  %v515_v27 = vsub.f32 %v7760_v36, %v10318_v34  ;;  %v344_v26 = vsel %vm10327_vm0, %v5499_v47, 0  ;;  %6280 = vmatmul.mubr.f32.gmra.mxu1 %v7618_v49  ;;  %v10537_v49 = vmul.u32 2, %v7406_v3 }
  0x57   : > { %v525_v13 = vsub.f32 %v7764_v63, %v10536_v15  ;;  %v535_v1 = vsub.f32 %v7772_v48, %v10321_v59  ;;  %v7814_v20 = vsub.f32 %v341_v0, %v7794_v28  ;;  %v7816_v34 = vand.u32 4294901760, %v344_v26  ;;  %6343 = vmatpush3.msk.msra.mxu1 %vm7446_vm3, %v10534_v39  ;;  %6282 = vmatprep.mubr.f32.mxu1 %v7660_v41 }
  0x58   : > { %v506_v19 = vand.u32 4294901760, %v505_v38  ;;  %6246 = vmatmul.mubr.f32.gmra.mxu0 %v496_v22  ;;  %v10322_v38 = vand.u32 4294901760, %v7792_v21  ;;  %v516_v47 = vand.u32 4294901760, %v515_v27  ;;  %v347_v15 = vsel %vm10327_vm0, %v5500_v23, 0  ;;  %6344 = vmatprep.subr.msk.mxu1 %vm7459_vm4, %v10534_v39 }
  0x59   : > { %v526_v22 = vand.u32 4294901760, %v525_v13  ;;  %vm7825_vm10 = vcmp.eq.s32.totalorder %v7404_v2, %v10537_v49  ;;  %v10326_v0 = vand.u32 4294901760, %v7814_v20  ;;  %v7838_v23 = vsub.f32 %v344_v26, %v7816_v34  ;;  %6345 = vmatpush3.msk.msra.mxu1 %vm7459_vm4, %v10534_v39  ;;  %6308 = vmatprep.subr.mxu0 %v7559_v60 }
  0x5a   : > { %6248 = vmatprep.mubr.f32.mxu0 %v506_v19  ;;  %v545_v19 = vsub.f32 %v7792_v21, %v10322_v38  ;;  %v7844_v3 = vand.u32 4294901760, %v347_v15  ;;  %v10540_v49 = vmul.u32 2, %v7408_v4  ;;  %v10541_v27 = vmov 0  ;;  %6283 = vmatmul.mubr.f32.gmra.mxu1 %v7678_v43 }
  0x5b   : > { %v10544_v13 = vmul.u32 2, %v7410_v5  ;;  %v10545_v26 = vmov 0  ;;  %v536_v38 = vand.u32 4294901760, %v535_v1  ;;  %v555_v4 = vsub.f32 %v7814_v20, %v10326_v0  ;;  %6285 = vmatprep.mubr.f32.mxu1 %v7700_v11  ;;  %6346 = vmatprep.subr.msk.mxu1 %vm7464_vm5, %v10534_v39 }
  0x5c   : > { %vm7849_vm11 = vcmp.eq.s32.totalorder %v7404_v2, %v10540_v49  ;;  %6249 = vmatmul.mubr.f32.gmra.mxu0 %v516_v47  ;;  %v10325_v49 = vand.u32 4294901760, %v7838_v23  ;;  %v546_v51 = vand.u32 4294901760, %v545_v19  ;;  %v7867_v5 = vsub.f32 %v347_v15, %v7844_v3  ;;  %6347 = vmatpush3.msk.msra.mxu1 %vm7464_vm5, %v10534_v39 }
  0x5d   : > { %v10542_v27 = vsel %vm7849_vm11, 4294967295, %v10541_v27  ;;  %vm7856_vm12 = vcmp.eq.s32.totalorder %v7404_v2, %v10544_v13  ;;  %6251 = vmatprep.mubr.f32.mxu0 %v526_v22  ;;  %v10548_v13 = vmul.u32 2, %v7412_v6  ;;  %v10549_v47 = vmov 0  ;;  %6309 = vmatpush3.msra.mxu0 %v7559_v60 }
  0x5e   : > { %10543 = vst [vmem:[#allocation46_spill] sm:$0xff] %v10542_v27  ;;  %v10546_v26 = vsel %vm7856_vm12, 4294967295, %v10545_v26  ;;  %v565_v1 = vsub.f32 %v7838_v23, %v10325_v49  ;;  %v574_v6 = vand.u32 4294901760, %v7867_v5  ;;  %v10552_v22 = vmul.u32 2, %v7414_v7  ;;  %6286 = vmatmul.mubr.f32.gmra.mxu1 %v7719_v62  ;;  %6348 = vmatprep.subr.msk.mxu1 %vm7478_vm6, %v10534_v39 }
  0x5f   : > { %10547 = vst [vmem:[#allocation47_spill] sm:$0xff] %v10546_v26  ;;  %vm7872_vm13 = vcmp.eq.s32.totalorder %v7404_v2, %v10548_v13  ;;  %v10553_v15 = vmov 0  ;;  %v556_v19 = vand.u32 4294901760, %v555_v4  ;;  %6288 = vmatprep.mubr.f32.mxu1 %v7725_v14  ;;  %v10556_v0 = vmul.u32 2, %v7416_v8  ;;  %6310 = vmatprep.subr.mxu0 %v7616_v44 }
  0x60   : > { %v10550_v47 = vsel %vm7872_vm13, 4294967295, %v10549_v47  ;;  %vm7891_vm14 = vcmp.eq.s32.totalorder %v7404_v2, %v10552_v22  ;;  %6252 = vmatmul.mubr.f32.gmra.mxu0 %v536_v38  ;;  %v566_v13 = vand.u32 4294901760, %v565_v1  ;;  %v575_v49 = vsub.f32 %v7867_v5, %v574_v6  ;;  %6349 = vmatpush3.msk.msra.mxu1 %vm7478_vm6, %v10534_v39  ;;  %v10576_v22 = vld [vmem:[#allocation39_spill] sm:$0xff] }
  0x61   : > { %10551 = vst [vmem:[#allocation48_spill] sm:$0xff] %v10550_v47  ;;  %v10554_v15 = vsel %vm7891_vm14, 4294967295, %v10553_v15  ;;  %6254 = vmatprep.mubr.f32.mxu0 %v546_v51  ;;  %vm7903_vm15 = vcmp.eq.s32.totalorder %v7404_v2, %v10556_v0  ;;  %v10557_v7 = vmov 0  ;;  %6311 = vmatpush3.msra.mxu0 %v7616_v44  ;;  %v10560_v51 = vmul.u32 2, %v7418_v9  ;;  %v10571_v0 = vld [vmem:[#allocation31_spill] sm:$0xff] }
  0x62   : > { %10555 = vst [vmem:[#allocation49_spill] sm:$0xff] %v10554_v15  ;;  %v10558_v7 = vsel %vm7903_vm15, 4294967295, %v10557_v7  ;;  %v10561_v8 = vmov 0  ;;  %6289 = vmatmul.mubr.f32.gmra.mxu1 %v7744_v32  ;;  %v576_v38 = vand.u32 4294901760, %v575_v49  ;;  %6312 = vmatprep.subr.mxu0 %v7633_v61  ;;  %v10565_v9 = vand.u32 4294901760, %v7579_v17 }
  0x63   : > { %10559 = vst [vmem:[#allocation50_spill] sm:$0xff] %v10558_v7  ;;  %vm7918_vm0 = vcmp.eq.s32.totalorder %v7404_v2, %v10560_v51  ;;  %6291 = vmatprep.mubr.f32.mxu1 %v7746_v55  ;;  %6350 = vmatprep.subr.msk.mxu1 %vm7485_vm7, %v10534_v39  ;;  %v10564_v2 = vand.u32 4294901760, %v7548_v57  ;;  %v10572_v4 = vmov 0.0   ;;  %v10574_v49 = vand.u32 4294901760, %v7741_v29 }
  0x64   : > { %v10562_v8 = vsel %vm7918_vm0, 4294967295, %v10561_v8  ;;  %6255 = vmatmul.mubr.f32.gmra.mxu0 %v556_v19  ;;  %6351 = vmatpush3.msk.msra.mxu1 %vm7485_vm7, %v10534_v39  ;;  %v10578_v19 = vand.u32 4294901760, %v7764_v63 }
  0x65   : > { %10563 = vst [vmem:[#allocation51_spill] sm:$0xff] %v10562_v8  ;;  %6257 = vmatprep.mubr.f32.mxu0 %v566_v13  ;;  %6313 = vmatpush3.msra.mxu0 %v7633_v61  ;;  %v10579_v13 = vld [vmem:[#allocation40_spill] sm:$0xff] }
  0x66   : > { %6292 = vmatmul.mubr.f32.gmra.mxu1 %v7754_v52  ;;  %6314 = vmatprep.subr.mxu0 %v7669_v10 }
  0x67   : > { %6315 = vmatpush3.msra.mxu0 %v7669_v10  ;;  %6294 = vmatprep.mubr.f32.mxu1 %v7774_v12 }
  0x68   : > { %6258 = vmatmul.mubr.f32.gmra.mxu0 %v576_v38  ;;  %6352 = vmatprep.subr.msk.mxu1 %vm7527_vm9, %v10534_v39  ;;  %v10582_v38 = vand.u32 4294901760, %v7772_v48 }
  0x69   : > { %6316 = vmatprep.mubr.f32.mxu0 %v7548_v57  ;;  %6380 = vmatprep.subr.mxu0 %v7513_v45  ;;  %v10566_v57 = vand.u32 4294901760, %v7609_v40 }
  0x6a   : > { %6295 = vmatmul.mubr.f32.gmra.mxu1 %v7794_v28 }
  0x6b   : > { %6353 = vmatpush3.msk.msra.mxu1 %vm7527_vm9, %v10534_v39  ;;  %6297 = vmatprep.mubr.f32.mxu1 %v7816_v34 }
  0x6c   : > { %6317 = vmatmul.mubr.f32.vlgmr.msra.gmra.mxu0 %v7579_v17  ;;  %6354 = vmatprep.subr.msk.mxu1 %vm7501_vm8, %v10534_v39  ;;  %v10567_v17 = vand.u32 4294901760, %v7644_v16 }
  0x6d   : > { %6319 = vmatprep.mubr.f32.mxu0 %v7609_v40  ;;  %6355 = vmatpush3.msk.msra.mxu1 %vm7501_vm8, %v10534_v39  ;;  %v10568_v40 = vand.u32 4294901760, %v7676_v18 }
  0x6e   : > { %6381 = vmatpush3.msra.mxu0 %v7513_v45  ;;  %6298 = vmatmul.mubr.f32.gmra.mxu1 %v7844_v3 }
  0x6f   : > { %6356 = vmatprep.mubr.f32.mxu1 %v10564_v2  ;;  %6420 = vmatprep.subr.msk.mxu1 %vm7441_vm2, %v10534_v39  ;;  %v10583_v2 = vld [vmem:[#allocation43_spill] sm:$0xff] }
  0x70   : > { %6320 = vmatmul.mubr.f32.gmra.mxu0 %v7644_v16  ;;  %6382 = vmatprep.subr.mxu0 %v7516_v46  ;;  %v10569_v16 = vand.u32 4294901760, %v7698_v53 }
  0x71   : > { %6322 = vmatprep.mubr.f32.mxu0 %v7676_v18  ;;  %6383 = vmatpush3.msra.mxu0 %v7516_v46  ;;  %v10570_v18 = vand.u32 4294901760, %v7716_v54 }
  0x72   : > { %6357 = vmatmul.mubr.f32.vlgmr.msra.gmra.mxu1 %v10565_v9  ;;  %6384 = vmatprep.subr.mxu0 %v7545_v56  ;;  %v10584_v9 = vld [vmem:[#allocation22_spill] sm:$0xff] }
  0x73   : > { %6421 = vmatpush3.msk.msra.mxu1 %vm7441_vm2, %v10534_v39  ;;  %6359 = vmatprep.mubr.f32.mxu1 %v10566_v57 }
  0x74   : > { %6323 = vmatmul.mubr.f32.gmra.mxu0 %v7698_v53  ;;  %6422 = vmatprep.subr.msk.mxu1 %vm7446_vm3, %v10534_v39  ;;  %v5484_v53 = vsel %vm7825_vm10, 1.0, %v10572_v4 }
  0x75   : > { %6325 = vmatprep.mubr.f32.mxu0 %v7716_v54  ;;  %6423 = vmatpush3.msk.msra.mxu1 %vm7446_vm3, %v10534_v39  ;;  %v10573_v54 = vand.u32 4294901760, %v7735_v33  ;;  %v8022_v1 = vsub.f32 %v5484_v53, %v5484_v53  ;;  %v10589_v53 = vand.u32 4294901760, %v7814_v20 }
  0x76   : > { %6360 = vmatmul.mubr.f32.gmra.mxu1 %v10567_v17  ;;  %6385 = vmatpush3.msra.mxu0 %v7545_v56 }
  0x77   : > { %6362 = vmatprep.mubr.f32.mxu1 %v10568_v40  ;;  %6424 = vmatprep.subr.msk.mxu1 %vm7459_vm4, %v10534_v39  ;;  %10575 = vst [vmem:[#allocation52_spill] sm:$0xff] %v8022_v1  ;;  %v8040_v51 = vand.u32 4294901760, %v8022_v1 }
  0x78   : > { %6326 = vmatmul.mubr.f32.gmra.mxu0 %v7735_v33  ;;  %6425 = vmatpush3.msk.msra.mxu1 %vm7459_vm4, %v10534_v39  ;;  %v10577_v33 = vand.u32 4294901760, %v7760_v36 }
  0x79   : > { %6328 = vmatprep.mubr.f32.mxu0 %v7741_v29  ;;  %6386 = vmatprep.subr.mxu0 %v7555_v58  ;;  %v5483_v29 = vsel %vm7849_vm11, 1.0, %v10572_v4  ;;  %10580 = vst [vmem:[#allocation53_spill] sm:$0xff] %v8040_v51  ;;  %v1832_v57 = vsub.f32 %v8022_v1, %v8040_v51 }
  0x7a   : > { %6363 = vmatmul.mubr.f32.gmra.mxu1 %v10569_v16  ;;  %6387 = vmatpush3.msra.mxu0 %v7555_v58  ;;  %v5481_v16 = vsel %vm7872_vm13, 1.0, %v10572_v4 }
  0x7b   : > { %6365 = vmatprep.mubr.f32.mxu1 %v10570_v18  ;;  %6426 = vmatprep.subr.msk.mxu1 %vm7464_vm5, %v10534_v39  ;;  %v10588_v18 = vld [vmem:[#allocation27_spill] sm:$0xff] }
  0x7c   : > { %6329 = vmatmul.mubr.f32.gmra.mxu0 %v7760_v36  ;;  %6427 = vmatpush3.msk.msra.mxu1 %vm7464_vm5, %v10534_v39  ;;  %v8046_v36 = vsub.f32 %v5483_v29, %v5483_v29  ;;  %v5480_v29 = vsel %vm7891_vm14, 1.0, %v10572_v4 }
  0x7d   : > { %6331 = vmatprep.mubr.f32.mxu0 %v7764_v63  ;;  %6388 = vmatprep.subr.mxu0 %v10571_v0  ;;  %v5482_v63 = vsel %vm7856_vm12, 1.0, %v10572_v4 }
  0x7e   : > { %6366 = vmatmul.mubr.f32.gmra.mxu1 %v10573_v54  ;;  %6389 = vmatpush3.msra.mxu0 %v10571_v0  ;;  %10581 = vst [vmem:[#allocation54_spill] sm:$0xff] %v8046_v36  ;;  %v8068_v17 = vand.u32 4294901760, %v8046_v36  ;;  %v8070_v40 = vsub.f32 %v5482_v63, %v5482_v63  ;;  %v10591_v54 = vand.u32 4294901760, %v7838_v23  ;;  %v193_v63 = vld [vmem:[%s7398_s24 + $0x8] sm:$0xff]  ;;  %v198_v0 = vld [vmem:[%s7398_s24 + $0x90] sm:$0xff] }
  0x7f   : > { %6368 = vmatprep.mubr.f32.mxu1 %v10574_v49  ;;  %6428 = vmatprep.subr.msk.mxu1 %vm7478_vm6, %v10534_v39  ;;  %v8087_v49 = vand.u32 4294901760, %v1832_v57 }
  0x80   : > { %6332 = vmatmul.mubr.f32.gmra.mxu0 %v7772_v48  ;;  %6390 = vmatprep.subr.mxu0 %v10576_v22  ;;  %v10585_v48 = vand.u32 4294901760, %v7792_v21  ;;  %10586 = vst [vmem:[#allocation22_spill] sm:$0xff] %v8068_v17  ;;  %10587 = vst [vmem:[#allocation55_spill] sm:$0xff] %v8070_v40 }
  0x81   : > { %6334 = vmatprep.mubr.f32.mxu0 %v7792_v21  ;;  %6429 = vmatpush3.msk.msra.mxu1 %vm7478_vm6, %v10534_v39  ;;  %v10590_v21 = vld [vmem:[#allocation32_spill] sm:$0xff]  ;;  %10592 = vst [vmem:[#allocation27_spill] sm:$0xff] %v8087_v49 }
  0x82   : > { %6369 = vmatmul.mubr.f32.gmra.mxu1 %v10577_v33  ;;  %6391 = vmatpush3.msra.mxu0 %v10576_v22  ;;  %v8089_v33 = vsub.f32 %v5481_v16, %v5481_v16  ;;  %v197_v22 = vld [vmem:[%s7398_s24 + $0x88] sm:$0xff] }
  0x83   : > { %6371 = vmatprep.mubr.f32.mxu1 %v10578_v19  ;;  %6392 = vmatprep.subr.mxu0 %v10579_v13  ;;  %v10595_v19 = vld [vmem:[#allocation36_spill] sm:$0xff] }
  0x84   : > { %6335 = vmatmul.mubr.f32.gmra.mxu0 %v7814_v20  ;;  %6430 = vmatprep.subr.msk.mxu1 %vm7485_vm7, %v10534_v39  ;;  %10593 = vst [vmem:[#allocation32_spill] sm:$0xff] %v8089_v33  ;;  %v1839_v20 = vsub.f32 %v8046_v36, %v8068_v17  ;;  %v8117_v57 = vand.u32 4294901760, %v8089_v33 }
  0x85   : > { %6337 = vmatprep.mubr.f32.mxu0 %v7838_v23  ;;  %6393 = vmatpush3.msra.mxu0 %v10579_v13  ;;  %v8100_v23 = vand.u32 4294901760, %v8070_v40 }
  0x86   : > { %6372 = vmatmul.mubr.f32.gmra.mxu1 %v10582_v38  ;;  %6394 = vmatprep.subr.mxu0 %v10583_v2  ;;  %v192_v38 = vld [vmem:[%s7398_s24] sm:$0xff]  ;;  %10596 = vst [vmem:[#allocation36_spill] sm:$0xff] %v8117_v57 }
  0x87   : > { %6431 = vmatpush3.msk.msra.mxu1 %vm7485_vm7, %v10534_v39  ;;  %6395 = vmatpush3.msra.mxu0 %v10583_v2  ;;  %10594 = vst [vmem:[#allocation56_spill] sm:$0xff] %v8100_v23 }
  0x88   : > { %6338 = vmatmul.mubr.f32.gmra.mxu0 %v7867_v5  ;;  %6374 = vmatprep.mubr.f32.mxu1 %v10585_v48  ;;  %v8119_v48 = vsub.f32 %v5480_v29, %v5480_v29  ;;  %v8124_v5 = vand.u32 4294901760, %v1839_v20  ;;  %v195_v20 = vld [vmem:[%s7398_s24 + $0x18] sm:$0xff] }
  0x89   : > { %6396 = vmatprep.mubr.f32.mxu0 %v10584_v9  ;;  %6432 = vmatprep.subr.msk.mxu1 %vm7527_vm9, %v10534_v39 }
  0x8a   : > { %6375 = vmatmul.mubr.f32.gmra.mxu1 %v10589_v53  ;;  %6460 = vmatprep.subr.msk.mxu0 %vm7825_vm10, %v10534_v39  ;;  %10597 = vst [vmem:[#allocation57_spill] sm:$0xff] %v8119_v48  ;;  %10598 = vst [vmem:[#allocation58_spill] sm:$0xff] %v8124_v5  ;;  %v194_v53 = vld [vmem:[%s7398_s24 + $0x10] sm:$0xff]  ;;  %v8144_v29 = vand.u32 4294901760, %v8119_v48 }
  0x8b   : > { %6433 = vmatpush3.msk.msra.mxu1 %vm7527_vm9, %v10534_v39  ;;  %6377 = vmatprep.mubr.f32.mxu1 %v10591_v54 }
  0x8c   : > { %6397 = vmatmul.mubr.f32.vlgmr.msra.gmra.mxu0 %v10588_v18  ;;  %6434 = vmatprep.subr.msk.mxu1 %vm7501_vm8, %v10534_v39  ;;  %10601 = vst [vmem:[#allocation59_spill] sm:$0xff] %v8144_v29 }
  0x8d   : > { %6399 = vmatprep.mubr.f32.mxu0 %v10590_v21  ;;  %6435 = vmatpush3.msk.msra.mxu1 %vm7501_vm8, %v10534_v39  ;;  %vm10599_vm8 = vcmask 523264  }
  0x8e   : > { %6378 = vmatmul.mubr.f32.gmra.mxu1 %v574_v6  ;;  %6461 = vmatpush3.msk.msra.mxu0 %vm7825_vm10, %v10534_v39  ;;  %v1846_v6 = vsub.f32 %v8070_v40, %v8100_v23  ;;  %v1532_v16 = vsel %vm10599_vm8, %v192_v38, 0  ;;  %vm10600_vm9 = vmmov %vm10599_vm8  ;;  %v1550_v10 = vsel %vm10599_vm8, %v198_v0, 0  ;;  %v1562_v25 = vsel %vm10599_vm8, %v202_v50, 0 }
  0x8f   : > { %6436 = vmatprep.mubr.f32.mxu1 %v10584_v9  ;;  %6500 = vmatprep.subr.mxu1 %v8087_v49  ;;  %v5479_v9 = vsel %vm7903_vm15, 1.0, %v10572_v4  ;;  %v1535_v54 = vsel %vm10600_vm9, %v193_v63, 0  ;;  %v1538_v63 = vsel %vm10599_vm8, %v194_v53, 0  ;;  %vm10604_vm9 = vmmov %vm10599_vm8  ;;  %v8237_v44 = vand.u32 4294901760, %v1550_v10 }
  0x90   : > { %6400 = vmatmul.mubr.f32.gmra.mxu0 %v10595_v19  ;;  %6462 = vmatprep.subr.msk.mxu0 %vm7849_vm11, %v10534_v39  ;;  %v8146_v38 = vsub.f32 %v5479_v9, %v5479_v9  ;;  %v8159_v2 = vand.u32 4294901760, %v1535_v54  ;;  %v196_v9 = vld [vmem:[%s7398_s24 + $0x80] sm:$0xff]  ;;  %v1541_v53 = vsel %vm10604_vm9, %v195_v20, 0  ;;  %v8170_v13 = vand.u32 4294901760, %v1538_v63  ;;  %vm10609_vm9 = vmmov %vm10599_vm8 }
  0x91   : > { %6402 = vmatprep.mubr.f32.mxu0 %v7660_v41  ;;  %6463 = vmatpush3.msk.msra.mxu0 %vm7849_vm11, %v10534_v39  ;;  %v1544_v58 = vsel %vm10599_vm8, %v196_v9, 0  ;;  %v8196_v46 = vand.u32 4294901760, %v1541_v53 }
  0x92   : > { %6437 = vmatmul.mubr.f32.vlgmr.msra.gmra.mxu1 %v10588_v18  ;;  %10602 = vst [vmem:[#allocation60_spill] sm:$0xff] %v8146_v38  ;;  %v8148_v18 = vand.u32 4294901760, %v1532_v16  ;;  %6464 = vmatprep.subr.msk.mxu0 %vm7856_vm12, %v10534_v39  ;;  %v8181_v20 = vand.u32 4294901760, %v8146_v38  ;;  %v8194_v56 = vsub.f32 %v1535_v54, %v8159_v2  ;;  %v8210_v54 = vsub.f32 %v1538_v63, %v8170_v13  ;;  %v200_v63 = vld [vmem:[%s7398_s24 + $0x100] sm:$0xff] }
  0x93   : > { %6501 = vmatpush3.msra.mxu1 %v8087_v49  ;;  %6439 = vmatprep.mubr.f32.mxu1 %v10590_v21  ;;  %v8155_v21 = vand.u32 4294901760, %v1846_v6  ;;  %v1853_v49 = vsub.f32 %v8089_v33, %v8117_v57  ;;  %v5478_v6 = vsel %vm7918_vm0, 1.0, %v10572_v4  ;;  %v1556_v60 = vsel %vm10599_vm8, %v200_v63, 0 }
  0x94   : > { %6403 = vmatmul.mubr.f32.gmra.mxu0 %v7678_v43  ;;  %6502 = vmatprep.subr.mxu1 %v8124_v5  ;;  %10605 = vst [vmem:[#allocation62_spill] sm:$0xff] %v8181_v20  ;;  %v8203_v9 = vsub.f32 %v5478_v6, %v5478_v6  ;;  %v1867_v0 = vsub.f32 %v8146_v38, %v8181_v20  ;;  %v8284_v35 = vand.u32 4294901760, %v1556_v60 }
  0x95   : > { %6405 = vmatprep.mubr.f32.mxu0 %v7700_v11  ;;  %10603 = vst [vmem:[#allocation61_spill] sm:$0xff] %v8155_v21  ;;  %6503 = vmatpush3.msra.mxu1 %v8124_v5  ;;  %v8184_v5 = vsub.f32 %v1532_v16, %v8148_v18  ;;  %v5477_v16 = vsel %vm7425_vm1, 1.0, %v10572_v4  ;;  %v8212_v4 = vand.u32 4294901760, %v1544_v58 }
  0x96   : > { %6440 = vmatmul.mubr.f32.gmra.mxu1 %v10595_v19  ;;  %6465 = vmatpush3.msk.msra.mxu0 %vm7856_vm12, %v10534_v39  ;;  %v1860_v19 = vsub.f32 %v8119_v48, %v8144_v29  ;;  %10608 = vst [vmem:[#allocation64_spill] sm:$0xff] %v8203_v9  ;;  %v8223_v6 = vsub.f32 %v5477_v16, %v5477_v16  ;;  %v8242_v16 = vand.u32 4294901760, %v8203_v9 }
  0x97   : > { %6442 = vmatprep.mubr.f32.mxu1 %v7660_v41  ;;  %6504 = vmatprep.subr.mxu1 %v8155_v21  ;;  %v8191_v41 = vand.u32 4294901760, %v1853_v49  ;;  %v1547_v49 = vsel %vm10609_vm9, %v197_v22, 0  ;;  %vm10613_vm9 = vmmov %vm10599_vm8 }
  0x98   : > { %6406 = vmatmul.mubr.f32.gmra.mxu0 %v7719_v62  ;;  %6466 = vmatprep.subr.msk.mxu0 %vm7872_vm13, %v10534_v39  ;;  %10611 = vst [vmem:[#allocation66_spill] sm:$0xff] %v8223_v6  ;;  %v8235_v61 = vand.u32 4294901760, %v1547_v49  ;;  %10612 = vst [vmem:[#allocation67_spill] sm:$0xff] %v8242_v16  ;;  %v8262_v42 = vand.u32 4294901760, %v8223_v6 }
  0x99   : > { %6408 = vmatprep.mubr.f32.mxu0 %v7725_v14  ;;  %10606 = vst [vmem:[#allocation63_spill] sm:$0xff] %v8191_v41  ;;  %6505 = vmatpush3.msra.mxu1 %v8155_v21  ;;  %v199_v21 = vld [vmem:[%s7398_s24 + $0x98] sm:$0xff] }
  0x9a   : > { %6443 = vmatmul.mubr.f32.gmra.mxu1 %v7678_v43  ;;  %6467 = vmatpush3.msk.msra.mxu0 %vm7872_vm13, %v10534_v39  ;;  %v8218_v43 = vand.u32 4294901760, %v1860_v19  ;;  %v8233_v19 = vsub.f32 %v1541_v53, %v8196_v46  ;;  %v8248_v53 = vsub.f32 %v1544_v58, %v8212_v4  ;;  %v1553_v22 = vsel %vm10613_vm9, %v199_v21, 0  ;;  %10616 = vst [vmem:[#allocation69_spill] sm:$0xff] %v8262_v42  ;;  %v201_v58 = vld [vmem:[%s7398_s24 + $0x108] sm:$0xff]  ;;  %vm10619_vm9 = vmmov %vm10599_vm8 }
  0x9b   : > { %6445 = vmatprep.mubr.f32.mxu1 %v7700_v11  ;;  %6506 = vmatprep.subr.mxu1 %v8191_v41  ;;  %v8274_v63 = vsub.f32 %v1547_v49, %v8235_v61  ;;  %v8282_v37 = vand.u32 4294901760, %v1553_v22  ;;  %v1874_v49 = vsub.f32 %v8203_v9, %v8242_v16  ;;  %v1881_v30 = vsub.f32 %v8223_v6, %v8262_v42  ;;  %v205_v16 = vld [vmem:[%s7398_s24 + $0x188] sm:$0xff] }
  0x9c   : > { %6409 = vmatmul.mubr.f32.gmra.mxu0 %v7744_v32  ;;  %10610 = vst [vmem:[#allocation65_spill] sm:$0xff] %v8218_v43  ;;  %6468 = vmatprep.subr.msk.mxu0 %vm7891_vm14, %v10534_v39  ;;  %v8319_v42 = vsub.f32 %v1556_v60, %v8284_v35  ;;  %v8333_v60 = vand.u32 4294901760, %v1562_v25 }
  0x9d   : > { %6411 = vmatprep.mubr.f32.mxu0 %v7746_v55  ;;  %6507 = vmatpush3.msra.mxu1 %v8191_v41  ;;  %v10615_v41 = vand.u32 4294901760, %v8184_v5  ;;  %v8316_v50 = vsub.f32 %v1553_v22, %v8282_v37  ;;  %v10623_v22 = vand.u32 4294901760, %v8248_v53 }
  0x9e   : > { %6446 = vmatmul.mubr.f32.gmra.mxu1 %v7719_v62  ;;  %6469 = vmatpush3.msk.msra.mxu0 %vm7891_vm14, %v10534_v39  ;;  %v8256_v62 = vand.u32 4294901760, %v1867_v0 }
  0x9f   : > { %6448 = vmatprep.mubr.f32.mxu1 %v7725_v14  ;;  %v1655_v11 = vsub.f32 %v8184_v5, %v10615_v41  ;;  %6508 = vmatprep.subr.mxu1 %v8218_v43  ;;  %v10617_v14 = vand.u32 4294901760, %v8194_v56  ;;  %v8277_v41 = vsub.f32 %v1550_v10, %v8237_v44  ;;  %v1695_v24 = vsub.f32 %v8248_v53, %v10623_v22 }
  0xa0   : > { %6412 = vmatmul.mubr.f32.gmra.mxu0 %v7754_v52  ;;  %10614 = vst [vmem:[#allocation68_spill] sm:$0xff] %v8256_v62  ;;  %6470 = vmatprep.subr.msk.mxu0 %vm7903_vm15, %v10534_v39 }
  0xa1   : > { %6414 = vmatprep.mubr.f32.mxu0 %v7774_v12  ;;  %v1665_v21 = vsub.f32 %v8194_v56, %v10617_v14  ;;  %6509 = vmatpush3.msra.mxu1 %v8218_v43  ;;  %v10618_v14 = vand.u32 4294901760, %v8210_v54  ;;  %v1656_v43 = vand.u32 4294901760, %v1655_v11  ;;  %v204_v11 = vld [vmem:[%s7398_s24 + $0x180] sm:$0xff] }
  0xa2   : > { %6449 = vmatmul.mubr.f32.gmra.mxu1 %v7744_v32  ;;  %v1559_v32 = vsel %vm10619_vm9, %v201_v58, 0  ;;  %6471 = vmatpush3.msk.msra.mxu0 %vm7903_vm15, %v10534_v39  ;;  %vm10621_vm9 = vmmov %vm10599_vm8 }
  0xa3   : > { %v1675_v10 = vsub.f32 %v8210_v54, %v10618_v14  ;;  %6451 = vmatprep.mubr.f32.mxu1 %v7746_v55  ;;  %6472 = vmatprep.subr.msk.mxu0 %vm7918_vm0, %v10534_v39  ;;  %v1666_v58 = vand.u32 4294901760, %v1665_v21  ;;  %v10620_v14 = vand.u32 4294901760, %v8233_v19  ;;  %v8321_v21 = vand.u32 4294901760, %v1559_v32 }
  0xa4   : > { %6415 = vmatmul.mubr.f32.gmra.mxu0 %v7794_v28  ;;  %6510 = vmatprep.subr.mxu1 %v8256_v62  ;;  %v8328_v55 = vand.u32 4294901760, %v1874_v49  ;;  %v8344_v49 = vand.u32 4294901760, %v1881_v30  ;;  %v10392_v30 = vand.u32 4294901760, %v8319_v42 }
  0xa5   : > { %6417 = vmatprep.mubr.f32.mxu0 %v7816_v34  ;;  %v1685_v0 = vsub.f32 %v8233_v19, %v10620_v14  ;;  %v1565_v14 = vsel %vm10621_vm9, %v203_v31, 0  ;;  %6473 = vmatpush3.msk.msra.mxu0 %vm7918_vm0, %v10534_v39  ;;  %v1568_v31 = vsel %vm10599_vm8, %v204_v11, 0  ;;  %v206_v11 = vld [vmem:[%s7398_s24 + $0x190] sm:$0xff]  ;;  %v8359_v57 = vsub.f32 %v1559_v32, %v8321_v21  ;;  %vm10627_vm9 = vmmov %vm10599_vm8 }
  0xa6   : > { %6452 = vmatmul.mubr.f32.gmra.mxu1 %v7754_v52  ;;  %10622 = vst [vmem:[#allocation70_spill] sm:$0xff] %v8328_v55  ;;  %v1676_v52 = vand.u32 4294901760, %v1675_v10  ;;  %6474 = vmatprep.subr.msk.mxu0 %vm7425_vm1, %v10534_v39  ;;  %10624 = vst [vmem:[#allocation71_spill] sm:$0xff] %v8344_v49  ;;  %v10625_v10 = vand.u32 4294901760, %v8274_v63  ;;  %v8365_v23 = vand.u32 4294901760, %v1568_v31 }
  0xa7   : > { %6511 = vmatpush3.msra.mxu1 %v8256_v62  ;;  %6475 = vmatpush3.msk.msra.mxu0 %vm7425_vm1, %v10534_v39  ;;  %v10626_v62 = vand.u32 4294901760, %v8277_v41  ;;  %v1686_v29 = vand.u32 4294901760, %v1685_v0  ;;  %v207_v0 = vld [vmem:[%s7398_s24 + $0x198] sm:$0xff] }
  0xa8   : > { %6418 = vmatmul.mubr.f32.gmra.mxu0 %v7844_v3  ;;  %6454 = vmatprep.mubr.f32.mxu1 %v7774_v12  ;;  %v1705_v22 = vsub.f32 %v8274_v63, %v10625_v10  ;;  %v10393_v12 = vand.u32 4294901760, %v8316_v50  ;;  %v1696_v10 = vand.u32 4294901760, %v1695_v24 }
  0xa9   : > { %6476 = vmatprep.mubr.f32.mxu0 %v1656_v43  ;;  %v1715_v20 = vsub.f32 %v8277_v41, %v10626_v62  ;;  %v8352_v43 = vand.u32 4294901760, %v1565_v14  ;;  %6512 = vmatprep.subr.mxu1 %v8328_v55  ;;  %v8363_v62 = vsub.f32 %v1562_v25, %v8333_v60 }
  0xaa   : > { %6455 = vmatmul.mubr.f32.gmra.mxu1 %v7794_v28  ;;  %v1574_v28 = vsel %vm10599_vm8, %v206_v11, 0  ;;  %6540 = vmatprep.subr.mxu0 %v8022_v1  ;;  %v1706_v32 = vand.u32 4294901760, %v1705_v22 }
  0xab   : > { %6513 = vmatpush3.msra.mxu1 %v8328_v55  ;;  %6457 = vmatprep.mubr.f32.mxu1 %v7816_v34  ;;  %v1716_v24 = vand.u32 4294901760, %v1715_v20  ;;  %v8375_v25 = vsub.f32 %v1565_v14, %v8352_v43  ;;  %v1735_v34 = vsub.f32 %v8319_v42, %v10392_v30  ;;  %v10394_v20 = vand.u32 4294901760, %v8363_v62 }
  0xac   : > { %6477 = vmatmul.mubr.f32.vlgmr.msra.gmra.mxu0 %v1666_v58  ;;  %v1571_v58 = vsel %vm10627_vm9, %v205_v16, 0  ;;  %6514 = vmatprep.subr.mxu1 %v8344_v49  ;;  %v1725_v16 = vsub.f32 %v8316_v50, %v10393_v12  ;;  %vm10628_vm9 = vmmov %vm10599_vm8 }
  0xad   : > { %6479 = vmatprep.mubr.f32.mxu0 %v1676_v52  ;;  %v10395_v52 = vand.u32 4294901760, %v8359_v57  ;;  %v8385_v11 = vand.u32 4294901760, %v1571_v58  ;;  %6515 = vmatpush3.msra.mxu1 %v8344_v49  ;;  %v1577_v14 = vsel %vm10628_vm9, %v207_v0, 0  ;;  %v1736_v12 = vand.u32 4294901760, %v1735_v34  ;;  %vm10652_vm9 = vmmov %vm10599_vm8  ;;  %v10682_v49 = vld [vmem:[#allocation15_spill] sm:$0xff] }
  0xae   : > { %6458 = vmatmul.mubr.f32.gmra.mxu1 %v7844_v3  ;;  %v8392_v3 = vand.u32 4294901760, %v1574_v28  ;;  %6541 = vmatpush3.msra.mxu0 %v8022_v1  ;;  %v8409_v30 = vand.u32 4294901760, %v1577_v14  ;;  %v10681_v1 = vld [vmem:[#allocation45_spill] sm:$0xff] }
  0xaf   : > { %6516 = vmatprep.mubr.f32.mxu1 %v8148_v18  ;;  %6580 = vmatprep.subr.msk.mxu1 %vm7825_vm10, %v10534_v39  ;;  %v8407_v0 = vsub.f32 %v1571_v58, %v8385_v11 }
  0xb0   : > { %6480 = vmatmul.mubr.f32.gmra.mxu0 %v1686_v29  ;;  %v8390_v29 = vsub.f32 %v1568_v31, %v8365_v23  ;;  %6542 = vmatprep.subr.mxu0 %v8046_v36  ;;  %v1726_v31 = vand.u32 4294901760, %v1725_v16  ;;  %v8419_v22 = vsub.f32 %v1574_v28, %v8392_v3 }
  0xb1   : > { %6482 = vmatprep.mubr.f32.mxu0 %v1696_v10  ;;  %v1745_v10 = vsub.f32 %v8359_v57, %v10395_v52  ;;  %6543 = vmatpush3.msra.mxu0 %v8046_v36  ;;  %v1784_v28 = vand.u32 4294901760, %v8407_v0 }
  0xb2   : > { %6517 = vmatmul.mubr.f32.vlgmr.msra.gmra.mxu1 %v8159_v2  ;;  %v10396_v16 = vand.u32 4294901760, %v8390_v29  ;;  %6544 = vmatprep.subr.mxu0 %v8070_v40 }
  0xb3   : > { %6581 = vmatpush3.msk.msra.mxu1 %vm7825_vm10, %v10534_v39  ;;  %6519 = vmatprep.mubr.f32.mxu1 %v8170_v13  ;;  %v1746_v58 = vand.u32 4294901760, %v1745_v10  ;;  %v1794_v10 = vand.u32 4294901760, %v8419_v22 }
  0xb4   : > { %6483 = vmatmul.mubr.f32.gmra.mxu0 %v1706_v32  ;;  %v1755_v32 = vsub.f32 %v8363_v62, %v10394_v20  ;;  %6582 = vmatprep.subr.msk.mxu1 %vm7849_vm11, %v10534_v39  ;;  %v8433_v20 = vsub.f32 %v1577_v14, %v8409_v30  ;;  %v1785_v14 = vsub.f32 %v8407_v0, %v1784_v28 }
  0xb5   : > { %6485 = vmatprep.mubr.f32.mxu0 %v1716_v24  ;;  %v10629_v24 = vand.u32 4294901760, %v8375_v25  ;;  %6583 = vmatpush3.msk.msra.mxu1 %vm7849_vm11, %v10534_v39 }
  0xb6   : > { %6520 = vmatmul.mubr.f32.gmra.mxu1 %v8196_v46  ;;  %v1756_v52 = vand.u32 4294901760, %v1755_v32  ;;  %6545 = vmatpush3.msra.mxu0 %v8070_v40  ;;  %v1804_v32 = vand.u32 4294901760, %v8433_v20 }
  0xb7   : > { %v1765_v34 = vsub.f32 %v8375_v25, %v10629_v24  ;;  %6522 = vmatprep.mubr.f32.mxu1 %v8212_v4  ;;  %6584 = vmatprep.subr.msk.mxu1 %vm7856_vm12, %v10534_v39 }
  0xb8   : > { %6486 = vmatmul.mubr.f32.gmra.mxu0 %v1726_v31  ;;  %v1775_v31 = vsub.f32 %v8390_v29, %v10396_v16  ;;  %6546 = vmatprep.subr.mxu0 %v8089_v33  ;;  %v1795_v16 = vsub.f32 %v8419_v22, %v1794_v10 }
  0xb9   : > { %6488 = vmatprep.mubr.f32.mxu0 %v1736_v12  ;;  %v1766_v12 = vand.u32 4294901760, %v1765_v34  ;;  %6585 = vmatpush3.msk.msra.mxu1 %vm7856_vm12, %v10534_v39 }
  0xba   : > { %6523 = vmatmul.mubr.f32.gmra.mxu1 %v8235_v61  ;;  %v1776_v24 = vand.u32 4294901760, %v1775_v31  ;;  %6547 = vmatpush3.msra.mxu0 %v8089_v33  ;;  %v1796_v34 = vand.u32 4294901760, %v1795_v16  ;;  %v10630_v16 = vand.u32 4294901760, %v8184_v5 }
  0xbb   : > { %6525 = vmatprep.mubr.f32.mxu1 %v8237_v44  ;;  %6586 = vmatprep.subr.msk.mxu1 %vm7872_vm13, %v10534_v39 }
  0xbc   : > { %6489 = vmatmul.mubr.f32.gmra.mxu0 %v1746_v58  ;;  %6548 = vmatprep.subr.mxu0 %v8119_v48  ;;  %v1786_v58 = vand.u32 4294901760, %v1785_v14  ;;  %v10633_v14 = vld [vmem:[#allocation56_spill] sm:$0xff] }
  0xbd   : > { %6491 = vmatprep.mubr.f32.mxu0 %v1756_v52  ;;  %v1805_v52 = vsub.f32 %v8433_v20, %v1804_v32  ;;  %6587 = vmatpush3.msk.msra.mxu1 %vm7872_vm13, %v10534_v39 }
  0xbe   : > { %6526 = vmatmul.mubr.f32.gmra.mxu1 %v8282_v37  ;;  %6549 = vmatpush3.msra.mxu0 %v8119_v48 }
  0xbf   : > { %6528 = vmatprep.mubr.f32.mxu1 %v8284_v35  ;;  %6588 = vmatprep.subr.msk.mxu1 %vm7891_vm14, %v10534_v39  ;;  %v1806_v31 = vand.u32 4294901760, %v1805_v52  ;;  %v10642_v52 = vld [vmem:[#allocation62_spill] sm:$0xff] }
  0xc0   : > { %6492 = vmatmul.mubr.f32.gmra.mxu0 %v1766_v12  ;;  %6550 = vmatprep.subr.mxu0 %v8146_v38  ;;  %v10631_v12 = vand.u32 4294901760, %v8194_v56 }
  0xc1   : > { %6494 = vmatprep.mubr.f32.mxu0 %v1776_v24  ;;  %6589 = vmatpush3.msk.msra.mxu1 %vm7891_vm14, %v10534_v39  ;;  %v10636_v24 = vld [vmem:[#allocation36_spill] sm:$0xff] }
  0xc2   : > { %6529 = vmatmul.mubr.f32.gmra.mxu1 %v8321_v21  ;;  %6551 = vmatpush3.msra.mxu0 %v8146_v38  ;;  %v5586_v38 = vld [vmem:[%s7398_s24 + $0x1e8] sm:$0xff] }
  0xc3   : > { %6531 = vmatprep.mubr.f32.mxu1 %v8333_v60  ;;  %6552 = vmatprep.subr.mxu0 %v8203_v9 }
  0xc4   : > { %6495 = vmatmul.mubr.f32.gmra.mxu0 %v1786_v58  ;;  %6590 = vmatprep.subr.msk.mxu1 %vm7903_vm15, %v10534_v39  ;;  %v10639_v58 = vld [vmem:[#allocation59_spill] sm:$0xff] }
  0xc5   : > { %6497 = vmatprep.mubr.f32.mxu0 %v1796_v34  ;;  %6553 = vmatpush3.msra.mxu0 %v8203_v9  ;;  %v10645_v34 = vld [vmem:[#allocation67_spill] sm:$0xff] }
  0xc6   : > { %6532 = vmatmul.mubr.f32.gmra.mxu1 %v8352_v43  ;;  %6554 = vmatprep.subr.mxu0 %v8223_v6 }
  0xc7   : > { %6591 = vmatpush3.msk.msra.mxu1 %vm7903_vm15, %v10534_v39  ;;  %6555 = vmatpush3.msra.mxu0 %v8223_v6 }
  0xc8   : > { %6498 = vmatmul.mubr.f32.gmra.mxu0 %v1806_v31  ;;  %6534 = vmatprep.mubr.f32.mxu1 %v8365_v23  ;;  %v10648_v31 = vand.u32 4294901760, %v8390_v29 }
  0xc9   : > { %6556 = vmatprep.mubr.f32.mxu0 %v8184_v5  ;;  %6592 = vmatprep.subr.msk.mxu1 %vm7918_vm0, %v10534_v39  ;;  %v10632_v5 = vand.u32 4294901760, %v8210_v54 }
  0xca   : > { %6535 = vmatmul.mubr.f32.gmra.mxu1 %v8385_v11  ;;  %6620 = vmatprep.subr.mxu0 %v8040_v51 }
  0xcb   : > { %6593 = vmatpush3.msk.msra.mxu1 %vm7918_vm0, %v10534_v39  ;;  %6537 = vmatprep.mubr.f32.mxu1 %v8392_v3 }
  0xcc   : > { %6557 = vmatmul.mubr.f32.vlgmr.msra.gmra.mxu0 %v8194_v56  ;;  %6594 = vmatprep.subr.msk.mxu1 %vm7425_vm1, %v10534_v39  ;;  %v10634_v56 = vand.u32 4294901760, %v8233_v19 }
  0xcd   : > { %6559 = vmatprep.mubr.f32.mxu0 %v8210_v54  ;;  %6595 = vmatpush3.msk.msra.mxu1 %vm7425_vm1, %v10534_v39  ;;  %v10635_v54 = vand.u32 4294901760, %v8248_v53 }
  0xce   : > { %6538 = vmatmul.mubr.f32.gmra.mxu1 %v8409_v30  ;;  %6621 = vmatpush3.msra.mxu0 %v8040_v51  ;;  %v10674_v51 = vld [vmem:[#allocation18_spill] sm:$0xff] }
  0xcf   : > { %6596 = vmatprep.mubr.f32.mxu1 %v10630_v16  ;;  %6660 = vmatprep.subr.msk.mxu1 %vm7825_vm10, %v10534_v39 }
  0xd0   : > { %6560 = vmatmul.mubr.f32.gmra.mxu0 %v8233_v19  ;;  %6622 = vmatprep.subr.mxu0 %v8068_v17  ;;  %v10637_v19 = vand.u32 4294901760, %v8274_v63 }
  0xd1   : > { %6562 = vmatprep.mubr.f32.mxu0 %v8248_v53  ;;  %6623 = vmatpush3.msra.mxu0 %v8068_v17  ;;  %v10638_v53 = vand.u32 4294901760, %v8277_v41  ;;  %v5585_v17 = vld [vmem:[%s7398_s24 + $0x1e0] sm:$0xff] }
  0xd2   : > { %6597 = vmatmul.mubr.f32.vlgmr.msra.gmra.mxu1 %v10631_v12  ;;  %6624 = vmatprep.subr.mxu0 %v10633_v14  ;;  %v5576_v12 = vld [vmem:[%s7398_s24 + $0x78] sm:$0xff] }
  0xd3   : > { %6661 = vmatpush3.msk.msra.mxu1 %vm7825_vm10, %v10534_v39  ;;  %6599 = vmatprep.mubr.f32.mxu1 %v10632_v5  ;;  %v10653_v5 = vld [vmem:[#allocation30_spill] sm:$0xff] }
  0xd4   : > { %6563 = vmatmul.mubr.f32.gmra.mxu0 %v8274_v63  ;;  %6662 = vmatprep.subr.msk.mxu1 %vm7849_vm11, %v10534_v39  ;;  %v10640_v63 = vand.u32 4294901760, %v8316_v50 }
  0xd5   : > { %6565 = vmatprep.mubr.f32.mxu0 %v8277_v41  ;;  %6663 = vmatpush3.msk.msra.mxu1 %vm7849_vm11, %v10534_v39  ;;  %v10641_v41 = vand.u32 4294901760, %v8319_v42 }
  0xd6   : > { %6600 = vmatmul.mubr.f32.gmra.mxu1 %v10634_v56  ;;  %6625 = vmatpush3.msra.mxu0 %v10633_v14 }
  0xd7   : > { %6602 = vmatprep.mubr.f32.mxu1 %v10635_v54  ;;  %6664 = vmatprep.subr.msk.mxu1 %vm7856_vm12, %v10534_v39  ;;  %v5577_v54 = vld [vmem:[%s7398_s24 + $0xe0] sm:$0xff] }
  0xd8   : > { %6566 = vmatmul.mubr.f32.gmra.mxu0 %v8316_v50  ;;  %6626 = vmatprep.subr.mxu0 %v10636_v24  ;;  %v10643_v50 = vand.u32 4294901760, %v8359_v57 }
  0xd9   : > { %6568 = vmatprep.mubr.f32.mxu0 %v8319_v42  ;;  %6665 = vmatpush3.msk.msra.mxu1 %vm7856_vm12, %v10534_v39  ;;  %v10644_v42 = vand.u32 4294901760, %v8363_v62 }
  0xda   : > { %6603 = vmatmul.mubr.f32.gmra.mxu1 %v10637_v19  ;;  %6627 = vmatpush3.msra.mxu0 %v10636_v24  ;;  %v10671_v24 = vld [vmem:[#allocation42_spill] sm:$0xff] }
  0xdb   : > { %6605 = vmatprep.mubr.f32.mxu1 %v10638_v53  ;;  %6666 = vmatprep.subr.msk.mxu1 %vm7872_vm13, %v10534_v39  ;;  %v5578_v53 = vld [vmem:[%s7398_s24 + $0xe8] sm:$0xff] }
  0xdc   : > { %6569 = vmatmul.mubr.f32.gmra.mxu0 %v8359_v57  ;;  %6628 = vmatprep.subr.mxu0 %v10639_v58  ;;  %v10646_v57 = vand.u32 4294901760, %v8375_v25 }
  0xdd   : > { %6571 = vmatprep.mubr.f32.mxu0 %v8363_v62  ;;  %6667 = vmatpush3.msk.msra.mxu1 %vm7872_vm13, %v10534_v39  ;;  %v10647_v62 = vld [vmem:[#allocation69_spill] sm:$0xff] }
  0xde   : > { %6606 = vmatmul.mubr.f32.gmra.mxu1 %v10640_v63  ;;  %6629 = vmatpush3.msra.mxu0 %v10639_v58 }
  0xdf   : > { %6608 = vmatprep.mubr.f32.mxu1 %v10641_v41  ;;  %6668 = vmatprep.subr.msk.mxu1 %vm7891_vm14, %v10534_v39  ;;  %v5579_v41 = vld [vmem:[%s7398_s24 + $0xf0] sm:$0xff] }
  0xe0   : > { %6572 = vmatmul.mubr.f32.gmra.mxu0 %v8375_v25  ;;  %6630 = vmatprep.subr.mxu0 %v10642_v52 }
  0xe1   : > { %6574 = vmatprep.mubr.f32.mxu0 %v8390_v29  ;;  %6669 = vmatpush3.msk.msra.mxu1 %vm7891_vm14, %v10534_v39  ;;  %v5573_v29 = vld [vmem:[%s7398_s24 + $0x60] sm:$0xff] }
  0xe2   : > { %6609 = vmatmul.mubr.f32.gmra.mxu1 %v10643_v50  ;;  %6631 = vmatpush3.msra.mxu0 %v10642_v52  ;;  %v10656_v50 = vld [vmem:[#allocation33_spill] sm:$0xff] }
  0xe3   : > { %6611 = vmatprep.mubr.f32.mxu1 %v10644_v42  ;;  %6632 = vmatprep.subr.mxu0 %v10645_v34 }
  0xe4   : > { %6575 = vmatmul.mubr.f32.gmra.mxu0 %v8407_v0  ;;  %6670 = vmatprep.subr.msk.mxu1 %vm7903_vm15, %v10534_v39  ;;  %v10650_v0 = vld [vmem:[#allocation29_spill] sm:$0xff] }
  0xe5   : > { %6577 = vmatprep.mubr.f32.mxu0 %v8419_v22  ;;  %6633 = vmatpush3.msra.mxu0 %v10645_v34  ;;  %v5574_v22 = vld [vmem:[%s7398_s24 + $0x68] sm:$0xff] }
  0xe6   : > { %6612 = vmatmul.mubr.f32.gmra.mxu1 %v10646_v57  ;;  %6634 = vmatprep.subr.mxu0 %v10647_v62 }
  0xe7   : > { %6671 = vmatpush3.msk.msra.mxu1 %vm7903_vm15, %v10534_v39  ;;  %6635 = vmatpush3.msra.mxu0 %v10647_v62  ;;  %v5583_v62 = vld [vmem:[%s7398_s24 + $0x170] sm:$0xff] }
  0xe8   : > { %6578 = vmatmul.mubr.f32.gmra.mxu0 %v8433_v20  ;;  %6614 = vmatprep.mubr.f32.mxu1 %v10648_v31 }
  0xe9   : > { %6636 = vmatprep.mubr.f32.mxu0 %v8148_v18  ;;  %6672 = vmatprep.subr.msk.mxu1 %vm7918_vm0, %v10534_v39 }
  0xea   : > { %6615 = vmatmul.mubr.f32.gmra.mxu1 %v1784_v28  ;;  %6700 = vmatprep.subr.msk.mxu0 %vm7441_vm2, %v10534_v39  ;;  %v2812_v28 = vsel %vm10599_vm8, %v5573_v29, 0 }
  0xeb   : > { %6673 = vmatpush3.msk.msra.mxu1 %vm7918_vm0, %v10534_v39  ;;  %6617 = vmatprep.mubr.f32.mxu1 %v1794_v10  ;;  %v5575_v10 = vld [vmem:[%s7398_s24 + $0x70] sm:$0xff]  ;;  %vm10676_vm0 = vmmov %vm10599_vm8 }
  0xec   : > { %6637 = vmatmul.mubr.f32.vlgmr.msra.gmra.mxu0 %v8159_v2  ;;  %6674 = vmatprep.subr.msk.mxu1 %vm7425_vm1, %v10534_v39  ;;  %v2818_v16 = vsel %vm10599_vm8, %v5575_v10, 0  ;;  %v5581_v10 = vld [vmem:[%s7398_s24 + $0x160] sm:$0xff]  ;;  %v2848_v9 = vsel %vm10676_vm0, %v5585_v17, 0 }
  0xed   : > { %6639 = vmatprep.mubr.f32.mxu0 %v8170_v13  ;;  %6675 = vmatpush3.msk.msra.mxu1 %vm7425_vm1, %v10534_v39  ;;  %vm10675_vm1 = vnez %v10674_v51 }
  0xee   : > { %6618 = vmatmul.mubr.f32.gmra.mxu1 %v1804_v32  ;;  %6701 = vmatpush3.msk.msra.mxu0 %vm7441_vm2, %v10534_v39  ;;  %v8652_v32 = vand.u32 4294901760, %v2812_v28 }
  0xef   : > { %6676 = vmatprep.mubr.f32.mxu1 %v8148_v18  ;;  %6740 = vmatprep.subr.mxu1 %v10650_v0  ;;  %v2815_v18 = vsel %vm10652_vm9, %v5574_v22, 0  ;;  %vm10655_vm9 = vmmov %vm10599_vm8 }
  0xf0   : > { %6640 = vmatmul.mubr.f32.gmra.mxu0 %v8196_v46  ;;  %6702 = vmatprep.subr.msk.mxu0 %vm7446_vm3, %v10534_v39  ;;  %v8660_v56 = vand.u32 4294901760, %v2815_v18  ;;  %v2821_v19 = vsel %vm10655_vm9, %v5576_v12, 0  ;;  %v8676_v63 = vsub.f32 %v2812_v28, %v8652_v32  ;;  %vm10658_vm9 = vmmov %vm10599_vm8  ;;  %v5580_v28 = vld [vmem:[%s7398_s24 + $0xf8] sm:$0xff]  ;;  %v2836_v12 = vsel %vm10599_vm8, %v5581_v10, 0 }
  0xf1   : > { %6642 = vmatprep.mubr.f32.mxu0 %v8212_v4  ;;  %6703 = vmatpush3.msk.msra.mxu0 %vm7446_vm3, %v10534_v39  ;;  %v8689_v57 = vand.u32 4294901760, %v2821_v19  ;;  %v2827_v31 = vsel %vm10658_vm9, %v5578_v53, 0  ;;  %vm10663_vm9 = vmmov %vm10599_vm8  ;;  %v8756_v52 = vand.u32 4294901760, %v2836_v12 }
  0xf2   : > { %6677 = vmatmul.mubr.f32.vlgmr.msra.gmra.mxu1 %v8159_v2  ;;  %6704 = vmatprep.subr.msk.mxu0 %vm7459_vm4, %v10534_v39  ;;  %v2833_v53 = vsel %vm10663_vm9, %v5580_v28, 0  ;;  %v10664_v28 = vld [vmem:[#allocation37_spill] sm:$0xff]  ;;  %vm10667_vm9 = vmmov %vm10599_vm8 }
  0xf3   : > { %6741 = vmatpush3.msra.mxu1 %v10650_v0  ;;  %6679 = vmatprep.mubr.f32.mxu1 %v8170_v13  ;;  %v8667_v13 = vand.u32 4294901760, %v2818_v16  ;;  %v2830_v0 = vsel %vm10599_vm8, %v5579_v41, 0  ;;  %v8747_v41 = vand.u32 4294901760, %v2833_v53 }
  0xf4   : > { %6643 = vmatmul.mubr.f32.gmra.mxu0 %v8235_v61  ;;  %6742 = vmatprep.subr.mxu1 %v10653_v5 }
  0xf5   : > { %6645 = vmatprep.mubr.f32.mxu0 %v8237_v44  ;;  %6743 = vmatpush3.msra.mxu1 %v10653_v5  ;;  %v8695_v29 = vsub.f32 %v2818_v16, %v8667_v13  ;;  %v8712_v5 = vand.u32 4294901760, %v2827_v31 }
  0xf6   : > { %6680 = vmatmul.mubr.f32.gmra.mxu1 %v8196_v46  ;;  %6705 = vmatpush3.msk.msra.mxu0 %vm7459_vm4, %v10534_v39  ;;  %v2824_v46 = vsel %vm10599_vm8, %v5577_v54, 0  ;;  %v8719_v54 = vand.u32 4294901760, %v2830_v0 }
  0xf7   : > { %6682 = vmatprep.mubr.f32.mxu1 %v8212_v4  ;;  %6744 = vmatprep.subr.mxu1 %v10656_v50  ;;  %v8685_v4 = vsub.f32 %v2815_v18, %v8660_v56  ;;  %v8697_v22 = vand.u32 4294901760, %v2824_v46  ;;  %v10659_v18 = vld [vmem:[#allocation34_spill] sm:$0xff]  ;;  %10661 = vst [vmem:[#allocation10_spill] sm:$0xff] %v8712_v5 }
  0xf8   : > { %6646 = vmatmul.mubr.f32.gmra.mxu0 %v8282_v37  ;;  %6706 = vmatprep.subr.msk.mxu0 %vm7464_vm5, %v10534_v39  ;;  %10662 = vst [vmem:[#allocation29_spill] sm:$0xff] %v8719_v54  ;;  %v8754_v34 = vsub.f32 %v2830_v0, %v8719_v54 }
  0xf9   : > { %6648 = vmatprep.mubr.f32.mxu0 %v8284_v35  ;;  %6745 = vmatpush3.msra.mxu1 %v10656_v50  ;;  %v8726_v50 = vsub.f32 %v2824_v46, %v8697_v22  ;;  %v10666_v46 = vand.u32 4294901760, %v8685_v4 }
  0xfa   : > { %6683 = vmatmul.mubr.f32.gmra.mxu1 %v8235_v61  ;;  %6707 = vmatpush3.msk.msra.mxu0 %vm7464_vm5, %v10534_v39  ;;  %v10398_v61 = vand.u32 4294901760, %v8676_v63  ;;  %v10678_v33 = vand.u32 4294901760, %v8754_v34 }
  0xfb   : > { %6685 = vmatprep.mubr.f32.mxu1 %v8237_v44  ;;  %6746 = vmatprep.subr.mxu1 %v10659_v18  ;;  %v8717_v44 = vsub.f32 %v2821_v19, %v8689_v57  ;;  %v2945_v10 = vsub.f32 %v8685_v4, %v10666_v46 }
  0xfc   : > { %6649 = vmatmul.mubr.f32.gmra.mxu0 %v8321_v21  ;;  %6708 = vmatprep.subr.msk.mxu0 %vm7478_vm6, %v10534_v39  ;;  %v2935_v19 = vsub.f32 %v8676_v63, %v10398_v61  ;;  %v2842_v61 = vsel %vm10599_vm8, %v5583_v62, 0 }
  0xfd   : > { %6651 = vmatprep.mubr.f32.mxu0 %v8333_v60  ;;  %6747 = vmatpush3.msra.mxu1 %v10659_v18  ;;  %v10672_v62 = vand.u32 4294901760, %v8717_v44  ;;  %v8798_v6 = vand.u32 4294901760, %v2842_v61 }
  0xfe   : > { %6686 = vmatmul.mubr.f32.gmra.mxu1 %v8282_v37  ;;  %v5582_v37 = vld [vmem:[%s7398_s24 + $0x168] sm:$0xff]  ;;  %6709 = vmatpush3.msk.msra.mxu0 %vm7478_vm6, %v10534_v39  ;;  %v2936_v0 = vand.u32 4294901760, %v2935_v19 }
  0xff   : > { %6688 = vmatprep.mubr.f32.mxu1 %v8284_v35  ;;  %6748 = vmatprep.subr.mxu1 %v10664_v28  ;;  %v8745_v35 = vsub.f32 %v2827_v31, %v8712_v5  ;;  %v2839_v46 = vsel %vm10667_vm9, %v5582_v37, 0  ;;  %v10668_v31 = vand.u32 4294901760, %v8695_v29  ;;  %v5584_v37 = vld [vmem:[%s7398_s24 + $0x178] sm:$0xff]  ;;  %v2965_v19 = vsub.f32 %v8717_v44, %v10672_v62 }
 0x100   : > { %6652 = vmatmul.mubr.f32.gmra.mxu0 %v8352_v43  ;;  %6710 = vmatprep.subr.msk.mxu0 %vm7485_vm7, %v10534_v39  ;;  %v8779_v14 = vand.u32 4294901760, %v2839_v46  ;;  %v2845_v62 = vsel %vm10599_vm8, %v5584_v37, 0  ;;  %v8827_v37 = vsub.f32 %v2842_v61, %v8798_v6  ;;  %vm10680_vm8 = vmmov %vm10676_vm0 }
 0x101   : > { %6654 = vmatprep.mubr.f32.mxu0 %v8365_v23  ;;  %6749 = vmatpush3.msra.mxu1 %v10664_v28  ;;  %v2955_v58 = vsub.f32 %v8695_v29, %v10668_v31  ;;  %v10669_v28 = vld [vmem:[#allocation23_spill] sm:$0xff]  ;;  %v8789_v31 = vsub.f32 %v2836_v12, %v8756_v52  ;;  %v2966_v48 = vand.u32 4294901760, %v2965_v19  ;;  %v8823_v36 = vand.u32 4294901760, %v2845_v62  ;;  %v5588_v19 = vld [vmem:[%s7398_s24 + $0x1f8] sm:$0xff] }
 0x102   : > { %6689 = vmatmul.mubr.f32.gmra.mxu1 %v8321_v21  ;;  %6711 = vmatpush3.msk.msra.mxu0 %vm7485_vm7, %v10534_v39  ;;  %vm10670_vm9 = vnez %v10669_v28  ;;  %v8777_v21 = vsub.f32 %v2833_v53, %v8747_v41 }
 0x103   : > { %6691 = vmatprep.mubr.f32.mxu1 %v8333_v60  ;;  %6712 = vmatprep.subr.msk.mxu0 %vm10670_vm9, %v10534_v39  ;;  %v2946_v60 = vand.u32 4294901760, %v2945_v10  ;;  %v2956_v53 = vand.u32 4294901760, %v2955_v58 }
 0x104   : > { %6655 = vmatmul.mubr.f32.gmra.mxu0 %v8385_v11  ;;  %6750 = vmatprep.subr.mxu1 %v10671_v24  ;;  %v10683_v61 = vand.u32 4294901760, %v8777_v21 }
 0x105   : > { %6657 = vmatprep.mubr.f32.mxu0 %v8392_v3  ;;  %6713 = vmatpush3.msk.msra.mxu0 %vm10670_vm9, %v10534_v39 }
 0x106   : > { %6692 = vmatmul.mubr.f32.gmra.mxu1 %v8352_v43  ;;  %v10673_v43 = vand.u32 4294901760, %v8726_v50  ;;  %6714 = vmatprep.subr.msk.mxu0 %vm10675_vm1, %v10534_v39 }
 0x107   : > { %6751 = vmatpush3.msra.mxu1 %v10671_v24  ;;  %6715 = vmatpush3.msk.msra.mxu0 %vm10675_vm1, %v10534_v39  ;;  %v10677_v24 = vand.u32 4294901760, %v8745_v35 }
 0x108   : > { %6658 = vmatmul.mubr.f32.gmra.mxu0 %v8409_v30  ;;  %v2975_v10 = vsub.f32 %v8726_v50, %v10673_v43  ;;  %6694 = vmatprep.mubr.f32.mxu1 %v8365_v23  ;;  %v8815_v43 = vsub.f32 %v2839_v46, %v8779_v14  ;;  %v2995_v23 = vsub.f32 %v8754_v34, %v10678_v33 }
 0x109   : > { %6716 = vmatprep.mubr.f32.mxu0 %v2936_v0  ;;  %v6238_v12 = vpop.f32.mrf.mxu0  ;;  %v2985_v58 = vsub.f32 %v8745_v35, %v10677_v24  ;;  %v5587_v0 = vld [vmem:[%s7398_s24 + $0x1f0] sm:$0xff]  ;;  %v10679_v24 = vld [vmem:[#allocation44_spill] sm:$0xff]  ;;  %6780 = vmatprep.subr.mxu0 %v10682_v49 }
 0x10a   : > { %6695 = vmatmul.mubr.f32.gmra.mxu1 %v8385_v11  ;;  %6752 = vmatprep.subr.mxu1 %v10679_v24  ;;  %v2976_v46 = vand.u32 4294901760, %v2975_v10  ;;  %v2851_v11 = vsel %vm10676_vm0, %v5586_v38, 0  ;;  %v2854_v33 = vsel %vm10680_vm8, %v5587_v0, 0  ;;  %v3005_v10 = vsub.f32 %v8777_v21, %v10683_v61  ;;  %vm10743_vm8 = vmmov %vm10676_vm0 }
 0x10b   : > { %v428_v17 = vpop.f32.mrf.mxu0  ;;  %6753 = vmatpush3.msra.mxu1 %v10679_v24  ;;  %6697 = vmatprep.mubr.f32.mxu1 %v8392_v3  ;;  %v10437_v55 = vand.u32 4294901760, %v8815_v43  ;;  %v2996_v38 = vand.u32 4294901760, %v2995_v23  ;;  %v10684_v3 = vand.u32 4294901760, %v8789_v31  ;;  %v8847_v24 = vsub.f32 %v2845_v62, %v8823_v36  ;;  %v10686_v62 = vld [vmem:[#allocation17_spill] sm:$0xff] }
 0x10c   : > { %6717 = vmatmul.mubr.f32.vlgmr.msra.gmra.mxu0 %v2946_v60  ;;  %v8829_v60 = vand.u32 4294901760, %v2848_v9  ;;  %6754 = vmatprep.subr.mxu1 %v10681_v1  ;;  %v8849_v45 = vand.u32 4294901760, %v2851_v11  ;;  %v2857_v23 = vsel %vm10676_vm0, %v5588_v19, 0 }
 0x10d   : > { %6719 = vmatprep.mubr.f32.mxu0 %v2956_v53  ;;  %v2986_v53 = vand.u32 4294901760, %v2985_v58  ;;  %v3015_v0 = vsub.f32 %v8789_v31, %v10684_v3  ;;  %6755 = vmatpush3.msra.mxu1 %v10681_v1  ;;  %v3006_v1 = vand.u32 4294901760, %v3005_v10  ;;  %v8873_v8 = vand.u32 4294901760, %v2857_v23 }
 0x10e   : > { %v6241_v40 = vpop.f32.mrf.mxu0  ;;  %6698 = vmatmul.mubr.f32.gmra.mxu1 %v8409_v30  ;;  %10685 = vst [vmem:[#allocation11_spill] sm:$0xff] %v8849_v45  ;;  %v8856_v30 = vand.u32 4294901760, %v2854_v33  ;;  %6781 = vmatpush3.msra.mxu0 %v10682_v49  ;;  %v8871_v49 = vsub.f32 %v2851_v11, %v8849_v45 }
 0x10f   : > { %6756 = vmatprep.mubr.f32.mxu1 %v8652_v32  ;;  %6820 = vmatprep.subr.msk.mxu1 %vm7441_vm2, %v10534_v39  ;;  %v3016_v19 = vand.u32 4294901760, %v3015_v0  ;;  %10687 = vst [vmem:[#allocation30_spill] sm:$0xff] %v8873_v8  ;;  %v10690_v0 = vand.u32 4294901760, %v8847_v24 }
 0x110   : > { %6720 = vmatmul.mubr.f32.gmra.mxu0 %v2966_v48  ;;  %v448_v58 = vpop.f32.mrf.mxu0  ;;  %v8854_v48 = vsub.f32 %v2848_v9, %v8829_v60  ;;  %6782 = vmatprep.subr.mxu0 %v10686_v62  ;;  %v3025_v9 = vsub.f32 %v8815_v43, %v10437_v55  ;;  %v8885_v55 = vsub.f32 %v2854_v33, %v8856_v30 }
 0x111   : > { %6722 = vmatprep.mubr.f32.mxu0 %v2976_v46  ;;  %6783 = vmatpush3.msra.mxu0 %v10686_v62  ;;  %v3045_v15 = vsub.f32 %v8847_v24, %v10690_v0  ;;  %v10448_v62 = vand.u32 4294901760, %v8871_v49 }
 0x112   : > { %v6278_v3 = vpop.f32.mrf.mxu1  ;;  %6757 = vmatmul.mubr.f32.vlgmr.msra.gmra.mxu1 %v8660_v56  ;;  %v3026_v33 = vand.u32 4294901760, %v3025_v9  ;;  %v10691_v47 = vand.u32 4294901760, %v8854_v48  ;;  %v10449_v26 = vand.u32 4294901760, %v8885_v55 }
 0x113   : > { %v8875_v7 = vadd.f32 %v6278_v3, %v6238_v12  ;;  %6821 = vmatpush3.msk.msra.mxu1 %vm7441_vm2, %v10534_v39  ;;  %6759 = vmatprep.mubr.f32.mxu1 %v8667_v13 }
 0x114   : > { %v6244_v46 = vpop.f32.mrf.mxu0  ;;  %6723 = vmatmul.mubr.f32.gmra.mxu0 %v2986_v53  ;;  %v10688_v53 = vand.u32 4294901760, %v8827_v37  ;;  %v689_v61 = vpop.f32.mrf.mxu1  ;;  %6822 = vmatprep.subr.msk.mxu1 %vm7446_vm3, %v10534_v39  ;;  %v3055_v9 = vsub.f32 %v8854_v48, %v10691_v47  ;;  %v3046_v47 = vand.u32 4294901760, %v3045_v15 }
 0x115   : > { %6725 = vmatprep.mubr.f32.mxu0 %v2996_v38  ;;  %v8889_v12 = vadd.f32 %v689_v61, %v428_v17  ;;  %v10689_v38 = vld [vmem:[#allocation21_spill] sm:$0xff]  ;;  %v8901_v17 = vsub.f32 %v2857_v23, %v8873_v8  ;;  %6823 = vmatpush3.msk.msra.mxu1 %vm7446_vm3, %v10534_v39  ;;  %v10692_v23 = vld [vmem:[#allocation24_spill] sm:$0xff] }
 0x116   : > { %v3035_v10 = vsub.f32 %v8827_v37, %v10688_v53  ;;  %v468_v11 = vpop.f32.mrf.mxu0  ;;  %6784 = vmatprep.subr.mxu0 %v10689_v38  ;;  %v6281_v53 = vpop.f32.mrf.mxu1  ;;  %6760 = vmatmul.mubr.f32.gmra.mxu1 %v8689_v57 }
 0x117   : > { %v8903_v61 = vadd.f32 %v6281_v53, %v6241_v40  ;;  %6762 = vmatprep.mubr.f32.mxu1 %v8697_v22  ;;  %6785 = vmatpush3.msra.mxu0 %v10689_v38  ;;  %v3065_v53 = vsub.f32 %v8871_v49, %v10448_v62  ;;  %v10452_v38 = vand.u32 4294901760, %v8901_v17 }
 0x118   : > { %v6247_v3 = vpop.f32.mrf.mxu0  ;;  %6726 = vmatmul.mubr.f32.gmra.mxu0 %v3006_v1  ;;  %v3036_v1 = vand.u32 4294901760, %v3035_v10  ;;  %v701_v27 = vpop.f32.mrf.mxu1  ;;  %6824 = vmatprep.subr.msk.mxu1 %vm7459_vm4, %v10534_v39 }
 0x119   : > { %6728 = vmatprep.mubr.f32.mxu0 %v3016_v19  ;;  %v8914_v40 = vadd.f32 %v701_v27, %v448_v58  ;;  %6786 = vmatprep.subr.mxu0 %v10692_v23  ;;  %v3056_v58 = vand.u32 4294901760, %v3055_v9 }
 0x11a   : > { %v488_v0 = vpop.f32.mrf.mxu0  ;;  %v6284_v10 = vpop.f32.mrf.mxu1  ;;  %6763 = vmatmul.mubr.f32.gmra.mxu1 %v8712_v5  ;;  %6787 = vmatpush3.msra.mxu0 %v10692_v23 }
 0x11b   : > { %v8925_v27 = vadd.f32 %v6284_v10, %v6244_v46  ;;  %6825 = vmatpush3.msk.msra.mxu1 %vm7459_vm4, %v10534_v39  ;;  %6765 = vmatprep.mubr.f32.mxu1 %v8719_v54  ;;  %v10693_v46 = vld [vmem:[#allocation28_spill] sm:$0xff]  ;;  %v3066_v10 = vand.u32 4294901760, %v3065_v53 }
 0x11c   : > { %v6250_v19 = vpop.f32.mrf.mxu0  ;;  %6729 = vmatmul.mubr.f32.gmra.mxu0 %v3026_v33  ;;  %v3075_v33 = vsub.f32 %v8885_v55, %v10449_v26  ;;  %v713_v15 = vpop.f32.mrf.mxu1  ;;  %6826 = vmatprep.subr.msk.mxu1 %vm7464_vm5, %v10534_v39  ;;  %v3085_v26 = vsub.f32 %v8901_v17, %v10452_v38 }
 0x11d   : > { %6731 = vmatprep.mubr.f32.mxu0 %v3036_v1  ;;  %v8935_v62 = vadd.f32 %v713_v15, %v468_v11  ;;  %6788 = vmatprep.subr.mxu0 %v10693_v46 }
 0x11e   : > { %v508_v5 = vpop.f32.mrf.mxu0  ;;  %v6287_v9 = vpop.f32.mrf.mxu1  ;;  %6766 = vmatmul.mubr.f32.gmra.mxu1 %v8747_v41  ;;  %v3076_v11 = vand.u32 4294901760, %v3075_v33  ;;  %6789 = vmatpush3.msra.mxu0 %v10693_v46 }
 0x11f   : > { %v8945_v54 = vadd.f32 %v6287_v9, %v6247_v3  ;;  %6827 = vmatpush3.msk.msra.mxu1 %vm7464_vm5, %v10534_v39  ;;  %6768 = vmatprep.mubr.f32.mxu1 %v8756_v52  ;;  %v10694_v3 = vld [vmem:[#allocation35_spill] sm:$0xff] }
 0x120   : > { %v6253_v1 = vpop.f32.mrf.mxu0  ;;  %6732 = vmatmul.mubr.f32.gmra.mxu0 %v3046_v47  ;;  %v725_v15 = vpop.f32.mrf.mxu1  ;;  %6828 = vmatprep.subr.msk.mxu1 %vm7478_vm6, %v10534_v39 }
 0x121   : > { %6734 = vmatprep.mubr.f32.mxu0 %v3056_v58  ;;  %v8952_v47 = vadd.f32 %v725_v15, %v488_v0  ;;  %6790 = vmatprep.subr.mxu0 %v10694_v3  ;;  %v3086_v58 = vand.u32 4294901760, %v3085_v26 }
 0x122   : > { %v528_v23 = vpop.f32.mrf.mxu0  ;;  %v6290_v9 = vpop.f32.mrf.mxu1  ;;  %6769 = vmatmul.mubr.f32.gmra.mxu1 %v8779_v14  ;;  %6791 = vmatpush3.msra.mxu0 %v10694_v3  ;;  %v10696_v3 = vld [vmem:[#allocation41_spill] sm:$0xff] }
 0x123   : > { %v8959_v33 = vadd.f32 %v6290_v9, %v6250_v19  ;;  %6829 = vmatpush3.msk.msra.mxu1 %vm7478_vm6, %v10534_v39  ;;  %6771 = vmatprep.mubr.f32.mxu1 %v8798_v6 }
 0x124   : > { %v6256_v53 = vpop.f32.mrf.mxu0  ;;  %6735 = vmatmul.mubr.f32.gmra.mxu0 %v3066_v10  ;;  %v737_v46 = vpop.f32.mrf.mxu1  ;;  %v10695_v10 = vld [vmem:[#allocation38_spill] sm:$0xff]  ;;  %6830 = vmatprep.subr.msk.mxu1 %vm7485_vm7, %v10534_v39 }
 0x125   : > { %6737 = vmatprep.mubr.f32.mxu0 %v3076_v11  ;;  %v8966_v15 = vadd.f32 %v737_v46, %v508_v5  ;;  %6792 = vmatprep.subr.mxu0 %v10695_v10 }
 0x126   : > { %v548_v0 = vpop.f32.mrf.mxu0  ;;  %v6293_v19 = vpop.f32.mrf.mxu1  ;;  %6772 = vmatmul.mubr.f32.gmra.mxu1 %v8823_v36  ;;  %6793 = vmatpush3.msra.mxu0 %v10695_v10 }
 0x127   : > { %v8973_v11 = vadd.f32 %v6293_v19, %v6253_v1  ;;  %6831 = vmatpush3.msk.msra.mxu1 %vm7485_vm7, %v10534_v39  ;;  %6794 = vmatprep.subr.mxu0 %v10696_v3 }
 0x128   : > { %v6259_v26 = vpop.f32.mrf.mxu0  ;;  %6738 = vmatmul.mubr.f32.gmra.mxu0 %v3086_v58  ;;  %v749_v9 = vpop.f32.mrf.mxu1  ;;  %6774 = vmatprep.mubr.f32.mxu1 %v8829_v60 }
 0x129   : > { %6796 = vmatprep.mubr.f32.mxu0 %v8676_v63  ;;  %v8981_v46 = vadd.f32 %v749_v9, %v528_v23  ;;  %6795 = vmatpush3.msra.mxu0 %v10696_v3 }
 0x12a   : > { %v568_v5 = vpop.f32.mrf.mxu0  ;;  %v6296_v58 = vpop.f32.mrf.mxu1  ;;  %6775 = vmatmul.mubr.f32.gmra.mxu1 %v8849_v45  ;;  %6832 = vmatprep.subr.msk.mxu1 %vm10670_vm9, %v10534_v39 }
 0x12b   : > { %v8988_v19 = vadd.f32 %v6296_v58, %v6256_v53  ;;  %6833 = vmatpush3.msk.msra.mxu1 %vm10670_vm9, %v10534_v39  ;;  %6777 = vmatprep.mubr.f32.mxu1 %v8856_v30 }
 0x12c   : > { %v6318_v1 = vpop.f32.mrf.mxu0  ;;  %6797 = vmatmul.mubr.f32.vlgmr.msra.gmra.mxu0 %v8685_v4  ;;  %v761_v3 = vpop.f32.mrf.mxu1  ;;  %6834 = vmatprep.subr.msk.mxu1 %vm10675_vm1, %v10534_v39 }
 0x12d   : > { %v875_v10 = vadd.f32 %v6318_v1, %v8875_v7  ;;  %6799 = vmatprep.mubr.f32.mxu0 %v8695_v29  ;;  %v8999_v38 = vadd.f32 %v761_v3, %v548_v0  ;;  %v10697_v7 = vld [vmem:[#allocation19_spill] sm:$0xff]  ;;  %6835 = vmatpush3.msk.msra.mxu1 %vm10675_vm1, %v10534_v39 }
 0x12e   : > { %v867_v23 = vpop.f32.mrf.mxu0  ;;  %6860 = vmatprep.subr.mxu0 %v10697_v7  ;;  %v6299_v1 = vpop.f32.mrf.mxu1  ;;  %6778 = vmatmul.mubr.f32.gmra.mxu1 %v8873_v8 }
 0x12f   : > { %v868_v9 = vadd.f32 %v867_v23, %v8889_v12  ;;  %v9008_v45 = vadd.f32 %v6299_v1, %v6259_v26  ;;  %v10698_v23 = vand.u32 4294901760, %v8676_v63  ;;  %6861 = vmatpush3.msra.mxu0 %v10697_v7  ;;  %6900 = vmatprep.subr.msk.mxu1 %vm7441_vm2, %v10534_v39  ;;  %v10700_v1 = vand.u32 4294901760, %v8685_v4 }
 0x130   : > { %v6321_v53 = vpop.f32.mrf.mxu0  ;;  %6800 = vmatmul.mubr.f32.gmra.mxu0 %v8717_v44  ;;  %v773_v0 = vpop.f32.mrf.mxu1 }
 0x131   : > { %v889_v58 = vadd.f32 %v6321_v53, %v8903_v61  ;;  %6802 = vmatprep.mubr.f32.mxu0 %v8726_v50  ;;  %6836 = vmatprep.mubr.f32.mxu1 %v10698_v23  ;;  %v9018_v8 = vadd.f32 %v773_v0, %v568_v5  ;;  %v10699_v61 = vld [vmem:[#allocation20_spill] sm:$0xff]  ;;  %v10703_v23 = vand.u32 4294901760, %v8717_v44 }
 0x132   : > { %v881_v12 = vpop.f32.mrf.mxu0  ;;  %6862 = vmatprep.subr.mxu0 %v10699_v61  ;;  %v6358_v53 = vpop.f32.mrf.mxu1  ;;  %6837 = vmatmul.mubr.f32.vlgmr.msra.gmra.mxu1 %v10700_v1  ;;  %v10706_v1 = vand.u32 4294901760, %v8745_v35 }
 0x133   : > { %v882_v3 = vadd.f32 %v881_v12, %v8914_v40  ;;  %v9028_v7 = vadd.f32 %v6358_v53, %v875_v10  ;;  %6901 = vmatpush3.msk.msra.mxu1 %vm7441_vm2, %v10534_v39  ;;  %v10701_v12 = vand.u32 4294901760, %v8695_v29  ;;  %6863 = vmatpush3.msra.mxu0 %v10699_v61  ;;  %vm10721_vm2 = vmmov %vm10676_vm0 }
 0x134   : > { %v6324_v26 = vpop.f32.mrf.mxu0  ;;  %6803 = vmatmul.mubr.f32.gmra.mxu0 %v8745_v35  ;;  %v1053_v5 = vpop.f32.mrf.mxu1  ;;  %6902 = vmatprep.subr.msk.mxu1 %vm7446_vm3, %v10534_v39 }
 0x135   : > { %v903_v63 = vadd.f32 %v6324_v26, %v8925_v27  ;;  %6805 = vmatprep.mubr.f32.mxu0 %v8754_v34  ;;  %6839 = vmatprep.mubr.f32.mxu1 %v10701_v12  ;;  %v9038_v0 = vadd.f32 %v1053_v5, %v868_v9  ;;  %v10702_v27 = vld [vmem:[#allocation25_spill] sm:$0xff]  ;;  %v10704_v26 = vand.u32 4294901760, %v8726_v50  ;;  %v10707_v5 = vand.u32 4294901760, %v8754_v34 }
 0x136   : > { %v895_v40 = vpop.f32.mrf.mxu0  ;;  %6864 = vmatprep.subr.mxu0 %v10702_v27  ;;  %v6361_v10 = vpop.f32.mrf.mxu1  ;;  %6840 = vmatmul.mubr.f32.gmra.mxu1 %v10703_v23 }
 0x137   : > { %v896_v4 = vadd.f32 %v895_v40, %v8935_v62  ;;  %v9048_v61 = vadd.f32 %v6361_v10, %v889_v58  ;;  %6903 = vmatpush3.msk.msra.mxu1 %vm7446_vm3, %v10534_v39  ;;  %6842 = vmatprep.mubr.f32.mxu1 %v10704_v26  ;;  %v10710_v10 = vand.u32 4294901760, %v8789_v31  ;;  %vm10727_vm3 = vmmov %vm10676_vm0 }
 0x138   : > { %v6327_v25 = vpop.f32.mrf.mxu0  ;;  %6806 = vmatmul.mubr.f32.gmra.mxu0 %v8777_v21  ;;  %v1069_v9 = vpop.f32.mrf.mxu1  ;;  %6904 = vmatprep.subr.msk.mxu1 %vm7459_vm4, %v10534_v39 }
 0x139   : > { %v917_v29 = vadd.f32 %v6327_v25, %v8945_v54  ;;  %6808 = vmatprep.mubr.f32.mxu0 %v8789_v31  ;;  %6865 = vmatpush3.msra.mxu0 %v10702_v27  ;;  %v9058_v53 = vadd.f32 %v1069_v9, %v882_v3  ;;  %v10705_v54 = vld [vmem:[#allocation26_spill] sm:$0xff]  ;;  %v10709_v27 = vand.u32 4294901760, %v8777_v21 }
 0x13a   : > { %v909_v62 = vpop.f32.mrf.mxu0  ;;  %6866 = vmatprep.subr.mxu0 %v10705_v54  ;;  %v6364_v58 = vpop.f32.mrf.mxu1  ;;  %6843 = vmatmul.mubr.f32.gmra.mxu1 %v10706_v1 }
 0x13b   : > { %v910_v44 = vadd.f32 %v909_v62, %v8952_v47  ;;  %v9068_v40 = vadd.f32 %v6364_v58, %v903_v63  ;;  %6905 = vmatpush3.msk.msra.mxu1 %vm7459_vm4, %v10534_v39  ;;  %6845 = vmatprep.mubr.f32.mxu1 %v10707_v5  ;;  %v10712_v62 = vand.u32 4294901760, %v8815_v43  ;;  %v10715_v58 = vand.u32 4294901760, %v8847_v24  ;;  %vm10730_vm4 = vmmov %vm10676_vm0 }
 0x13c   : > { %v6330_v20 = vpop.f32.mrf.mxu0  ;;  %6809 = vmatmul.mubr.f32.gmra.mxu0 %v8815_v43  ;;  %v1085_v3 = vpop.f32.mrf.mxu1  ;;  %6906 = vmatprep.subr.msk.mxu1 %vm7464_vm5, %v10534_v39 }
 0x13d   : > { %v931_v50 = vadd.f32 %v6330_v20, %v8959_v33  ;;  %6811 = vmatprep.mubr.f32.mxu0 %v8827_v37  ;;  %6867 = vmatpush3.msra.mxu0 %v10705_v54  ;;  %v9078_v12 = vadd.f32 %v1085_v3, %v896_v4  ;;  %v10708_v33 = vld [vmem:[#allocation31_spill] sm:$0xff] }
 0x13e   : > { %v923_v47 = vpop.f32.mrf.mxu0  ;;  %6868 = vmatprep.subr.mxu0 %v10708_v33  ;;  %v6367_v63 = vpop.f32.mrf.mxu1  ;;  %6846 = vmatmul.mubr.f32.gmra.mxu1 %v10709_v27 }
 0x13f   : > { %v924_v35 = vadd.f32 %v923_v47, %v8966_v15  ;;  %v9088_v25 = vadd.f32 %v6367_v63, %v917_v29  ;;  %6907 = vmatpush3.msk.msra.mxu1 %vm7464_vm5, %v10534_v39  ;;  %6848 = vmatprep.mubr.f32.mxu1 %v10710_v10  ;;  %v5557_v63 = vld [vmem:[%s7398_s24 + $0x40] sm:$0xff]  ;;  %vm10731_vm5 = vmmov %vm10676_vm0 }
 0x140   : > { %v6333_v2 = vpop.f32.mrf.mxu0  ;;  %6812 = vmatmul.mubr.f32.gmra.mxu0 %v8847_v24  ;;  %v1101_v4 = vpop.f32.mrf.mxu1  ;;  %6908 = vmatprep.subr.msk.mxu1 %vm7478_vm6, %v10534_v39  ;;  %v4042_v10 = vsel %vm10721_vm2, %v5557_v63, 0  ;;  %vm10749_vm2 = vmmov %vm10676_vm0 }
 0x141   : > { %v945_v34 = vadd.f32 %v6333_v2, %v8973_v11  ;;  %6814 = vmatprep.mubr.f32.mxu0 %v8854_v48  ;;  %6869 = vmatpush3.msra.mxu0 %v10708_v33  ;;  %v9098_v23 = vadd.f32 %v1101_v4, %v910_v44  ;;  %v10711_v11 = vld [vmem:[#allocation39_spill] sm:$0xff]  ;;  %v10713_v44 = vand.u32 4294901760, %v8827_v37 }
 0x142   : > { %v937_v15 = vpop.f32.mrf.mxu0  ;;  %6870 = vmatprep.subr.mxu0 %v10711_v11  ;;  %v6370_v29 = vpop.f32.mrf.mxu1  ;;  %6849 = vmatmul.mubr.f32.gmra.mxu1 %v10712_v62 }
 0x143   : > { %v938_v21 = vadd.f32 %v937_v15, %v8981_v46  ;;  %v9108_v9 = vadd.f32 %v6370_v29, %v931_v50  ;;  %6909 = vmatpush3.msk.msra.mxu1 %vm7478_vm6, %v10534_v39  ;;  %6871 = vmatpush3.msra.mxu0 %v10711_v11  ;;  %v10716_v50 = vld [vmem:[#allocation43_spill] sm:$0xff]  ;;  %v5558_v15 = vld [vmem:[%s7398_s24 + $0x48] sm:$0xff]  ;;  %vm10734_vm6 = vmmov %vm10676_vm0 }
 0x144   : > { %v6336_v42 = vpop.f32.mrf.mxu0  ;;  %6815 = vmatmul.mubr.f32.gmra.mxu0 %v8871_v49  ;;  %v1117_v26 = vpop.f32.mrf.mxu1  ;;  %6851 = vmatprep.mubr.f32.mxu1 %v10713_v44  ;;  %v10722_v29 = vld [vmem:[#allocation27_spill] sm:$0xff] }
 0x145   : > { %v959_v31 = vadd.f32 %v6336_v42, %v8988_v19  ;;  %6817 = vmatprep.mubr.f32.mxu0 %v8885_v55  ;;  %v9118_v54 = vadd.f32 %v1117_v26, %v924_v35  ;;  %v10714_v19 = vld [vmem:[#allocation40_spill] sm:$0xff]  ;;  %6910 = vmatprep.subr.msk.mxu1 %vm7485_vm7, %v10534_v39  ;;  %v10718_v35 = vand.u32 4294901760, %v8871_v49  ;;  %v10719_v49 = vand.u32 4294901760, %v8885_v55 }
 0x146   : > { %v951_v46 = vpop.f32.mrf.mxu0  ;;  %6872 = vmatprep.subr.mxu0 %v10714_v19  ;;  %v6373_v20 = vpop.f32.mrf.mxu1  ;;  %6852 = vmatmul.mubr.f32.gmra.mxu1 %v10715_v58  ;;  %v10720_v55 = vand.u32 4294901760, %v8901_v17  ;;  %v9194_v26 = vand.u32 4294901760, %v4042_v10 }
 0x147   : > { %v952_v43 = vadd.f32 %v951_v46, %v8999_v38  ;;  %v9128_v1 = vadd.f32 %v6373_v20, %v945_v34  ;;  %6873 = vmatpush3.msra.mxu0 %v10714_v19  ;;  %6911 = vmatpush3.msk.msra.mxu1 %vm7485_vm7, %v10534_v39  ;;  %vm10735_vm7 = vmmov %vm10676_vm0 }
 0x148   : > { %v6339_v16 = vpop.f32.mrf.mxu0  ;;  %6818 = vmatmul.mubr.f32.gmra.mxu0 %v8901_v17  ;;  %6874 = vmatprep.subr.mxu0 %v10716_v50  ;;  %v1133_v47 = vpop.f32.mrf.mxu1  ;;  %v5559_v17 = vld [vmem:[%s7398_s24 + $0x50] sm:$0xff] }
 0x149   : > { %v973_v37 = vadd.f32 %v6339_v16, %v9008_v45  ;;  %6876 = vmatprep.mubr.f32.mxu0 %v8652_v32  ;;  %v9137_v24 = vadd.f32 %v1133_v47, %v938_v21  ;;  %6875 = vmatpush3.msra.mxu0 %v10716_v50  ;;  %v10717_v45 = vand.u32 4294901760, %v8854_v48  ;;  %v4048_v19 = vsel %vm10727_vm3, %v5559_v17, 0  ;;  %v5561_v47 = vld [vmem:[%s7398_s24 + $0xc0] sm:$0xff]  ;;  %vm10757_vm3 = vmmov %vm10676_vm0 }
 0x14a   : > { %v965_v38 = vpop.f32.mrf.mxu0  ;;  %v6376_v18 = vpop.f32.mrf.mxu1  ;;  %6912 = vmatprep.subr.msk.mxu1 %vm10670_vm9, %v10534_v39  ;;  %6940 = vmatprep.subr.msk.mxu0 %vm7825_vm10, %v10534_v39 }
 0x14b   : > { %v966_v3 = vadd.f32 %v965_v38, %v9018_v8  ;;  %6854 = vmatprep.mubr.f32.mxu1 %v10717_v45  ;;  %v9146_v2 = vadd.f32 %v6376_v18, %v959_v31  ;;  %6913 = vmatpush3.msk.msra.mxu1 %vm10670_vm9, %v10534_v39  ;;  %v10728_v38 = vld [vmem:[#allocation58_spill] sm:$0xff]  ;;  %v9220_v45 = vsub.f32 %v4042_v10, %v9194_v26  ;;  %v5563_v18 = vld [vmem:[%s7398_s24 + $0xd0] sm:$0xff]  ;;  %vm10741_vm9 = vmmov %vm10676_vm0 }
 0x14c   : > { %v6398_v5 = vpop.f32.mrf.mxu0  ;;  %6877 = vmatmul.mubr.f32.vlgmr.msra.gmra.mxu0 %v8660_v56  ;;  %6855 = vmatmul.mubr.f32.gmra.mxu1 %v10718_v35  ;;  %v1149_v48 = vpop.f32.mrf.mxu1 }
 0x14d   : > { %v1275_v33 = vadd.f32 %v6398_v5, %v9028_v7  ;;  %6879 = vmatprep.mubr.f32.mxu0 %v8667_v13  ;;  %6857 = vmatprep.mubr.f32.mxu1 %v10719_v49  ;;  %v9159_v27 = vadd.f32 %v1149_v48, %v952_v43  ;;  %v10726_v43 = vld [vmem:[#allocation29_spill] sm:$0xff]  ;;  %v9222_v5 = vand.u32 4294901760, %v4048_v19 }
 0x14e   : > { %v1268_v8 = vpop.f32.mrf.mxu0  ;;  %6914 = vmatprep.subr.msk.mxu1 %vm10675_vm1, %v10534_v39  ;;  %v6379_v34 = vpop.f32.mrf.mxu1  ;;  %6941 = vmatpush3.msk.msra.mxu0 %vm7825_vm10, %v10534_v39 }
 0x14f   : > { %v1269_v7 = vadd.f32 %v1268_v8, %v9038_v0  ;;  %v9172_v4 = vadd.f32 %v6379_v34, %v973_v37  ;;  %6915 = vmatpush3.msk.msra.mxu1 %vm10675_vm1, %v10534_v39  ;;  %6942 = vmatprep.subr.msk.mxu0 %vm7849_vm11, %v10534_v39  ;;  %vm10724_vm1 = vmmov %vm10676_vm0  ;;  %v9253_v10 = vsub.f32 %v4048_v19, %v9222_v5 }
 0x150   : > { %v6401_v28 = vpop.f32.mrf.mxu0  ;;  %6880 = vmatmul.mubr.f32.gmra.mxu0 %v8689_v57  ;;  %6858 = vmatmul.mubr.f32.gmra.mxu1 %v10720_v55  ;;  %v1165_v11 = vpop.f32.mrf.mxu1  ;;  %v4045_v62 = vsel %vm10724_vm1, %v5558_v15, 0  ;;  %v4060_v55 = vsel %vm10735_vm7, %v5563_v18, 0  ;;  %vm10769_vm7 = vmmov %vm10676_vm0 }
 0x151   : > { %v1287_v0 = vadd.f32 %v6401_v28, %v9048_v61  ;;  %6882 = vmatprep.mubr.f32.mxu0 %v8697_v22  ;;  %6916 = vmatprep.mubr.f32.mxu1 %v8652_v32  ;;  %v9185_v42 = vadd.f32 %v1165_v11, %v966_v3  ;;  %v10725_v32 = vld [vmem:[#allocation10_spill] sm:$0xff]  ;;  %v10732_v28 = vld [vmem:[#allocation61_spill] sm:$0xff] }
 0x152   : > { %v1280_v21 = vpop.f32.mrf.mxu0  ;;  %6980 = vmatprep.subr.mxu1 %v10722_v29  ;;  %v6438_v46 = vpop.f32.mrf.mxu1  ;;  %6943 = vmatpush3.msk.msra.mxu0 %vm7849_vm11, %v10534_v39 }
 0x153   : > { %v1281_v61 = vadd.f32 %v1280_v21, %v9058_v53  ;;  %v9197_v44 = vadd.f32 %v6438_v46, %v1275_v33  ;;  %6944 = vmatprep.subr.msk.mxu0 %vm7856_vm12, %v10534_v39  ;;  %v9272_v46 = vand.u32 4294901760, %v4060_v55 }
 0x154   : > { %v6404_v31 = vpop.f32.mrf.mxu0  ;;  %6883 = vmatmul.mubr.f32.gmra.mxu0 %v10725_v32  ;;  %6917 = vmatmul.mubr.f32.vlgmr.msra.gmra.mxu1 %v8660_v56  ;;  %v1437_v20 = vpop.f32.mrf.mxu1  ;;  %v9206_v56 = vand.u32 4294901760, %v4045_v62 }
 0x155   : > { %v1299_v53 = vadd.f32 %v6404_v31, %v9068_v40  ;;  %6981 = vmatpush3.msra.mxu1 %v10722_v29  ;;  %6885 = vmatprep.mubr.f32.mxu0 %v10726_v43  ;;  %v5560_v40 = vld [vmem:[%s7398_s24 + $0x58] sm:$0xff]  ;;  %v9210_v37 = vadd.f32 %v1437_v20, %v1269_v7  ;;  %v10739_v20 = vld [vmem:[#allocation63_spill] sm:$0xff] }
 0x156   : > { %v1292_v16 = vpop.f32.mrf.mxu0  ;;  %6919 = vmatprep.mubr.f32.mxu1 %v8667_v13  ;;  %6982 = vmatprep.subr.mxu1 %v10728_v38  ;;  %v6441_v3 = vpop.f32.mrf.mxu1  ;;  %v4051_v8 = vsel %vm10730_vm4, %v5560_v40, 0  ;;  %v5564_v29 = vld [vmem:[%s7398_s24 + $0xd8] sm:$0xff] }
 0x157   : > { %v1293_v58 = vadd.f32 %v1292_v16, %v9078_v12  ;;  %v5562_v12 = vld [vmem:[%s7398_s24 + $0xc8] sm:$0xff]  ;;  %v9227_v33 = vadd.f32 %v6441_v3, %v1287_v0  ;;  %6983 = vmatpush3.msra.mxu1 %v10728_v38  ;;  %6945 = vmatpush3.msk.msra.mxu0 %vm7856_vm12, %v10534_v39  ;;  %v9255_v21 = vand.u32 4294901760, %v4051_v8 }
 0x158   : > { %v6407_v13 = vpop.f32.mrf.mxu0  ;;  %6886 = vmatmul.mubr.f32.gmra.mxu0 %v8747_v41  ;;  %6920 = vmatmul.mubr.f32.gmra.mxu1 %v8689_v57  ;;  %v1449_v49 = vpop.f32.mrf.mxu1  ;;  %v9237_v57 = vsub.f32 %v4045_v62, %v9206_v56 }
 0x159   : > { %v1311_v35 = vadd.f32 %v6407_v13, %v9088_v25  ;;  %6888 = vmatprep.mubr.f32.mxu0 %v8756_v52  ;;  %6922 = vmatprep.mubr.f32.mxu1 %v8697_v22  ;;  %v4054_v25 = vsel %vm10731_vm5, %v5561_v47, 0  ;;  %v9241_v7 = vadd.f32 %v1449_v49, %v1281_v61  ;;  %v4057_v22 = vsel %vm10734_vm6, %v5562_v12, 0  ;;  %vm10762_vm5 = vmmov %vm10676_vm0 }
 0x15a   : > { %v1304_v48 = vpop.f32.mrf.mxu0  ;;  %6984 = vmatprep.subr.mxu1 %v10732_v28  ;;  %6946 = vmatprep.subr.msk.mxu0 %vm7872_vm13, %v10534_v39  ;;  %v6444_v0 = vpop.f32.mrf.mxu1  ;;  %v9262_v61 = vand.u32 4294901760, %v4054_v25  ;;  %v4063_v13 = vsel %vm10741_vm9, %v5564_v29, 0  ;;  %vm10768_vm6 = vmmov %vm10676_vm0 }
 0x15b   : > { %v1305_v63 = vadd.f32 %v1304_v48, %v9098_v23  ;;  %v10459_v23 = vand.u32 4294901760, %v9220_v45  ;;  %v9258_v17 = vadd.f32 %v6444_v0, %v1299_v53  ;;  %6985 = vmatpush3.msra.mxu1 %v10732_v28  ;;  %6947 = vmatpush3.msk.msra.mxu0 %vm7872_vm13, %v10534_v39  ;;  %v5565_v53 = vld [vmem:[%s7398_s24 + $0x140] sm:$0xff]  ;;  %v5566_v48 = vld [vmem:[%s7398_s24 + $0x148] sm:$0xff]  ;;  %v5567_v28 = vld [vmem:[%s7398_s24 + $0x150] sm:$0xff] }
 0x15c   : > { %v6410_v15 = vpop.f32.mrf.mxu0  ;;  %6889 = vmatmul.mubr.f32.gmra.mxu0 %v8779_v14  ;;  %6923 = vmatmul.mubr.f32.gmra.mxu1 %v10725_v32  ;;  %v1461_v31 = vpop.f32.mrf.mxu1  ;;  %v10458_v32 = vand.u32 4294901760, %v9237_v57  ;;  %v4066_v18 = vsel %vm10743_vm8, %v5565_v53, 0  ;;  %v10747_v53 = vld [vmem:[#allocation11_spill] sm:$0xff]  ;;  %vm10778_vm9 = vmmov %vm10676_vm0 }
 0x15d   : > { %v1323_v11 = vadd.f32 %v6410_v15, %v9108_v9  ;;  %10736 = vst [vmem:[#allocation12_spill] sm:$0xff] %v9258_v17  ;;  %6891 = vmatprep.mubr.f32.mxu0 %v8798_v6  ;;  %6925 = vmatprep.mubr.f32.mxu1 %v10726_v43  ;;  %v9270_v9 = vand.u32 4294901760, %v4057_v22  ;;  %v9276_v16 = vadd.f32 %v1461_v31, %v1293_v58 }
 0x15e   : > { %v1316_v62 = vpop.f32.mrf.mxu0  ;;  %6986 = vmatprep.subr.mxu1 %v10739_v20  ;;  %6948 = vmatprep.subr.msk.mxu0 %vm7891_vm14, %v10534_v39  ;;  %v6447_v38 = vpop.f32.mrf.mxu1  ;;  %v9287_v47 = vsub.f32 %v9220_v45, %v10459_v23  ;;  %v9291_v58 = vsub.f32 %v4051_v8, %v9255_v21  ;;  %v10753_v23 = vld [vmem:[#allocation68_spill] sm:$0xff] }
 0x15f   : > { %10737 = vst [vmem:[#allocation33_spill] sm:$0xff] %v9270_v9  ;;  %v1317_v19 = vadd.f32 %v1316_v62, %v9118_v54  ;;  %10738 = vst [vmem:[#allocation13_spill] sm:$0xff] %v9276_v16  ;;  %v10457_v54 = vand.u32 4294901760, %v9253_v10  ;;  %v9295_v12 = vadd.f32 %v6447_v38, %v1311_v35  ;;  %6987 = vmatpush3.msra.mxu1 %v10739_v20  ;;  %6949 = vmatpush3.msk.msra.mxu0 %vm7891_vm14, %v10534_v39 }
 0x160   : > { %v6413_v43 = vpop.f32.mrf.mxu0  ;;  %6892 = vmatmul.mubr.f32.gmra.mxu0 %v8823_v36  ;;  %6926 = vmatmul.mubr.f32.gmra.mxu1 %v8747_v41  ;;  %v9300_v41 = vsub.f32 %v4054_v25, %v9262_v61  ;;  %v1473_v8 = vpop.f32.mrf.mxu1  ;;  %v9314_v35 = vsub.f32 %v4057_v22, %v9270_v9  ;;  %v9317_v25 = vsub.f32 %v4060_v55, %v9272_v46  ;;  %v9327_v62 = vand.u32 4294901760, %v4063_v13 }
 0x161   : > { %v1335_v3 = vadd.f32 %v6413_v43, %v9128_v1  ;;  %10742 = vst [vmem:[#allocation34_spill] sm:$0xff] %v9295_v12  ;;  %6894 = vmatprep.mubr.f32.mxu0 %v8829_v60  ;;  %6928 = vmatprep.mubr.f32.mxu1 %v8756_v52  ;;  %v9311_v1 = vsub.f32 %v9237_v57, %v10458_v32  ;;  %v10745_v52 = vld [vmem:[#allocation65_spill] sm:$0xff]  ;;  %v9337_v55 = vand.u32 4294901760, %v4066_v18  ;;  %v4069_v20 = vsel %vm10676_vm0, %v5566_v48, 0  ;;  %v10751_v32 = vld [vmem:[#allocation51_spill] sm:$0xff] }
 0x162   : > { %v1328_v49 = vpop.f32.mrf.mxu0  ;;  %v9321_v0 = vadd.f32 %v1473_v8, %v1305_v63  ;;  %6988 = vmatprep.subr.mxu1 %v10745_v52  ;;  %6950 = vmatprep.subr.msk.mxu0 %vm7903_vm15, %v10534_v39  ;;  %v6450_v22 = vpop.f32.mrf.mxu1  ;;  %v10460_v63 = vand.u32 4294901760, %v9291_v58  ;;  %vm10752_vm1 = vnez %v10751_v32 }
 0x163   : > { %v1329_v15 = vadd.f32 %v1328_v49, %v9137_v24  ;;  %v9334_v24 = vsub.f32 %v9253_v10, %v10457_v54  ;;  %v9341_v38 = vadd.f32 %v6450_v22, %v1323_v11  ;;  %6989 = vmatpush3.msra.mxu1 %v10745_v52  ;;  %v4072_v49 = vsel %vm10749_vm2, %v5567_v28, 0  ;;  %6951 = vmatpush3.msk.msra.mxu0 %vm7903_vm15, %v10534_v39 }
 0x164   : > { %10744 = vst [vmem:[#allocation14_spill] sm:$0xff] %v9321_v0  ;;  %v6416_v31 = vpop.f32.mrf.mxu0  ;;  %6895 = vmatmul.mubr.f32.gmra.mxu0 %v10747_v53  ;;  %6929 = vmatmul.mubr.f32.gmra.mxu1 %v8779_v14  ;;  %v1485_v54 = vpop.f32.mrf.mxu1  ;;  %v4176_v11 = vand.u32 4294901760, %v9311_v1  ;;  %v5569_v1 = vld [vmem:[%s7398_s24 + $0x1c0] sm:$0xff]  ;;  %v10754_v14 = vld [vmem:[#allocation30_spill] sm:$0xff] }
 0x165   : > { %v1347_v43 = vadd.f32 %v6416_v31, %v9146_v2  ;;  %10748 = vst [vmem:[#allocation37_spill] sm:$0xff] %v9341_v38  ;;  %6897 = vmatprep.mubr.f32.mxu0 %v8856_v30  ;;  %6931 = vmatprep.mubr.f32.mxu1 %v8798_v6  ;;  %v4166_v2 = vand.u32 4294901760, %v9287_v47  ;;  %v5568_v31 = vld [vmem:[%s7398_s24 + $0x158] sm:$0xff]  ;;  %v9357_v22 = vadd.f32 %v1485_v54, %v1317_v19  ;;  %v9366_v47 = vand.u32 4294901760, %v4069_v20  ;;  %v10758_v38 = vld [vmem:[#allocation9_spill] sm:$0xff] }
 0x166   : > { %v1340_v8 = vpop.f32.mrf.mxu0  ;;  %6952 = vmatprep.subr.msk.mxu0 %vm10752_vm1, %v10534_v39  ;;  %6990 = vmatprep.subr.mxu1 %v10753_v23  ;;  %v9364_v6 = vsub.f32 %v4063_v13, %v9327_v62  ;;  %v6453_v52 = vpop.f32.mrf.mxu1  ;;  %v4195_v19 = vsub.f32 %v9291_v58, %v10460_v63  ;;  %v9376_v54 = vsub.f32 %v4066_v18, %v9337_v55  ;;  %v9378_v13 = vand.u32 4294901760, %v4072_v49 }
 0x167   : > { %v1341_v28 = vadd.f32 %v1340_v8, %v9159_v27  ;;  %10750 = vst [vmem:[#allocation16_spill] sm:$0xff] %v9357_v22  ;;  %v4186_v27 = vand.u32 4294901760, %v9334_v24  ;;  %v9381_v22 = vadd.f32 %v6453_v52, %v1335_v3  ;;  %6953 = vmatpush3.msk.msra.mxu0 %vm10752_vm1, %v10534_v39  ;;  %6991 = vmatpush3.msra.mxu1 %v10753_v23  ;;  %v4075_v18 = vsel %vm10757_vm3, %v5568_v31, 0 }
 0x168   : > { %v6419_v48 = vpop.f32.mrf.mxu0  ;;  %6898 = vmatmul.mubr.f32.gmra.mxu0 %v10754_v14  ;;  %6932 = vmatmul.mubr.f32.gmra.mxu1 %v8823_v36  ;;  %v10756_v36 = vand.u32 4294901760, %v9300_v41  ;;  %vm10759_vm4 = vnez %v10758_v38  ;;  %v10760_v3 = vand.u32 4294901760, %v9314_v35  ;;  %v10761_v23 = vand.u32 4294901760, %v9317_v25  ;;  %v10845_v38 = vld [vmem:[#allocation13_spill] sm:$0xff] }
 0x169   : > { %v1359_v8 = vadd.f32 %v6419_v48, %v9172_v4  ;;  %10755 = vst [vmem:[#allocation23_spill] sm:$0xff] %v9381_v22  ;;  %6954 = vmatprep.subr.msk.mxu0 %vm10759_vm4, %v10534_v39  ;;  %v1497_v4 = vpop.f32.mrf.mxu1  ;;  %6956 = vmatprep.mubr.f32.mxu0 %v4166_v2  ;;  %v5570_v22 = vld [vmem:[%s7398_s24 + $0x1c8] sm:$0xff] }
 0x16a   : > { %v4205_v24 = vsub.f32 %v9300_v41, %v10756_v36  ;;  %v1352_v63 = vpop.f32.mrf.mxu0  ;;  %v4215_v48 = vsub.f32 %v9314_v35, %v10760_v3  ;;  %v9400_v52 = vsub.f32 %v9317_v25, %v10761_v23  ;;  %v4078_v36 = vsel %vm10762_vm5, %v5569_v1, 0  ;;  %6955 = vmatpush3.msk.msra.mxu0 %vm10759_vm4, %v10534_v39  ;;  %6934 = vmatprep.mubr.f32.mxu1 %v8829_v60  ;;  %v5571_v23 = vld [vmem:[%s7398_s24 + $0x1d0] sm:$0xff] }
 0x16b   : > { %v1353_v31 = vadd.f32 %v1352_v63, %v9185_v42  ;;  %v9405_v0 = vadd.f32 %v1497_v4, %v1329_v15  ;;  %v9413_v3 = vsub.f32 %v4069_v20, %v9366_v47  ;;  %v6456_v1 = vpop.f32.mrf.mxu1  ;;  %v4196_v42 = vand.u32 4294901760, %v4195_v19  ;;  %v10766_v20 = vld [vmem:[#allocation70_spill] sm:$0xff] }
 0x16c   : > { %v9416_v12 = vpop.f32.mrf.mxu0  ;;  %6957 = vmatmul.mubr.f32.vlgmr.msra.gmra.mxu0 %v4176_v11  ;;  %6935 = vmatmul.mubr.f32.gmra.mxu1 %v10747_v53  ;;  %v9421_v63 = vsub.f32 %v4072_v49, %v9378_v13  ;;  %v9423_v60 = vand.u32 4294901760, %v4075_v18  ;;  %v9425_v4 = vadd.f32 %v6456_v1, %v1347_v43  ;;  %v4206_v2 = vand.u32 4294901760, %v4205_v24  ;;  %v5572_v43 = vld [vmem:[%s7398_s24 + $0x1d8] sm:$0xff] }
 0x16d   : > { %10763 = vst [vmem:[#allocation42_spill] sm:$0xff] %v9405_v0  ;;  %6992 = vmatprep.subr.mxu1 %v10766_v20  ;;  %6959 = vmatprep.mubr.f32.mxu0 %v4186_v27  ;;  %v9428_v0 = vand.u32 4294901760, %v4078_v36  ;;  %v4081_v11 = vsel %vm10768_vm6, %v5570_v22, 0  ;;  %v1509_v19 = vpop.f32.mrf.mxu1  ;;  %v4216_v49 = vand.u32 4294901760, %v4215_v48  ;;  %v4084_v15 = vsel %vm10769_vm7, %v5571_v23, 0  ;;  %v10772_v27 = vld [vmem:[#allocation52_spill] sm:$0xff] }
 0x16e   : > { %10764 = vst [vmem:[#allocation18_spill] sm:$0xff] %v9423_v60  ;;  %10765 = vst [vmem:[#allocation44_spill] sm:$0xff] %v9425_v4  ;;  %v9431_v53 = vpop.f32.mrf.mxu0  ;;  %6993 = vmatpush3.msra.mxu1 %v10766_v20  ;;  %6937 = vmatprep.mubr.f32.mxu1 %v8856_v30  ;;  %v9437_v1 = vadd.f32 %v1509_v19, %v1341_v28  ;;  %v10771_v4 = vld [vmem:[#allocation71_spill] sm:$0xff]  ;;  %v4226_v24 = vand.u32 4294901760, %v9400_v52  ;;  %v10773_v22 = vand.u32 4294901760, %v9364_v6  ;;  %v10774_v28 = vand.u32 4294901760, %v9376_v54 }
 0x16f   : > { %10767 = vst [vmem:[#allocation45_spill] sm:$0xff] %v9428_v0  ;;  %6994 = vmatprep.subr.mxu1 %v10771_v4  ;;  %7020 = vmatprep.subr.mxu0 %v10772_v27  ;;  %v6459_v30 = vpop.f32.mrf.mxu1  ;;  %v9454_v52 = vsub.f32 %v4075_v18, %v9423_v60  ;;  %v9456_v19 = vand.u32 4294901760, %v4081_v11  ;;  %v4087_v20 = vsel %vm10778_vm9, %v5572_v43, 0  ;;  %v10782_v43 = vand.u32 4294901760, %v9413_v3 }
 0x170   : > { %10770 = vst [vmem:[#allocation15_spill] sm:$0xff] %v9437_v1  ;;  %v4235_v16 = vsub.f32 %v9364_v6, %v10773_v22  ;;  %v9446_v17 = vpop.f32.mrf.mxu0  ;;  %6960 = vmatmul.mubr.f32.gmra.mxu0 %v4196_v42  ;;  %6938 = vmatmul.mubr.f32.gmra.mxu1 %v10754_v14  ;;  %v4245_v48 = vsub.f32 %v9376_v54, %v10774_v28  ;;  %v9464_v14 = vand.u32 4294901760, %v4084_v15 }
 0x171   : > { %10775 = vst [vmem:[#allocation17_spill] sm:$0xff] %v9456_v19  ;;  %v9458_v22 = vadd.f32 %v6459_v30, %v1359_v8  ;;  %6995 = vmatpush3.msra.mxu1 %v10771_v4  ;;  %6962 = vmatprep.mubr.f32.mxu0 %v4206_v2  ;;  %v9462_v42 = vsub.f32 %v4078_v36, %v9428_v0  ;;  %v1521_v23 = vpop.f32.mrf.mxu1  ;;  %v10780_v8 = vld [vmem:[#allocation54_spill] sm:$0xff] }
 0x172   : > { %10777 = vst [vmem:[#allocation24_spill] sm:$0xff] %v9464_v14  ;;  %v9467_v28 = vpop.f32.mrf.mxu0  ;;  %6996 = vmatprep.mubr.f32.mxu1 %v9194_v26  ;;  %7021 = vmatpush3.msra.mxu0 %v10772_v27  ;;  %v9471_v18 = vadd.f32 %v1521_v23, %v1353_v31  ;;  %v4236_v36 = vand.u32 4294901760, %v4235_v16  ;;  %v4255_v27 = vsub.f32 %v9413_v3, %v10782_v43  ;;  %v9489_v23 = vand.u32 4294901760, %v4087_v20 }
 0x173   : > { %10776 = vst [vmem:[#allocation21_spill] sm:$0xff] %v9458_v22  ;;  %7060 = vmatprep.subr.msk.mxu1 %vm7825_vm10, %v10534_v39  ;;  %7022 = vmatprep.subr.mxu0 %v10780_v8  ;;  %v9479_v4 = vpop.f32.mrf.mxu1  ;;  %v9487_v30 = vsub.f32 %v4081_v11, %v9456_v19  ;;  %v4246_v16 = vand.u32 4294901760, %v4245_v48  ;;  %v9499_v43 = vsub.f32 %v4084_v15, %v9464_v14  ;;  %v10789_v22 = vand.u32 4294901760, %v9454_v52 }
 0x174   : > { %10779 = vst [vmem:[#allocation28_spill] sm:$0xff] %v9471_v18  ;;  %v9477_v2 = vpop.f32.mrf.mxu0  ;;  %6963 = vmatmul.mubr.f32.gmra.mxu0 %v4216_v49  ;;  %6997 = vmatmul.mubr.f32.vlgmr.msra.gmra.mxu1 %v9206_v56  ;;  %10783 = vst [vmem:[#allocation38_spill] sm:$0xff] %v9489_v23  ;;  %v10784_v49 = vand.u32 4294901760, %v9421_v63  ;;  %v4256_v15 = vand.u32 4294901760, %v4255_v27  ;;  %v1679_v32 = vadd.f32 %v9467_v28, %v9241_v7  ;;  %v10843_v7 = vld [vmem:[#allocation12_spill] sm:$0xff] }
 0x175   : > { %10781 = vst [vmem:[#allocation35_spill] sm:$0xff] %v9477_v2  ;;  %7061 = vmatpush3.msk.msra.mxu1 %vm7825_vm10, %v10534_v39  ;;  %6965 = vmatprep.mubr.f32.mxu0 %v4226_v24  ;;  %v9503_v11 = vpop.f32.mrf.mxu1  ;;  %v10786_v24 = vld [vmem:[#allocation55_spill] sm:$0xff]  ;;  %v4275_v1 = vsub.f32 %v9454_v52, %v10789_v22 }
 0x176   : > { %v4265_v18 = vsub.f32 %v9421_v63, %v10784_v49  ;;  %v9501_v31 = vpop.f32.mrf.mxu0  ;;  %6999 = vmatprep.mubr.f32.mxu1 %v9222_v5  ;;  %7023 = vmatpush3.msra.mxu0 %v10780_v8  ;;  %v10463_v8 = vand.u32 4294901760, %v9487_v30 }
 0x177   : > { %10785 = vst [vmem:[#allocation41_spill] sm:$0xff] %v9501_v31  ;;  %7062 = vmatprep.subr.msk.mxu1 %vm7849_vm11, %v10534_v39  ;;  %7024 = vmatprep.subr.mxu0 %v10786_v24  ;;  %v9513_v49 = vpop.f32.mrf.mxu1  ;;  %v9521_v31 = vsub.f32 %v4087_v20, %v9489_v23  ;;  %v10792_v20 = vld [vmem:[#allocation32_spill] sm:$0xff] }
 0x178   : > { %v9511_v48 = vpop.f32.mrf.mxu0  ;;  %6966 = vmatmul.mubr.f32.gmra.mxu0 %v4236_v36  ;;  %10788 = vst [vmem:[#allocation20_spill] sm:$0xff] %v9513_v49  ;;  %7000 = vmatmul.mubr.f32.gmra.mxu1 %v9255_v21  ;;  %v4266_v36 = vand.u32 4294901760, %v4265_v18  ;;  %v4295_v27 = vsub.f32 %v9487_v30, %v10463_v8 }
 0x179   : > { %10787 = vst [vmem:[#allocation19_spill] sm:$0xff] %v9511_v48  ;;  %7063 = vmatpush3.msk.msra.mxu1 %vm7849_vm11, %v10534_v39  ;;  %6968 = vmatprep.mubr.f32.mxu0 %v4246_v16  ;;  %v10790_v48 = vand.u32 4294901760, %v9462_v42  ;;  %v9532_v22 = vpop.f32.mrf.mxu1 }
 0x17a   : > { %v9530_v49 = vpop.f32.mrf.mxu0  ;;  %7002 = vmatprep.mubr.f32.mxu1 %v9262_v61  ;;  %7025 = vmatpush3.msra.mxu0 %v10786_v24  ;;  %v10464_v24 = vand.u32 4294901760, %v9521_v31 }
 0x17b   : > { %v4285_v2 = vsub.f32 %v9462_v42, %v10790_v48  ;;  %10791 = vst [vmem:[#allocation25_spill] sm:$0xff] %v9530_v49  ;;  %7064 = vmatprep.subr.msk.mxu1 %vm7856_vm12, %v10534_v39  ;;  %7026 = vmatprep.subr.mxu0 %v10792_v20  ;;  %v9542_v16 = vpop.f32.mrf.mxu1  ;;  %v4276_v48 = vand.u32 4294901760, %v4275_v1  ;;  %v10798_v1 = vld [vmem:[#allocation57_spill] sm:$0xff] }
 0x17c   : > { %v9540_v18 = vpop.f32.mrf.mxu0  ;;  %6969 = vmatmul.mubr.f32.gmra.mxu0 %v4256_v15  ;;  %10794 = vst [vmem:[#allocation31_spill] sm:$0xff] %v9542_v16  ;;  %7003 = vmatmul.mubr.f32.gmra.mxu1 %v9270_v9  ;;  %v4315_v8 = vsub.f32 %v9521_v31, %v10464_v24  ;;  %v10844_v28 = vld [vmem:[#allocation35_spill] sm:$0xff] }
 0x17d   : > { %10793 = vst [vmem:[#allocation26_spill] sm:$0xff] %v9540_v18  ;;  %7065 = vmatpush3.msk.msra.mxu1 %vm7856_vm12, %v10534_v39  ;;  %6971 = vmatprep.mubr.f32.mxu0 %v4266_v36  ;;  %v4286_v49 = vand.u32 4294901760, %v4285_v2  ;;  %v10795_v18 = vand.u32 4294901760, %v9499_v43  ;;  %v9557_v9 = vpop.f32.mrf.mxu1 }
 0x17e   : > { %v9555_v16 = vpop.f32.mrf.mxu0  ;;  %10797 = vst [vmem:[#allocation40_spill] sm:$0xff] %v9557_v9  ;;  %7005 = vmatprep.mubr.f32.mxu1 %v9272_v46  ;;  %7027 = vmatpush3.msra.mxu0 %v10792_v20 }
 0x17f   : > { %v4305_v15 = vsub.f32 %v9499_v43, %v10795_v18  ;;  %10796 = vst [vmem:[#allocation39_spill] sm:$0xff] %v9555_v16  ;;  %7066 = vmatprep.subr.msk.mxu1 %vm7872_vm13, %v10534_v39  ;;  %7028 = vmatprep.subr.mxu0 %v10798_v1  ;;  %v9567_v2 = vpop.f32.mrf.mxu1  ;;  %v4296_v18 = vand.u32 4294901760, %v4295_v27  ;;  %v10799_v27 = vld [vmem:[#allocation60_spill] sm:$0xff] }
 0x180   : > { %v9565_v36 = vpop.f32.mrf.mxu0  ;;  %6972 = vmatmul.mubr.f32.gmra.mxu0 %v4276_v48  ;;  %7006 = vmatmul.mubr.f32.gmra.mxu1 %v9327_v62 }
 0x181   : > { %7067 = vmatpush3.msk.msra.mxu1 %vm7872_vm13, %v10534_v39  ;;  %6974 = vmatprep.mubr.f32.mxu0 %v4286_v49  ;;  %v4306_v20 = vand.u32 4294901760, %v4305_v15  ;;  %v9578_v9 = vpop.f32.mrf.mxu1  ;;  %v4316_v49 = vand.u32 4294901760, %v4315_v8 }
 0x182   : > { %v9576_v16 = vpop.f32.mrf.mxu0  ;;  %7008 = vmatprep.mubr.f32.mxu1 %v9337_v55  ;;  %7029 = vmatpush3.msra.mxu0 %v10798_v1 }
 0x183   : > { %7068 = vmatprep.subr.msk.mxu1 %vm7891_vm14, %v10534_v39  ;;  %7030 = vmatprep.subr.mxu0 %v10799_v27  ;;  %v9588_v24 = vpop.f32.mrf.mxu1 }
 0x184   : > { %v9586_v48 = vpop.f32.mrf.mxu0  ;;  %6975 = vmatmul.mubr.f32.gmra.mxu0 %v4296_v18  ;;  %7009 = vmatmul.mubr.f32.gmra.mxu1 %v9366_v47 }
 0x185   : > { %10800 = vst [vmem:[#allocation43_spill] sm:$0xff] %v9586_v48  ;;  %7069 = vmatpush3.msk.msra.mxu1 %vm7891_vm14, %v10534_v39  ;;  %6977 = vmatprep.mubr.f32.mxu0 %v4306_v20  ;;  %v9596_v1 = vpop.f32.mrf.mxu1  ;;  %v10802_v48 = vld [vmem:[#allocation64_spill] sm:$0xff] }
 0x186   : > { %v9594_v15 = vpop.f32.mrf.mxu0  ;;  %7031 = vmatpush3.msra.mxu0 %v10799_v27  ;;  %7011 = vmatprep.mubr.f32.mxu1 %v9378_v13  ;;  %v10806_v27 = vld [vmem:[#allocation66_spill] sm:$0xff] }
 0x187   : > { %10801 = vst [vmem:[#allocation27_spill] sm:$0xff] %v9594_v15  ;;  %7032 = vmatprep.subr.mxu0 %v10802_v48  ;;  %7070 = vmatprep.subr.msk.mxu1 %vm7903_vm15, %v10534_v39  ;;  %v9606_v18 = vpop.f32.mrf.mxu1 }
 0x188   : > { %v9604_v8 = vpop.f32.mrf.mxu0  ;;  %6978 = vmatmul.mubr.f32.gmra.mxu0 %v4316_v49  ;;  %10804 = vst [vmem:[#allocation10_spill] sm:$0xff] %v9606_v18  ;;  %7012 = vmatmul.mubr.f32.gmra.mxu1 %v9423_v60  ;;  %v10815_v60 = vand.u32 4294901760, %v9237_v57  ;;  %v10821_v18 = vand.u32 4294901760, %v9314_v35 }
 0x189   : > { %10803 = vst [vmem:[#allocation46_spill] sm:$0xff] %v9604_v8  ;;  %7033 = vmatpush3.msra.mxu0 %v10802_v48  ;;  %7071 = vmatpush3.msk.msra.mxu1 %vm7903_vm15, %v10534_v39  ;;  %v9616_v15 = vpop.f32.mrf.mxu1  ;;  %v10810_v8 = vld [vmem:[#allocation53_spill] sm:$0xff] }
 0x18a   : > { %v9613_v20 = vpop.f32.mrf.mxu0  ;;  %7034 = vmatprep.subr.mxu0 %v10806_v27  ;;  %10807 = vst [vmem:[#allocation58_spill] sm:$0xff] %v9616_v15  ;;  %7036 = vmatprep.mubr.f32.mxu0 %v9220_v45  ;;  %v10813_v15 = vand.u32 4294901760, %v9220_v45 }
 0x18b   : > { %10805 = vst [vmem:[#allocation29_spill] sm:$0xff] %v9613_v20  ;;  %7035 = vmatpush3.msra.mxu0 %v10806_v27  ;;  %7014 = vmatprep.mubr.f32.mxu1 %v9428_v0  ;;  %v9624_v48 = vpop.f32.mrf.mxu1 }
 0x18c   : > { %v9621_v49 = vpop.f32.mrf.mxu0  ;;  %7037 = vmatmul.mubr.f32.vlgmr.msra.gmra.mxu0 %v9237_v57  ;;  %10808 = vst [vmem:[#allocation47_spill] sm:$0xff] %v9624_v48  ;;  %7015 = vmatmul.mubr.f32.gmra.mxu1 %v9456_v19  ;;  %v10817_v57 = vld [vmem:[#allocation56_spill] sm:$0xff] }
 0x18d   : > { %7072 = vmatprep.subr.msk.mxu1 %vm10752_vm1, %v10534_v39  ;;  %7039 = vmatprep.mubr.f32.mxu0 %v9253_v10  ;;  %v9636_v27 = vpop.f32.mrf.mxu1 }
 0x18e   : > { %v9631_v20 = vpop.f32.mrf.mxu0  ;;  %7073 = vmatpush3.msk.msra.mxu1 %vm10752_vm1, %v10534_v39  ;;  %10809 = vst [vmem:[#allocation61_spill] sm:$0xff] %v9636_v27  ;;  %7017 = vmatprep.mubr.f32.mxu1 %v9464_v14 }
 0x18f   : > { %7074 = vmatprep.subr.msk.mxu1 %vm10759_vm4, %v10534_v39  ;;  %7100 = vmatprep.subr.mxu0 %v10810_v8  ;;  %v9646_v48 = vpop.f32.mrf.mxu1 }
 0x190   : > { %v9643_v19 = vpop.f32.mrf.mxu0  ;;  %7040 = vmatmul.mubr.f32.gmra.mxu0 %v9291_v58  ;;  %10811 = vst [vmem:[#allocation48_spill] sm:$0xff] %v9646_v48  ;;  %7018 = vmatmul.mubr.f32.gmra.mxu1 %v9489_v23  ;;  %v10814_v23 = vld [vmem:[#allocation22_spill] sm:$0xff] }
 0x191   : > { %7075 = vmatpush3.msk.msra.mxu1 %vm10759_vm4, %v10534_v39  ;;  %7042 = vmatprep.mubr.f32.mxu0 %v9300_v41  ;;  %v9655_v14 = vpop.f32.mrf.mxu1 }
 0x192   : > { %v9653_v27 = vpop.f32.mrf.mxu0  ;;  %10812 = vst [vmem:[#allocation63_spill] sm:$0xff] %v9655_v14  ;;  %7076 = vmatprep.mubr.f32.mxu1 %v10813_v15  ;;  %7101 = vmatpush3.msra.mxu0 %v10810_v8  ;;  %v10816_v8 = vand.u32 4294901760, %v9253_v10  ;;  %v10818_v14 = vand.u32 4294901760, %v9291_v58  ;;  %v10820_v58 = vld [vmem:[#allocation36_spill] sm:$0xff] }
 0x193   : > { %7140 = vmatprep.subr.msk.mxu1 %vm7825_vm10, %v10534_v39  ;;  %7102 = vmatprep.subr.mxu0 %v10814_v23  ;;  %v9667_v0 = vpop.f32.mrf.mxu1 }
 0x194   : > { %v9664_v48 = vpop.f32.mrf.mxu0  ;;  %7043 = vmatmul.mubr.f32.gmra.mxu0 %v9314_v35  ;;  %7077 = vmatmul.mubr.f32.vlgmr.msra.gmra.mxu1 %v10815_v60  ;;  %v10824_v35 = vld [vmem:[#allocation59_spill] sm:$0xff] }
 0x195   : > { %7141 = vmatpush3.msk.msra.mxu1 %vm7825_vm10, %v10534_v39  ;;  %7045 = vmatprep.mubr.f32.mxu0 %v9317_v25  ;;  %v9677_v15 = vpop.f32.mrf.mxu1 }
 0x196   : > { %v9675_v45 = vpop.f32.mrf.mxu0  ;;  %7079 = vmatprep.mubr.f32.mxu1 %v10816_v8  ;;  %7103 = vmatpush3.msra.mxu0 %v10814_v23  ;;  %v10819_v8 = vand.u32 4294901760, %v9300_v41 }
 0x197   : > { %7142 = vmatprep.subr.msk.mxu1 %vm7849_vm11, %v10534_v39  ;;  %7104 = vmatprep.subr.mxu0 %v10817_v57  ;;  %v9689_v59 = vpop.f32.mrf.mxu1 }
 0x198   : > { %v9686_v60 = vpop.f32.mrf.mxu0  ;;  %7046 = vmatmul.mubr.f32.gmra.mxu0 %v9364_v6  ;;  %7080 = vmatmul.mubr.f32.gmra.mxu1 %v10818_v14 }
 0x199   : > { %7143 = vmatpush3.msk.msra.mxu1 %vm7849_vm11, %v10534_v39  ;;  %7048 = vmatprep.mubr.f32.mxu0 %v9376_v54  ;;  %v9699_v23 = vpop.f32.mrf.mxu1 }
 0x19a   : > { %v9697_v10 = vpop.f32.mrf.mxu0  ;;  %7082 = vmatprep.mubr.f32.mxu1 %v10819_v8  ;;  %7105 = vmatpush3.msra.mxu0 %v10817_v57  ;;  %v10823_v8 = vand.u32 4294901760, %v9317_v25 }
 0x19b   : > { %7144 = vmatprep.subr.msk.mxu1 %vm7856_vm12, %v10534_v39  ;;  %7106 = vmatprep.subr.mxu0 %v10820_v58  ;;  %v9711_v51 = vpop.f32.mrf.mxu1 }
 0x19c   : > { %v9708_v14 = vpop.f32.mrf.mxu0  ;;  %7049 = vmatmul.mubr.f32.gmra.mxu0 %v9413_v3  ;;  %7083 = vmatmul.mubr.f32.gmra.mxu1 %v10821_v18 }
 0x19d   : > { %7145 = vmatpush3.msk.msra.mxu1 %vm7856_vm12, %v10534_v39  ;;  %7051 = vmatprep.mubr.f32.mxu0 %v9421_v63  ;;  %v9721_v57 = vpop.f32.mrf.mxu1 }
 0x19e   : > { %v9719_v41 = vpop.f32.mrf.mxu0  ;;  %7085 = vmatprep.mubr.f32.mxu1 %v10823_v8  ;;  %7107 = vmatpush3.msra.mxu0 %v10820_v58  ;;  %v10827_v8 = vand.u32 4294901760, %v9376_v54 }
 0x19f   : > { %10822 = vst [vmem:[#allocation49_spill] sm:$0xff] %v9719_v41  ;;  %7146 = vmatprep.subr.msk.mxu1 %vm7872_vm13, %v10534_v39  ;;  %7108 = vmatprep.subr.mxu0 %v10824_v35  ;;  %v9733_v50 = vpop.f32.mrf.mxu1  ;;  %v10825_v41 = vand.u32 4294901760, %v9364_v6  ;;  %v10828_v6 = vld [vmem:[#allocation62_spill] sm:$0xff] }
 0x1a0   : > { %v9730_v18 = vpop.f32.mrf.mxu0  ;;  %7052 = vmatmul.mubr.f32.gmra.mxu0 %v9454_v52  ;;  %7147 = vmatpush3.msk.msra.mxu1 %vm7872_vm13, %v10534_v39 }
 0x1a1   : > { %7086 = vmatmul.mubr.f32.gmra.mxu1 %v10825_v41  ;;  %7054 = vmatprep.mubr.f32.mxu0 %v9462_v42  ;;  %v9743_v58 = vpop.f32.mrf.mxu1 }
 0x1a2   : > { %v9741_v25 = vpop.f32.mrf.mxu0  ;;  %7088 = vmatprep.mubr.f32.mxu1 %v10827_v8  ;;  %7109 = vmatpush3.msra.mxu0 %v10824_v35  ;;  %v10832_v8 = vand.u32 4294901760, %v9421_v63 }
 0x1a3   : > { %10826 = vst [vmem:[#allocation65_spill] sm:$0xff] %v9741_v25  ;;  %7148 = vmatprep.subr.msk.mxu1 %vm7891_vm14, %v10534_v39  ;;  %7110 = vmatprep.subr.mxu0 %v10828_v6  ;;  %v9755_v34 = vpop.f32.mrf.mxu1  ;;  %v10830_v25 = vand.u32 4294901760, %v9413_v3 }
 0x1a4   : > { %v9752_v41 = vpop.f32.mrf.mxu0  ;;  %7055 = vmatmul.mubr.f32.gmra.mxu0 %v9487_v30  ;;  %7149 = vmatpush3.msk.msra.mxu1 %vm7891_vm14, %v10534_v39 }
 0x1a5   : > { %10829 = vst [vmem:[#allocation50_spill] sm:$0xff] %v9752_v41  ;;  %7089 = vmatmul.mubr.f32.gmra.mxu1 %v10830_v25  ;;  %7057 = vmatprep.mubr.f32.mxu0 %v9499_v43  ;;  %v9765_v35 = vpop.f32.mrf.mxu1  ;;  %v10833_v41 = vld [vmem:[#allocation67_spill] sm:$0xff]  ;;  %v10835_v25 = vand.u32 4294901760, %v9454_v52  ;;  %v10838_v52 = vand.u32 4294901760, %v9462_v42  ;;  %v10840_v42 = vand.u32 4294901760, %v9499_v43 }
 0x1a6   : > { %v9763_v54 = vpop.f32.mrf.mxu0  ;;  %7111 = vmatpush3.msra.mxu0 %v10828_v6  ;;  %7091 = vmatprep.mubr.f32.mxu1 %v10832_v8  ;;  %v10837_v6 = vld [vmem:[#allocation69_spill] sm:$0xff] }
 0x1a7   : > { %10831 = vst [vmem:[#allocation11_spill] sm:$0xff] %v9763_v54  ;;  %7112 = vmatprep.subr.mxu0 %v10833_v41  ;;  %7150 = vmatprep.subr.msk.mxu1 %vm7903_vm15, %v10534_v39  ;;  %v9777_v40 = vpop.f32.mrf.mxu1 }
 0x1a8   : > { %v9774_v3 = vpop.f32.mrf.mxu0  ;;  %7058 = vmatmul.mubr.f32.gmra.mxu0 %v9521_v31  ;;  %7151 = vmatpush3.msk.msra.mxu1 %vm7903_vm15, %v10534_v39 }
 0x1a9   : > { %10834 = vst [vmem:[#allocation51_spill] sm:$0xff] %v9774_v3  ;;  %7092 = vmatmul.mubr.f32.gmra.mxu1 %v10835_v25  ;;  %7113 = vmatpush3.msra.mxu0 %v10833_v41  ;;  %v9788_v8 = vpop.f32.mrf.mxu1  ;;  %v1669_v3 = vadd.f32 %v9416_v12, %v9197_v44  ;;  %v10839_v25 = vand.u32 4294901760, %v9487_v30 }
 0x1aa   : > { %v9785_v63 = vpop.f32.mrf.mxu0  ;;  %7114 = vmatprep.subr.mxu0 %v10837_v6  ;;  %7116 = vmatprep.mubr.f32.mxu0 %v9194_v26 }
 0x1ab   : > { %10836 = vst [vmem:[#allocation68_spill] sm:$0xff] %v9785_v63  ;;  %7115 = vmatpush3.msra.mxu0 %v10837_v6  ;;  %7094 = vmatprep.mubr.f32.mxu1 %v10838_v52  ;;  %v9797_v29 = vpop.f32.mrf.mxu1  ;;  %v1659_v63 = vadd.f32 %v9431_v53, %v9210_v37  ;;  %v1926_v54 = vadd.f32 %v9479_v4, %v1669_v3  ;;  %v10841_v3 = vand.u32 4294901760, %v9521_v31 }
 0x1ac   : > { %v6638_v41 = vpop.f32.mrf.mxu0  ;;  %7117 = vmatmul.mubr.f32.vlgmr.msra.gmra.mxu0 %v9206_v56  ;;  %7152 = vmatprep.subr.msk.mxu1 %vm10752_vm1, %v10534_v39  ;;  %v1689_v37 = vadd.f32 %v9446_v17, %v9227_v33  ;;  %v10842_v33 = vld [vmem:[#allocation20_spill] sm:$0xff] }
 0x1ad   : > { %7095 = vmatmul.mubr.f32.gmra.mxu1 %v10839_v25  ;;  %7119 = vmatprep.mubr.f32.mxu0 %v9222_v5  ;;  %v9811_v12 = vpop.f32.mrf.mxu1  ;;  %v1920_v53 = vadd.f32 %v9503_v11, %v1659_v63  ;;  %v2105_v4 = vadd.f32 %v9621_v49, %v1926_v54  ;;  %v1709_v54 = vadd.f32 %v10844_v28, %v10843_v7 }
 0x1ae   : > { %v2498_v44 = vpop.f32.mrf.mxu0  ;;  %7153 = vmatpush3.msk.msra.mxu1 %vm10752_vm1, %v10534_v39  ;;  %7097 = vmatprep.mubr.f32.mxu1 %v10840_v42  ;;  %v1938_v17 = vadd.f32 %v10842_v33, %v1689_v37  ;;  %v1932_v63 = vadd.f32 %v9532_v22, %v1679_v32  ;;  %v10847_v42 = vld [vmem:[#allocation31_spill] sm:$0xff] }
 0x1af   : > { %7154 = vmatprep.subr.msk.mxu1 %vm10759_vm4, %v10534_v39  ;;  %v9825_v43 = vpop.f32.mrf.mxu1  ;;  %v2098_v11 = vadd.f32 %v9631_v20, %v1920_v53  ;;  %v2292_v49 = vadd.f32 %v9667_v0, %v2105_v4  ;;  %v1950_v37 = vadd.f32 %v10847_v42, %v1709_v54 }
 0x1b0   : > { %v6641_v30 = vpop.f32.mrf.mxu0  ;;  %7120 = vmatmul.mubr.f32.gmra.mxu0 %v9255_v21  ;;  %7155 = vmatpush3.msk.msra.mxu1 %vm10759_vm4, %v10534_v39  ;;  %v2119_v20 = vadd.f32 %v9643_v19, %v1938_v17  ;;  %v10846_v39 = vld [vmem:[#allocation41_spill] sm:$0xff]  ;;  %v2112_v53 = vadd.f32 %v9653_v27, %v1932_v63  ;;  %v10851_v17 = vld [vmem:[#allocation40_spill] sm:$0xff] }
 0x1b1   : > { %7098 = vmatmul.mubr.f32.gmra.mxu1 %v10841_v3  ;;  %7122 = vmatprep.mubr.f32.mxu0 %v9262_v61  ;;  %v9840_v6 = vpop.f32.mrf.mxu1  ;;  %v2284_v0 = vadd.f32 %v9677_v15, %v2098_v11  ;;  %v2505_v52 = vadd.f32 %v6638_v41, %v2292_v49  ;;  %v1699_v25 = vadd.f32 %v10846_v39, %v10845_v38  ;;  %v10848_v3 = vld [vmem:[#allocation33_spill] sm:$0xff]  ;;  %v10849_v15 = vld [vmem:[#allocation34_spill] sm:$0xff]  ;;  %v10850_v41 = vld [vmem:[#allocation19_spill] sm:$0xff] }
 0x1b2   : > { %v2510_v31 = vpop.f32.mrf.mxu0  ;;  %7156 = vmatprep.mubr.f32.mxu1 %v9194_v26  ;;  %v2308_v26 = vadd.f32 %v9689_v59, %v2119_v20  ;;  %v1729_v33 = vadd.f32 %v10850_v41, %v10849_v15  ;;  %v2133_v7 = vadd.f32 %v9664_v48, %v1950_v37  ;;  %v2300_v28 = vadd.f32 %v9699_v23, %v2112_v53  ;;  %v10854_v38 = vld [vmem:[#allocation37_spill] sm:$0xff]  ;;  %v10856_v53 = vld [vmem:[#allocation16_spill] sm:$0xff]  ;;  %v10858_v15 = vld [vmem:[#allocation23_spill] sm:$0xff] }
 0x1b3   : > { %v6678_v22 = vpop.f32.mrf.mxu1  ;;  %v2499_v32 = vadd.f32 %v2498_v44, %v2284_v0  ;;  %v1944_v11 = vadd.f32 %v10851_v17, %v1699_v25  ;;  %v10852_v44 = vld [vmem:[#allocation14_spill] sm:$0xff] }
 0x1b4   : > { %v6644_v4 = vpop.f32.mrf.mxu0  ;;  %7123 = vmatmul.mubr.f32.gmra.mxu0 %v10848_v3  ;;  %v2674_v19 = vadd.f32 %v6678_v22, %v2505_v52  ;;  %v1962_v63 = vadd.f32 %v9567_v2, %v1729_v33  ;;  %v2324_v23 = vadd.f32 %v9711_v51, %v2133_v7  ;;  %v10855_v2 = vld [vmem:[#allocation26_spill] sm:$0xff]  ;;  %v10857_v22 = vld [vmem:[#allocation39_spill] sm:$0xff] }
 0x1b5   : > { %7157 = vmatmul.mubr.f32.vlgmr.msra.gmra.mxu1 %v9206_v56  ;;  %7125 = vmatprep.mubr.f32.mxu0 %v9272_v46  ;;  %v2667_v49 = vpop.f32.mrf.mxu1  ;;  %v2517_v56 = vadd.f32 %v6641_v30, %v2308_v26  ;;  %v2126_v20 = vadd.f32 %v9675_v45, %v1944_v11  ;;  %v2511_v30 = vadd.f32 %v2510_v31, %v2300_v28  ;;  %v10860_v7 = vld [vmem:[#allocation10_spill] sm:$0xff]  ;;  %v10861_v28 = vld [vmem:[#allocation49_spill] sm:$0xff] }
 0x1b6   : > { %7159 = vmatprep.mubr.f32.mxu1 %v9222_v5  ;;  %v2522_v27 = vpop.f32.mrf.mxu0  ;;  %2762 = vst [vmem:[%s9859_s17 + $0x10] sm:$0xff] %v2674_v19  ;;  %v2668_v59 = vadd.f32 %v2667_v49, %v2499_v32  ;;  %v10853_v5 = vld [vmem:[#allocation25_spill] sm:$0xff]  ;;  %v1749_v39 = vadd.f32 %v10855_v2, %v10854_v38  ;;  %v2147_v37 = vadd.f32 %v9686_v60, %v1962_v63  ;;  %v10867_v38 = vld [vmem:[#allocation15_spill] sm:$0xff] }
 0x1b7   : > { %v1719_v54 = vadd.f32 %v10853_v5, %v10852_v44  ;;  %v6681_v48 = vpop.f32.mrf.mxu1  ;;  %v2529_v51 = vadd.f32 %v6644_v4, %v2324_v23  ;;  %v1739_v26 = vadd.f32 %v10857_v22, %v10856_v53  ;;  %v10863_v5 = vld [vmem:[#allocation45_spill] sm:$0xff]  ;;  %v10868_v2 = vld [vmem:[#allocation27_spill] sm:$0xff]  ;;  %v10872_v53 = vld [vmem:[#allocation24_spill] sm:$0xff] }
 0x1b8   : > { %v6647_v0 = vpop.f32.mrf.mxu0  ;;  %7126 = vmatmul.mubr.f32.gmra.mxu0 %v9327_v62  ;;  %2761 = vst [vmem:[%s9859_s17] sm:$0xff] %v2668_v59  ;;  %v2686_v52 = vadd.f32 %v6681_v48, %v2517_v56  ;;  %v2340_v60 = vadd.f32 %v9733_v50, %v2147_v37  ;;  %v10862_v59 = vld [vmem:[#allocation18_spill] sm:$0xff]  ;;  %v10873_v22 = vld [vmem:[#allocation21_spill] sm:$0xff] }
 0x1b9   : > { %7160 = vmatmul.mubr.f32.gmra.mxu1 %v9255_v21  ;;  %7128 = vmatprep.mubr.f32.mxu0 %v9337_v55  ;;  %v1956_v45 = vadd.f32 %v9578_v9, %v1719_v54  ;;  %v2679_v42 = vpop.f32.mrf.mxu1  ;;  %v2316_v21 = vadd.f32 %v9721_v57, %v2126_v20  ;;  %v10865_v54 = vld [vmem:[#allocation43_spill] sm:$0xff]  ;;  %v10866_v20 = vld [vmem:[#allocation58_spill] sm:$0xff] }
 0x1ba   : > { %7162 = vmatprep.mubr.f32.mxu1 %v9262_v61  ;;  %v2534_v25 = vpop.f32.mrf.mxu0  ;;  %2764 = vst [vmem:[%s9859_s17 + $0x30] sm:$0xff] %v2686_v52  ;;  %v2680_v31 = vadd.f32 %v2679_v42, %v2511_v30  ;;  %v1974_v61 = vadd.f32 %v9588_v24, %v1749_v39  ;;  %v1769_v24 = vadd.f32 %v9565_v36, %v10858_v15 }
 0x1bb   : > { %v2140_v32 = vadd.f32 %v9697_v10, %v1956_v45  ;;  %v6684_v9 = vpop.f32.mrf.mxu1  ;;  %v2523_v57 = vadd.f32 %v2522_v27, %v2316_v21  ;;  %v1968_v10 = vadd.f32 %v9596_v1, %v1739_v26  ;;  %v2541_v50 = vadd.f32 %v6647_v0, %v2340_v60  ;;  %v10859_v27 = vld [vmem:[#allocation42_spill] sm:$0xff]  ;;  %v10869_v45 = vld [vmem:[#allocation47_spill] sm:$0xff]  ;;  %v10871_v21 = vld [vmem:[#allocation17_spill] sm:$0xff] }
 0x1bc   : > { %v6650_v19 = vpop.f32.mrf.mxu0  ;;  %7129 = vmatmul.mubr.f32.gmra.mxu0 %v9366_v47  ;;  %2763 = vst [vmem:[%s9859_s17 + $0x20] sm:$0xff] %v2680_v31  ;;  %v2698_v4 = vadd.f32 %v6684_v9, %v2529_v51  ;;  %v2161_v17 = vadd.f32 %v9708_v14, %v1974_v61  ;;  %v1759_v49 = vadd.f32 %v9576_v16, %v10859_v27  ;;  %v10864_v16 = vld [vmem:[#allocation44_spill] sm:$0xff]  ;;  %v10874_v26 = vld [vmem:[#allocation46_spill] sm:$0xff] }
 0x1bd   : > { %7163 = vmatmul.mubr.f32.gmra.mxu1 %v10848_v3  ;;  %7131 = vmatprep.mubr.f32.mxu0 %v9378_v13  ;;  %v2691_v33 = vpop.f32.mrf.mxu1  ;;  %v2332_v3 = vadd.f32 %v9743_v58, %v2140_v32  ;;  %v2154_v56 = vadd.f32 %v10861_v28, %v1968_v10  ;;  %v1789_v63 = vadd.f32 %v10865_v54, %v10864_v16  ;;  %v10875_v32 = vld [vmem:[#allocation61_spill] sm:$0xff]  ;;  %v10884_v54 = vld [vmem:[#allocation68_spill] sm:$0xff] }
 0x1be   : > { %7165 = vmatprep.mubr.f32.mxu1 %v9272_v46  ;;  %v2546_v41 = vpop.f32.mrf.mxu0  ;;  %2766 = vst [vmem:[%s9859_s17 + $0x50] sm:$0xff] %v2698_v4  ;;  %v2692_v11 = vadd.f32 %v2691_v33, %v2523_v57  ;;  %v1986_v46 = vadd.f32 %v10860_v7, %v1769_v24  ;;  %v2356_v14 = vadd.f32 %v9755_v34, %v2161_v17  ;;  %v10876_v57 = vld [vmem:[#allocation50_spill] sm:$0xff]  ;;  %v10877_v24 = vld [vmem:[#allocation28_spill] sm:$0xff]  ;;  %v10878_v10 = vld [vmem:[#allocation29_spill] sm:$0xff] }
 0x1bf   : > { %v6687_v1 = vpop.f32.mrf.mxu1  ;;  %v2535_v58 = vadd.f32 %v2534_v25, %v2332_v3  ;;  %v1980_v0 = vadd.f32 %v10866_v20, %v1759_v49  ;;  %v1779_v39 = vadd.f32 %v10868_v2, %v10867_v38  ;;  %v10870_v25 = vld [vmem:[#allocation65_spill] sm:$0xff]  ;;  %v1809_v61 = vadd.f32 %v10874_v26, %v10873_v22  ;;  %v10879_v33 = vld [vmem:[#allocation48_spill] sm:$0xff]  ;;  %v10880_v3 = vld [vmem:[#allocation38_spill] sm:$0xff] }
 0x1c0   : > { %v6653_v36 = vpop.f32.mrf.mxu0  ;;  %7132 = vmatmul.mubr.f32.gmra.mxu0 %v10862_v59  ;;  %2765 = vst [vmem:[%s9859_s17 + $0x40] sm:$0xff] %v2692_v11  ;;  %v2710_v44 = vadd.f32 %v6687_v1, %v2541_v50  ;;  %v2175_v30 = vadd.f32 %v9730_v18, %v1986_v46  ;;  %v2553_v34 = vadd.f32 %v6650_v19, %v2356_v14  ;;  %v10881_v11 = vld [vmem:[#allocation11_spill] sm:$0xff] }
 0x1c1   : > { %7166 = vmatmul.mubr.f32.gmra.mxu1 %v9327_v62  ;;  %7134 = vmatprep.mubr.f32.mxu0 %v10863_v5  ;;  %v2703_v23 = vpop.f32.mrf.mxu1  ;;  %v2348_v62 = vadd.f32 %v9765_v35, %v2154_v56  ;;  %v2168_v42 = vadd.f32 %v10870_v25, %v1980_v0  ;;  %v1992_v19 = vadd.f32 %v10875_v32, %v1779_v39  ;;  %v10882_v46 = vld [vmem:[#allocation63_spill] sm:$0xff] }
 0x1c2   : > { %7168 = vmatprep.mubr.f32.mxu1 %v9337_v55  ;;  %v2558_v48 = vpop.f32.mrf.mxu0  ;;  %2768 = vst [vmem:[%s9859_s17 + $0x70] sm:$0xff] %v2710_v44  ;;  %v2704_v52 = vadd.f32 %v2703_v23, %v2535_v58  ;;  %v1998_v55 = vadd.f32 %v10869_v45, %v1789_v63  ;;  %v2372_v18 = vadd.f32 %v9777_v40, %v2175_v30  ;;  %v10883_v1 = vld [vmem:[#allocation51_spill] sm:$0xff] }
 0x1c3   : > { %v6690_v51 = vpop.f32.mrf.mxu1  ;;  %v2547_v35 = vadd.f32 %v2546_v41, %v2348_v62  ;;  %v1799_v41 = vadd.f32 %v10878_v10, %v10877_v24  ;;  %v2182_v27 = vadd.f32 %v10881_v11, %v1992_v19 }
 0x1c4   : > { %v6656_v37 = vpop.f32.mrf.mxu0  ;;  %7135 = vmatmul.mubr.f32.gmra.mxu0 %v10871_v21  ;;  %2767 = vst [vmem:[%s9859_s17 + $0x60] sm:$0xff] %v2704_v52  ;;  %v2722_v31 = vadd.f32 %v6690_v51, %v2553_v34  ;;  %v2189_v4 = vadd.f32 %v10876_v57, %v1998_v55  ;;  %v2565_v40 = vadd.f32 %v6653_v36, %v2372_v18 }
 0x1c5   : > { %7169 = vmatmul.mubr.f32.gmra.mxu1 %v9366_v47  ;;  %7137 = vmatprep.mubr.f32.mxu0 %v10872_v53  ;;  %v2715_v60 = vpop.f32.mrf.mxu1  ;;  %v2364_v47 = vadd.f32 %v9788_v8, %v2168_v42  ;;  %v2004_v28 = vadd.f32 %v10882_v46, %v1799_v41  ;;  %v2380_v58 = vadd.f32 %v9811_v12, %v2182_v27 }
 0x1c6   : > { %7171 = vmatprep.mubr.f32.mxu1 %v9378_v13  ;;  %v2570_v9 = vpop.f32.mrf.mxu0  ;;  %2770 = vst [vmem:[%s9859_s17 + $0x90] sm:$0xff] %v2722_v31  ;;  %v2716_v15 = vadd.f32 %v2715_v60, %v2547_v35  ;;  %v2010_v13 = vadd.f32 %v10879_v33, %v1809_v61  ;;  %v2388_v49 = vadd.f32 %v9797_v29, %v2189_v4 }
 0x1c7   : > { %v6693_v50 = vpop.f32.mrf.mxu1  ;;  %v2559_v8 = vadd.f32 %v2558_v48, %v2364_v47  ;;  %v2196_v63 = vadd.f32 %v10884_v54, %v2004_v28  ;;  %v2571_v20 = vadd.f32 %v2570_v9, %v2380_v58 }
 0x1c8   : > { %v6659_v17 = vpop.f32.mrf.mxu0  ;;  %7138 = vmatmul.mubr.f32.gmra.mxu0 %v10880_v3  ;;  %2769 = vst [vmem:[%s9859_s17 + $0x80] sm:$0xff] %v2716_v15  ;;  %v2734_v7 = vadd.f32 %v6693_v50, %v2565_v40  ;;  %v2203_v14 = vadd.f32 %v10883_v1, %v2010_v13  ;;  %v2577_v44 = vadd.f32 %v6656_v37, %v2388_v49 }
 0x1c9   : > { %7172 = vmatmul.mubr.f32.gmra.mxu1 %v10862_v59  ;;  %v2727_v36 = vpop.f32.mrf.mxu1  ;;  %v2396_v23 = vadd.f32 %v9840_v6, %v2196_v63 }
 0x1ca   : > { %7174 = vmatprep.mubr.f32.mxu1 %v10863_v5  ;;  %v2582_v56 = vpop.f32.mrf.mxu0  ;;  %2772 = vst [vmem:[%s9859_s17 + $0xb0] sm:$0xff] %v2734_v7  ;;  %v2728_v59 = vadd.f32 %v2727_v36, %v2559_v8  ;;  %v2404_v5 = vadd.f32 %v9825_v43, %v2203_v14 }
 0x1cb   : > { %v6696_v29 = vpop.f32.mrf.mxu1  ;;  %v2583_v38 = vadd.f32 %v2582_v56, %v2396_v23 }
 0x1cc   : > { %v6718_v16 = vpop.f32.mrf.mxu0  ;;  %2771 = vst [vmem:[%s9859_s17 + $0xa0] sm:$0xff] %v2728_v59  ;;  %v2746_v0 = vadd.f32 %v6696_v29, %v2577_v44  ;;  %v2589_v30 = vadd.f32 %v6659_v17, %v2404_v5 }
 0x1cd   : > { %7175 = vmatmul.mubr.f32.gmra.mxu1 %v10871_v21  ;;  %v2739_v48 = vpop.f32.mrf.mxu1 }
 0x1ce   : > { %7177 = vmatprep.mubr.f32.mxu1 %v10872_v53  ;;  %v2938_v12 = vpop.f32.mrf.mxu0  ;;  %2774 = vst [vmem:[%s9859_s17 + $0xd0] sm:$0xff] %v2746_v0  ;;  %v2740_v62 = vadd.f32 %v2739_v48, %v2571_v20 }
 0x1cf   : > { %v6699_v52 = vpop.f32.mrf.mxu1 }
 0x1d0   : > { %v6721_v34 = vpop.f32.mrf.mxu0  ;;  %2773 = vst [vmem:[%s9859_s17 + $0xc0] sm:$0xff] %v2740_v62  ;;  %v2758_v43 = vadd.f32 %v6699_v52, %v2589_v30 }
 0x1d1   : > { %7178 = vmatmul.mubr.f32.gmra.mxu1 %v10880_v3  ;;  %v2751_v39 = vpop.f32.mrf.mxu1 }
 0x1d2   : > { %v2958_v2 = vpop.f32.mrf.mxu0  ;;  %2776 = vst [vmem:[%s9859_s17 + $0xf0] sm:$0xff] %v2758_v43  ;;  %v2752_v45 = vadd.f32 %v2751_v39, %v2583_v38 }
 0x1d3   : > { %v6758_v25 = vpop.f32.mrf.mxu1 }
 0x1d4   : > { %v6724_v55 = vpop.f32.mrf.mxu0  ;;  %2775 = vst [vmem:[%s9859_s17 + $0xe0] sm:$0xff] %v2752_v45  ;;  %v3206_v42 = vadd.f32 %v6758_v25, %v6718_v16 }
 0x1d5   : > { %v3199_v37 = vpop.f32.mrf.mxu1 }
 0x1d6   : > { %v2978_v6 = vpop.f32.mrf.mxu0  ;;  %v3200_v21 = vadd.f32 %v3199_v37, %v2938_v12 }
 0x1d7   : > { %v6761_v18 = vpop.f32.mrf.mxu1 }
 0x1d8   : > { %v6727_v51 = vpop.f32.mrf.mxu0  ;;  %v3218_v35 = vadd.f32 %v6761_v18, %v6721_v34 }
 0x1d9   : > { %v3211_v53 = vpop.f32.mrf.mxu1 }
 0x1da   : > { %v2998_v31 = vpop.f32.mrf.mxu0  ;;  %v3212_v22 = vadd.f32 %v3211_v53, %v2958_v2 }
 0x1db   : > { %v6764_v61 = vpop.f32.mrf.mxu1 }
 0x1dc   : > { %v6730_v26 = vpop.f32.mrf.mxu0  ;;  %v3230_v32 = vadd.f32 %v6764_v61, %v6724_v55 }
 0x1dd   : > { %v3223_v9 = vpop.f32.mrf.mxu1 }
 0x1de   : > { %v3018_v19 = vpop.f32.mrf.mxu0  ;;  %v3224_v60 = vadd.f32 %v3223_v9, %v2978_v6 }
 0x1df   : > { %v6767_v4 = vpop.f32.mrf.mxu1 }
 0x1e0   : > { %v6733_v57 = vpop.f32.mrf.mxu0  ;;  %v3242_v47 = vadd.f32 %v6767_v4, %v6727_v51 }
 0x1e1   : > { %v3235_v15 = vpop.f32.mrf.mxu1 }
 0x1e2   : > { %v3038_v40 = vpop.f32.mrf.mxu0  ;;  %v3236_v24 = vadd.f32 %v3235_v15, %v2998_v31 }
 0x1e3   : > { %v6770_v41 = vpop.f32.mrf.mxu1 }
 0x1e4   : > { %v6736_v10 = vpop.f32.mrf.mxu0  ;;  %v3254_v33 = vadd.f32 %v6770_v41, %v6730_v26 }
 0x1e5   : > { %v3247_v17 = vpop.f32.mrf.mxu1 }
 0x1e6   : > { %v3058_v13 = vpop.f32.mrf.mxu0  ;;  %v3248_v3 = vadd.f32 %v3247_v17, %v3018_v19 }
 0x1e7   : > { %v6773_v11 = vpop.f32.mrf.mxu1 }
 0x1e8   : > { %v6739_v50 = vpop.f32.mrf.mxu0  ;;  %v3266_v27 = vadd.f32 %v6773_v11, %v6733_v57 }
 0x1e9   : > { %v3259_v8 = vpop.f32.mrf.mxu1 }
 0x1ea   : > { %v3078_v49 = vpop.f32.mrf.mxu0  ;;  %v3260_v7 = vadd.f32 %v3259_v8, %v3038_v40 }
 0x1eb   : > { %v6776_v28 = vpop.f32.mrf.mxu1 }
 0x1ec   : > { %v6798_v46 = vpop.f32.mrf.mxu0  ;;  %v3278_v36 = vadd.f32 %v6776_v28, %v6736_v10 }
 0x1ed   : > { %v3385_v56 = vadd.f32 %v6798_v46, %v3206_v42  ;;  %v3271_v14 = vpop.f32.mrf.mxu1 }
 0x1ee   : > { %v3377_v1 = vpop.f32.mrf.mxu0  ;;  %v3272_v44 = vadd.f32 %v3271_v14, %v3058_v13 }
 0x1ef   : > { %v3378_v58 = vadd.f32 %v3377_v1, %v3200_v21  ;;  %v6779_v16 = vpop.f32.mrf.mxu1 }
 0x1f0   : > { %v6801_v59 = vpop.f32.mrf.mxu0  ;;  %v3290_v54 = vadd.f32 %v6779_v16, %v6739_v50 }
 0x1f1   : > { %v3399_v29 = vadd.f32 %v6801_v59, %v3218_v35  ;;  %v3283_v5 = vpop.f32.mrf.mxu1 }
 0x1f2   : > { %v3391_v63 = vpop.f32.mrf.mxu0  ;;  %v3284_v0 = vadd.f32 %v3283_v5, %v3078_v49 }
 0x1f3   : > { %v3392_v20 = vadd.f32 %v3391_v63, %v3212_v22  ;;  %v6838_v48 = vpop.f32.mrf.mxu1 }
 0x1f4   : > { %v6804_v12 = vpop.f32.mrf.mxu0  ;;  %v3572_v30 = vadd.f32 %v6838_v48, %v3385_v56 }
 0x1f5   : > { %v3413_v23 = vadd.f32 %v6804_v12, %v3230_v32  ;;  %v3563_v34 = vpop.f32.mrf.mxu1 }
 0x1f6   : > { %v3405_v62 = vpop.f32.mrf.mxu0  ;;  %v3564_v38 = vadd.f32 %v3563_v34, %v3378_v58 }
 0x1f7   : > { %v3406_v52 = vadd.f32 %v3405_v62, %v3224_v60  ;;  %v6841_v2 = vpop.f32.mrf.mxu1 }
 0x1f8   : > { %v6807_v43 = vpop.f32.mrf.mxu0  ;;  %v3588_v45 = vadd.f32 %v6841_v2, %v3399_v29 }
 0x1f9   : > { %v3427_v39 = vadd.f32 %v6807_v43, %v3242_v47  ;;  %v3579_v25 = vpop.f32.mrf.mxu1 }
 0x1fa   : > { %v3419_v55 = vpop.f32.mrf.mxu0  ;;  %v3580_v6 = vadd.f32 %v3579_v25, %v3392_v20 }
 0x1fb   : > { %v3420_v42 = vadd.f32 %v3419_v55, %v3236_v24  ;;  %v6844_v21 = vpop.f32.mrf.mxu1 }
 0x1fc   : > { %v6810_v37 = vpop.f32.mrf.mxu0  ;;  %v3604_v18 = vadd.f32 %v6844_v21, %v3413_v23 }
 0x1fd   : > { %v3441_v51 = vadd.f32 %v6810_v37, %v3254_v33  ;;  %v3595_v31 = vpop.f32.mrf.mxu1 }
 0x1fe   : > { %v3433_v35 = vpop.f32.mrf.mxu0  ;;  %v3596_v22 = vadd.f32 %v3595_v31, %v3406_v52 }
 0x1ff   : > { %v3434_v53 = vadd.f32 %v3433_v35, %v3248_v3  ;;  %v6847_v61 = vpop.f32.mrf.mxu1 }
 0x200   : > { %v6813_v26 = vpop.f32.mrf.mxu0  ;;  %v3620_v19 = vadd.f32 %v6847_v61, %v3427_v39 }
 0x201   : > { %v3455_v32 = vadd.f32 %v6813_v26, %v3266_v27  ;;  %v3611_v60 = vpop.f32.mrf.mxu1 }
 0x202   : > { %v3447_v9 = vpop.f32.mrf.mxu0  ;;  %v3612_v4 = vadd.f32 %v3611_v60, %v3420_v42 }
 0x203   : > { %v3448_v57 = vadd.f32 %v3447_v9, %v3260_v7  ;;  %v6850_v40 = vpop.f32.mrf.mxu1 }
 0x204   : > { %v6816_v47 = vpop.f32.mrf.mxu0  ;;  %v3636_v24 = vadd.f32 %v6850_v40, %v3441_v51 }
 0x205   : > { %v3469_v15 = vadd.f32 %v6816_v47, %v3278_v36  ;;  %v3627_v41 = vpop.f32.mrf.mxu1 }
 0x206   : > { %v3461_v10 = vpop.f32.mrf.mxu0  ;;  %v3628_v13 = vadd.f32 %v3627_v41, %v3434_v53 }
 0x207   : > { %v3462_v33 = vadd.f32 %v3461_v10, %v3272_v44  ;;  %v6853_v50 = vpop.f32.mrf.mxu1 }
 0x208   : > { %v6819_v17 = vpop.f32.mrf.mxu0  ;;  %v3652_v11 = vadd.f32 %v6853_v50, %v3455_v32 }
 0x209   : > { %v3483_v3 = vadd.f32 %v6819_v17, %v3290_v54  ;;  %v3643_v8 = vpop.f32.mrf.mxu1 }
 0x20a   : > { %v3475_v49 = vpop.f32.mrf.mxu0  ;;  %v3644_v46 = vadd.f32 %v3643_v8, %v3448_v57 }
 0x20b   : > { %v3476_v27 = vadd.f32 %v3475_v49, %v3284_v0 }
 0x20c   : > { %v6878_v28 = vpop.f32.mrf.mxu0  ;;  %v6856_v56 = vpop.f32.mrf.mxu1 }
 0x20d   : > { %v3785_v7 = vadd.f32 %v6878_v28, %v3572_v30  ;;  %v3668_v1 = vadd.f32 %v6856_v56, %v3469_v15 }
 0x20e   : > { %v3778_v14 = vpop.f32.mrf.mxu0  ;;  %v3659_v58 = vpop.f32.mrf.mxu1 }
 0x20f   : > { %v3779_v36 = vadd.f32 %v3778_v14, %v3564_v38  ;;  %v3660_v59 = vadd.f32 %v3659_v58, %v3462_v33 }
 0x210   : > { %v6881_v16 = vpop.f32.mrf.mxu0  ;;  %v6859_v29 = vpop.f32.mrf.mxu1 }
 0x211   : > { %v3797_v44 = vadd.f32 %v6881_v16, %v3588_v45  ;;  %v3684_v63 = vadd.f32 %v6859_v29, %v3483_v3 }
 0x212   : > { %v3790_v5 = vpop.f32.mrf.mxu0  ;;  %v3675_v20 = vpop.f32.mrf.mxu1 }
 0x213   : > { %v3791_v54 = vadd.f32 %v3790_v5, %v3580_v6  ;;  %v3676_v12 = vadd.f32 %v3675_v20, %v3476_v27 }
 0x214   : > { %v6884_v48 = vpop.f32.mrf.mxu0  ;;  %v6918_v23 = vpop.f32.mrf.mxu1 }
 0x215   : > { %v3809_v0 = vadd.f32 %v6884_v48, %v3604_v18  ;;  %v9950_v62 = vadd.f32 %v6918_v23, %v3785_v7 }
 0x216   : > { %v3802_v34 = vpop.f32.mrf.mxu0  ;;  %v3947_v30 = vpop.f32.mrf.mxu1 }
 0x217   : > { %v3803_v52 = vadd.f32 %v3802_v34, %v3596_v22  ;;  %v9952_v43 = vadd.f32 %v3947_v30, %v3779_v36 }
 0x218   : > { %v6887_v38 = vpop.f32.mrf.mxu0  ;;  %v6921_v2 = vpop.f32.mrf.mxu1 }
 0x219   : > { %v3821_v39 = vadd.f32 %v6887_v38, %v3620_v19  ;;  %v9954_v55 = vadd.f32 %v6921_v2, %v3797_v44 }
 0x21a   : > { %v3814_v45 = vpop.f32.mrf.mxu0  ;;  %v3959_v25 = vpop.f32.mrf.mxu1 }
 0x21b   : > { %v3815_v42 = vadd.f32 %v3814_v45, %v3612_v4  ;;  %v9956_v6 = vadd.f32 %v3959_v25, %v3791_v54 }
 0x21c   : > { %v6890_v37 = vpop.f32.mrf.mxu0  ;;  %v6924_v21 = vpop.f32.mrf.mxu1 }
 0x21d   : > { %v3833_v51 = vadd.f32 %v6890_v37, %v3636_v24  ;;  %v9958_v18 = vadd.f32 %v6924_v21, %v3809_v0 }
 0x21e   : > { %v3826_v35 = vpop.f32.mrf.mxu0  ;;  %v3971_v31 = vpop.f32.mrf.mxu1 }
 0x21f   : > { %v3827_v53 = vadd.f32 %v3826_v35, %v3628_v13  ;;  %v9960_v22 = vadd.f32 %v3971_v31, %v3803_v52 }
 0x220   : > { %v6893_v26 = vpop.f32.mrf.mxu0  ;;  %v6927_v61 = vpop.f32.mrf.mxu1 }
 0x221   : > { %v3845_v32 = vadd.f32 %v6893_v26, %v3652_v11  ;;  %v9962_v19 = vadd.f32 %v6927_v61, %v3821_v39 }
 0x222   : > { %v3838_v9 = vpop.f32.mrf.mxu0  ;;  %v3983_v60 = vpop.f32.mrf.mxu1 }
 0x223   : > { %v3839_v57 = vadd.f32 %v3838_v9, %v3644_v46  ;;  %v9964_v4 = vadd.f32 %v3983_v60, %v3815_v42 }
 0x224   : > { %v6896_v47 = vpop.f32.mrf.mxu0  ;;  %v6930_v40 = vpop.f32.mrf.mxu1 }
 0x225   : > { %v3857_v15 = vadd.f32 %v6896_v47, %v3668_v1  ;;  %v9966_v24 = vadd.f32 %v6930_v40, %v3833_v51 }
 0x226   : > { %v3850_v10 = vpop.f32.mrf.mxu0  ;;  %v3995_v41 = vpop.f32.mrf.mxu1 }
 0x227   : > { %v3851_v33 = vadd.f32 %v3850_v10, %v3660_v59  ;;  %v9968_v13 = vadd.f32 %v3995_v41, %v3827_v53 }
 0x228   : > { %v6899_v17 = vpop.f32.mrf.mxu0  ;;  %v6933_v50 = vpop.f32.mrf.mxu1 }
 0x229   : > { %v3869_v3 = vadd.f32 %v6899_v17, %v3684_v63  ;;  %v9970_v11 = vadd.f32 %v6933_v50, %v3845_v32 }
 0x22a   : > { %v3862_v49 = vpop.f32.mrf.mxu0  ;;  %v4007_v8 = vpop.f32.mrf.mxu1 }
 0x22b   : > { %v3863_v27 = vadd.f32 %v3862_v49, %v3676_v12  ;;  %v9972_v46 = vadd.f32 %v4007_v8, %v3839_v57 }
 0x22c   : > { %v9974_v28 = vpop.f32.mrf.mxu0  ;;  %v6936_v56 = vpop.f32.mrf.mxu1 }
 0x22d   : > { %v9976_v7 = vadd.f32 %v6936_v56, %v3857_v15 }
 0x22e   : > { %v9978_v1 = vpop.f32.mrf.mxu0  ;;  %v4019_v14 = vpop.f32.mrf.mxu1 }
 0x22f   : > { %10885 = vst [vmem:[#allocation30_spill] sm:$0xff] %v9976_v7  ;;  %v9980_v58 = vadd.f32 %v4019_v14, %v3851_v33 }
 0x230   : > { %v9982_v36 = vpop.f32.mrf.mxu0  ;;  %v6939_v59 = vpop.f32.mrf.mxu1 }
 0x231   : > { %10886 = vst [vmem:[#allocation9_spill] sm:$0xff] %v9980_v58  ;;  %v9984_v16 = vadd.f32 %v6939_v59, %v3869_v3 }
 0x232   : > { %v9986_v29 = vpop.f32.mrf.mxu0  ;;  %v4031_v44 = vpop.f32.mrf.mxu1 }
 0x233   : > { %10887 = vst [vmem:[#allocation70_spill] sm:$0xff] %v9984_v16  ;;  %v9988_v63 = vadd.f32 %v4031_v44, %v3863_v27 }
 0x234   : > { %v9990_v5 = vpop.f32.mrf.mxu0  ;;  %v6998_v20 = vpop.f32.mrf.mxu1 }
 0x235   : > { %10888 = vst [vmem:[#allocation71_spill] sm:$0xff] %v9988_v63 }
 0x236   : > { %v9992_v54 = vpop.f32.mrf.mxu0  ;;  %v4429_v12 = vpop.f32.mrf.mxu1 }
 0x238   : > { %v9994_v48 = vpop.f32.mrf.mxu0  ;;  %v9996_v23 = vpop.f32.mrf.mxu1 }
 0x23a   : > { %v9998_v0 = vpop.f32.mrf.mxu0  ;;  %v10000_v34 = vpop.f32.mrf.mxu1 }
 0x23c   : > { %v10002_v30 = vpop.f32.mrf.mxu0  ;;  %v10004_v52 = vpop.f32.mrf.mxu1 }
 0x23e   : > { %v10006_v38 = vpop.f32.mrf.mxu0  ;;  %v10008_v2 = vpop.f32.mrf.mxu1 }
 0x240   : > { %v10010_v39 = vpop.f32.mrf.mxu0  ;;  %v10012_v45 = vpop.f32.mrf.mxu1 }
 0x242   : > { %v10014_v25 = vpop.f32.mrf.mxu0  ;;  %v10016_v42 = vpop.f32.mrf.mxu1 }
 0x244   : > { %v10018_v37 = vpop.f32.mrf.mxu0  ;;  %v10020_v21 = vpop.f32.mrf.mxu1 }
 0x245   : > { %10889 = vst [vmem:[#allocation52_spill] sm:$0xff] %v10018_v37 }
 0x246   : > { %v10022_v51 = vpop.f32.mrf.mxu0  ;;  %v10024_v35 = vpop.f32.mrf.mxu1 }
 0x247   : > { %10890 = vst [vmem:[#allocation54_spill] sm:$0xff] %v10022_v51 }
 0x248   : > { %v10026_v31 = vpop.f32.mrf.mxu0  ;;  %v10028_v53 = vpop.f32.mrf.mxu1 }
 0x249   : > { %10891 = vst [vmem:[#allocation55_spill] sm:$0xff] %v10026_v31  ;;  %10892 = vst [vmem:[#allocation32_spill] sm:$0xff] %v10028_v53 }
 0x24a   : > { %v10030_v26 = vpop.f32.mrf.mxu0  ;;  %v10032_v61 = vpop.f32.mrf.mxu1 }
 0x24b   : > { %10893 = vst [vmem:[#allocation57_spill] sm:$0xff] %v10030_v26  ;;  %10894 = vst [vmem:[#allocation60_spill] sm:$0xff] %v10032_v61 }
 0x24c   : > { %v7038_v32 = vpop.f32.mrf.mxu0  ;;  %v10034_v9 = vpop.f32.mrf.mxu1 }
 0x24d   : > { %10895 = vst [vmem:[#allocation64_spill] sm:$0xff] %v10034_v9 }
 0x24e   : > { %v4607_v60 = vpop.f32.mrf.mxu0  ;;  %v10036_v57 = vpop.f32.mrf.mxu1 }
 0x24f   : > { %10896 = vst [vmem:[#allocation66_spill] sm:$0xff] %v10036_v57 }
 0x250   : > { %v7041_v47 = vpop.f32.mrf.mxu0  ;;  %v10038_v40 = vpop.f32.mrf.mxu1 }
 0x251   : > { %10897 = vst [vmem:[#allocation53_spill] sm:$0xff] %v10038_v40 }
 0x252   : > { %v4621_v15 = vpop.f32.mrf.mxu0  ;;  %v10040_v10 = vpop.f32.mrf.mxu1 }
 0x253   : > { %10898 = vst [vmem:[#allocation22_spill] sm:$0xff] %v10040_v10 }
 0x254   : > { %v7044_v41 = vpop.f32.mrf.mxu0  ;;  %v7078_v33 = vpop.f32.mrf.mxu1 }
 0x256   : > { %v10042_v17 = vpop.f32.mrf.mxu0  ;;  %v4793_v50 = vpop.f32.mrf.mxu1 }
 0x258   : > { %v10044_v3 = vpop.f32.mrf.mxu0  ;;  %v7081_v49 = vpop.f32.mrf.mxu1 }
 0x25a   : > { %v10046_v8 = vpop.f32.mrf.mxu0  ;;  %v4809_v27 = vpop.f32.mrf.mxu1 }
 0x25c   : > { %v10048_v56 = vpop.f32.mrf.mxu0  ;;  %v7084_v14 = vpop.f32.mrf.mxu1 }
 0x25e   : > { %v10050_v59 = vpop.f32.mrf.mxu0  ;;  %v10052_v44 = vpop.f32.mrf.mxu1 }
 0x25f   : > { %10899 = vst [vmem:[#allocation56_spill] sm:$0xff] %v10050_v59 }
 0x260   : > { %v10054_v40 = vpop.f32.mrf.mxu0 }
 0x261   : > { %10900 = vst [vmem:[#allocation36_spill] sm:$0xff] %v10054_v40  ;;  %v10056_v10 = vpop.f32.mrf.mxu1 }
 0x262   : > { %v10058_v26 = vpop.f32.mrf.mxu0 }
 0x263   : > { %10901 = vst [vmem:[#allocation59_spill] sm:$0xff] %v10058_v26  ;;  %v10060_v63 = vpop.f32.mrf.mxu1  ;;  %v4179_v26 = vadd.f32 %v9974_v28, %v9950_v62  ;;  %v4189_v62 = vadd.f32 %v9986_v29, %v9956_v6 }
 0x264   : > { %v10062_v57 = vpop.f32.mrf.mxu0 }
 0x265   : > { %10902 = vst [vmem:[#allocation62_spill] sm:$0xff] %v10062_v57  ;;  %v10064_v31 = vpop.f32.mrf.mxu1  ;;  %v4169_v57 = vadd.f32 %v9978_v1, %v9952_v43  ;;  %v4219_v43 = vadd.f32 %v9990_v5, %v9958_v18  ;;  %v4239_v5 = vadd.f32 %v9994_v48, %v9962_v19 }
 0x266   : > { %10903 = vst [vmem:[#allocation67_spill] sm:$0xff] %v10064_v31  ;;  %v10066_v16 = vpop.f32.mrf.mxu0 }
 0x267   : > { %10904 = vst [vmem:[#allocation69_spill] sm:$0xff] %v10066_v16  ;;  %v10068_v9 = vpop.f32.mrf.mxu1  ;;  %v4436_v16 = vadd.f32 %v6998_v20, %v4179_v26  ;;  %v4209_v26 = vadd.f32 %v9992_v54, %v9960_v22  ;;  %v4460_v6 = vadd.f32 %v10004_v52, %v4219_v43  ;;  %v4229_v54 = vadd.f32 %v9998_v0, %v9964_v4 }
 0x268   : > { %10905 = vst [vmem:[#allocation20_spill] sm:$0xff] %v10068_v9  ;;  %v10070_v51 = vpop.f32.mrf.mxu0  ;;  %v4472_v52 = vadd.f32 %v10012_v45, %v4239_v5 }
 0x269   : > { %10906 = vst [vmem:[#allocation12_spill] sm:$0xff] %v10070_v51  ;;  %v10072_v58 = vpop.f32.mrf.mxu1  ;;  %v4199_v51 = vadd.f32 %v9982_v36, %v9954_v55  ;;  %v4442_v55 = vadd.f32 %v10000_v34, %v4189_v62  ;;  %v4454_v34 = vadd.f32 %v10008_v2, %v4209_v26 }
 0x26a   : > { %10907 = vst [vmem:[#allocation35_spill] sm:$0xff] %v10072_v58  ;;  %v10074_v61 = vpop.f32.mrf.mxu0  ;;  %v4430_v58 = vadd.f32 %v4429_v12, %v4169_v57  ;;  %v4657_v4 = vadd.f32 %v10044_v3, %v4472_v52 }
 0x26b   : > { %10908 = vst [vmem:[#allocation13_spill] sm:$0xff] %v10074_v61  ;;  %v10076_v40 = vpop.f32.mrf.mxu1  ;;  %v4615_v61 = vadd.f32 %v7038_v32, %v4436_v16  ;;  %v4448_v28 = vadd.f32 %v9996_v23, %v4199_v51  ;;  %v4622_v23 = vadd.f32 %v4621_v15, %v4442_v55  ;;  %v4636_v19 = vadd.f32 %v10042_v17, %v4454_v34 }
 0x26c   : > { %10909 = vst [vmem:[#allocation41_spill] sm:$0xff] %v10076_v40  ;;  %v7118_v37 = vpop.f32.mrf.mxu0  ;;  %v4259_v15 = vadd.f32 %v10002_v30, %v9966_v24  ;;  %v4249_v17 = vadd.f32 %v10006_v38, %v9968_v13 }
 0x26d   : > { %v10080_v7 = vpop.f32.mrf.mxu1  ;;  %v4802_v53 = vadd.f32 %v7078_v33, %v4615_v61  ;;  %v4629_v36 = vadd.f32 %v7041_v47, %v4448_v28  ;;  %v4810_v32 = vadd.f32 %v4809_v27, %v4622_v23  ;;  %v4826_v0 = vadd.f32 %v10052_v44, %v4636_v19 }
 0x26e   : > { %10910 = vst [vmem:[#allocation31_spill] sm:$0xff] %v10080_v7  ;;  %v5008_v31 = vpop.f32.mrf.mxu0  ;;  %v4608_v7 = vadd.f32 %v4607_v60, %v4430_v58  ;;  %v4484_v27 = vadd.f32 %v10020_v21, %v4259_v15  ;;  %v4279_v44 = vadd.f32 %v10010_v39, %v9970_v11  ;;  %v4478_v62 = vadd.f32 %v10024_v35, %v4249_v17  ;;  %v10912_v39 = vld [vmem:[#allocation56_spill] sm:$0xff]  ;;  %v10913_v35 = vld [vmem:[#allocation67_spill] sm:$0xff]  ;;  %v10924_v15 = vld [vmem:[#allocation70_spill] sm:$0xff] }
 0x26f   : > { %v10084_v9 = vpop.f32.mrf.mxu1  ;;  %v5015_v12 = vadd.f32 %v7118_v37, %v4802_v53  ;;  %v4818_v51 = vadd.f32 %v7081_v49, %v4629_v36  ;;  %v4643_v53 = vadd.f32 %v7044_v41, %v4460_v6  ;;  %v4466_v41 = vadd.f32 %v10016_v42, %v4229_v54  ;;  %v10914_v6 = vld [vmem:[#allocation30_spill] sm:$0xff] }
 0x270   : > { %v7121_v59 = vpop.f32.mrf.mxu0  ;;  %v4794_v16 = vadd.f32 %v4793_v50, %v4608_v7  ;;  %v4850_v42 = vadd.f32 %v10056_v10, %v4657_v4  ;;  %v4671_v38 = vadd.f32 %v10048_v56, %v4484_v27  ;;  %v4269_v10 = vadd.f32 %v10014_v25, %v9972_v46  ;;  %v10917_v25 = vld [vmem:[#allocation36_spill] sm:$0xff] }
 0x271   : > { %v10088_v40 = vpop.f32.mrf.mxu1  ;;  %v5027_v60 = vadd.f32 %v7121_v59, %v4818_v51  ;;  %v4834_v48 = vadd.f32 %v7084_v14, %v4643_v53  ;;  %v4650_v30 = vadd.f32 %v10046_v8, %v4466_v41  ;;  %v10920_v53 = vld [vmem:[#allocation54_spill] sm:$0xff]  ;;  %v10923_v19 = vld [vmem:[#allocation35_spill] sm:$0xff] }
 0x272   : > { %v5020_v1 = vpop.f32.mrf.mxu0  ;;  %v5009_v61 = vadd.f32 %v5008_v31, %v4794_v16  ;;  %v4664_v16 = vadd.f32 %v10912_v39, %v4478_v62  ;;  %v10925_v41 = vld [vmem:[#allocation55_spill] sm:$0xff]  ;;  %v10935_v39 = vld [vmem:[#allocation12_spill] sm:$0xff] }
 0x273   : > { %v10095_v20 = vpop.f32.mrf.mxu1  ;;  %v5021_v47 = vadd.f32 %v5020_v1, %v4810_v32  ;;  %v4842_v21 = vadd.f32 %v10060_v63, %v4650_v30  ;;  %v10911_v1 = vld [vmem:[#allocation32_spill] sm:$0xff]  ;;  %v10928_v27 = vld [vmem:[#allocation41_spill] sm:$0xff] }
 0x274   : > { %v7124_v29 = vpop.f32.mrf.mxu0  ;;  %v4496_v55 = vadd.f32 %v10911_v1, %v4279_v44  ;;  %v10915_v63 = vld [vmem:[#allocation52_spill] sm:$0xff]  ;;  %v10931_v44 = vld [vmem:[#allocation53_spill] sm:$0xff]  ;;  %v10934_v1 = vld [vmem:[#allocation22_spill] sm:$0xff] }
 0x275   : > { %v7158_v58 = vpop.f32.mrf.mxu1  ;;  %v5039_v45 = vadd.f32 %v7124_v29, %v4834_v48  ;;  %v4299_v29 = vadd.f32 %v10915_v63, %v10914_v6  ;;  %v10936_v6 = vld [vmem:[#allocation13_spill] sm:$0xff] }
 0x276   : > { %v5184_v18 = vadd.f32 %v7158_v58, %v5015_v12  ;;  %v5032_v7 = vpop.f32.mrf.mxu0  ;;  %v4866_v12 = vadd.f32 %v10913_v35, %v4671_v38  ;;  %v10916_v58 = vld [vmem:[#allocation60_spill] sm:$0xff] }
 0x277   : > { %v5177_v37 = vpop.f32.mrf.mxu1  ;;  %v5033_v59 = vadd.f32 %v5032_v7, %v4826_v0  ;;  %v4490_v23 = vadd.f32 %v10916_v58, %v4269_v10 }
 0x278   : > { %5272 = vst [vmem:[%s9859_s17 + $0x18] sm:$0xff] %v5184_v18  ;;  %v5178_v22 = vadd.f32 %v5177_v37, %v5009_v61  ;;  %v7127_v31 = vpop.f32.mrf.mxu0  ;;  %v4685_v61 = vadd.f32 %v10917_v25, %v4496_v55  ;;  %v10918_v18 = vld [vmem:[#allocation20_spill] sm:$0xff]  ;;  %v10919_v37 = vld [vmem:[#allocation9_spill] sm:$0xff] }
 0x279   : > { %v7161_v57 = vpop.f32.mrf.mxu1  ;;  %v5051_v43 = vadd.f32 %v7127_v31, %v4850_v42  ;;  %v4858_v5 = vadd.f32 %v10918_v18, %v4664_v16  ;;  %v4289_v32 = vadd.f32 %v10920_v53, %v10919_v37  ;;  %v10922_v31 = vld [vmem:[#allocation59_spill] sm:$0xff] }
 0x27a   : > { %5271 = vst [vmem:[%s9859_s17 + $0x8] sm:$0xff] %v5178_v22  ;;  %v5196_v2 = vadd.f32 %v7161_v57, %v5027_v60  ;;  %v5044_v33 = vpop.f32.mrf.mxu0  ;;  %v10921_v60 = vld [vmem:[#allocation64_spill] sm:$0xff]  ;;  %v4678_v57 = vadd.f32 %v10922_v31, %v4490_v23  ;;  %v4882_v48 = vadd.f32 %v10923_v19, %v4685_v61  ;;  %v10929_v42 = vld [vmem:[#allocation71_spill] sm:$0xff]  ;;  %v5331_v31 = vld [vmem:[%s9859_s17 + $0x40] sm:$0xff] (%p7365_p9) }
 0x27b   : > { %v5189_v50 = vpop.f32.mrf.mxu1  ;;  %v5045_v26 = vadd.f32 %v5044_v33, %v4842_v21  ;;  %v4508_v22 = vadd.f32 %v10921_v60, %v4299_v29  ;;  %v4319_v33 = vadd.f32 %v10925_v41, %v10924_v15  ;;  %v10933_v21 = vld [vmem:[#allocation31_spill] sm:$0xff]  ;;  %v5323_v60 = vld [vmem:[%s9859_s17 + $0x20] sm:$0xff] (%p7365_p9)  ;;  %5332 = vst [vmem:[%s10179_s27 + $0x80] sm:$0xff] (%p7365_p9), %v5331_v31 }
 0x27c   : > { %5274 = vst [vmem:[%s9859_s17 + $0x38] sm:$0xff] %v5196_v2  ;;  %v5190_v49 = vadd.f32 %v5189_v50, %v5021_v47  ;;  %v7130_v14 = vpop.f32.mrf.mxu0  ;;  %v10926_v50 = vld [vmem:[#allocation66_spill] sm:$0xff]  ;;  %v5319_v53 = vld [vmem:[%s9859_s17 + $0x10] sm:$0xff] (%p7365_p9)  ;;  %5324 = vst [vmem:[%s10179_s27 + $0x40] sm:$0xff] (%p7365_p9), %v5323_v60 }
 0x27d   : > { %v7164_v24 = vpop.f32.mrf.mxu1  ;;  %v5063_v34 = vadd.f32 %v7130_v14, %v4866_v12  ;;  %v4502_v4 = vadd.f32 %v10926_v50, %v4289_v32  ;;  %v4874_v14 = vadd.f32 %v10928_v27, %v4678_v57  ;;  %v4520_v62 = vadd.f32 %v10931_v44, %v4319_v33  ;;  %5320 = vst [vmem:[%s10179_s27 + $0x20] sm:$0xff] (%p7365_p9), %v5319_v53  ;;  %v5335_v19 = vld [vmem:[%s9859_s17 + $0x50] sm:$0xff] (%p7365_p9)  ;;  %v5347_v33 = vld [vmem:[%s9859_s17 + $0x80] sm:$0xff] (%p7365_p9) }
 0x27e   : > { %5273 = vst [vmem:[%s9859_s17 + $0x28] sm:$0xff] %v5190_v49  ;;  %v5208_v3 = vadd.f32 %v7164_v24, %v5039_v45  ;;  %v5056_v28 = vpop.f32.mrf.mxu0  ;;  %v10927_v49 = vld [vmem:[#allocation62_spill] sm:$0xff]  ;;  %5336 = vst [vmem:[%s10179_s27 + $0xa0] sm:$0xff] (%p7365_p9), %v5335_v19  ;;  %v5343_v15 = vld [vmem:[%s9859_s17 + $0x70] sm:$0xff] (%p7365_p9) }
 0x27f   : > { %v5201_v13 = vpop.f32.mrf.mxu1  ;;  %v5057_v47 = vadd.f32 %v5056_v28, %v4858_v5  ;;  %v4699_v17 = vadd.f32 %v10927_v49, %v4508_v22  ;;  %v4713_v16 = vadd.f32 %v10935_v39, %v4520_v62  ;;  %v5321_v32 = vld [vmem:[%s9859_s17 + $0x18] sm:$0xff] (%p7365_p9)  ;;  %5344 = vst [vmem:[%s10179_s27 + $0xe0] sm:$0xff] (%p7365_p9), %v5343_v15  ;;  %5348 = vst [vmem:[%s10179_s27 + $0x100] sm:$0xff] (%p7365_p9), %v5347_v33  ;;  %v5375_v44 = vld [vmem:[%s9859_s17 + $0xf0] sm:$0xff] (%p7365_p9) }
 0x280   : > { %5276 = vst [vmem:[%s9859_s17 + $0x58] sm:$0xff] %v5208_v3  ;;  %v5202_v8 = vadd.f32 %v5201_v13, %v5033_v59  ;;  %v7133_v36 = vpop.f32.mrf.mxu0  ;;  %v10930_v59 = vld [vmem:[#allocation57_spill] sm:$0xff]  ;;  %5322 = vst [vmem:[%s10179_s27 + $0x28] sm:$0xff] (%p7365_p9), %v5321_v32 }
 0x281   : > { %v7167_v11 = vpop.f32.mrf.mxu1  ;;  %v5075_v24 = vadd.f32 %v7133_v36, %v4882_v48  ;;  %v4309_v3 = vadd.f32 %v10930_v59, %v10929_v42  ;;  %v10932_v13 = vld [vmem:[#allocation69_spill] sm:$0xff]  ;;  %v4914_v29 = vadd.f32 %v10088_v40, %v4713_v16  ;;  %5376 = vst [vmem:[%s10179_s27 + $0x1e0] sm:$0xff] (%p7365_p9), %v5375_v44 }
 0x282   : > { %5275 = vst [vmem:[%s9859_s17 + $0x48] sm:$0xff] %v5202_v8  ;;  %v5220_v56 = vadd.f32 %v7167_v11, %v5051_v43  ;;  %v5068_v51 = vpop.f32.mrf.mxu0  ;;  %v4692_v38 = vadd.f32 %v10932_v13, %v4502_v4  ;;  %v4898_v43 = vadd.f32 %v10933_v21, %v4699_v17  ;;  %v5315_v40 = vld [vmem:[%s9859_s17] sm:$0xff] (%p7365_p9)  ;;  %v5351_v4 = vld [vmem:[%s9859_s17 + $0x90] sm:$0xff] (%p7365_p9) }
 0x283   : > { %v5213_v46 = vpop.f32.mrf.mxu1  ;;  %v5069_v8 = vadd.f32 %v5068_v51, %v4874_v14  ;;  %v4514_v55 = vadd.f32 %v10934_v1, %v4309_v3  ;;  %5316 = vst [vmem:[%s10179_s27] sm:$0xff] (%p7365_p9), %v5315_v40  ;;  %5352 = vst [vmem:[%s10179_s27 + $0x120] sm:$0xff] (%p7365_p9), %v5351_v4  ;;  %v5359_v17 = vld [vmem:[%s9859_s17 + $0xb0] sm:$0xff] (%p7365_p9)  ;;  %v5363_v14 = vld [vmem:[%s9859_s17 + $0xc0] sm:$0xff] (%p7365_p9) }
 0x284   : > { %5278 = vst [vmem:[%s9859_s17 + $0x78] sm:$0xff] %v5220_v56  ;;  %v5214_v7 = vadd.f32 %v5213_v46, %v5045_v26  ;;  %v7136_v54 = vpop.f32.mrf.mxu0  ;;  %v4890_v35 = vadd.f32 %v10084_v9, %v4692_v38  ;;  %5360 = vst [vmem:[%s10179_s27 + $0x160] sm:$0xff] (%p7365_p9), %v5359_v17  ;;  %v5371_v59 = vld [vmem:[%s9859_s17 + $0xe0] sm:$0xff] (%p7365_p9) }
 0x285   : > { %v7170_v52 = vpop.f32.mrf.mxu1  ;;  %v5087_v12 = vadd.f32 %v7136_v54, %v4898_v43  ;;  %v4706_v63 = vadd.f32 %v10936_v6, %v4514_v55  ;;  %v5325_v22 = vld [vmem:[%s9859_s17 + $0x28] sm:$0xff] (%p7365_p9)  ;;  %v5327_v54 = vld [vmem:[%s9859_s17 + $0x30] sm:$0xff] (%p7365_p9)  ;;  %5364 = vst [vmem:[%s10179_s27 + $0x180] sm:$0xff] (%p7365_p9), %v5363_v14  ;;  %5372 = vst [vmem:[%s10179_s27 + $0x1c0] sm:$0xff] (%p7365_p9), %v5371_v59 }
 0x286   : > { %5277 = vst [vmem:[%s9859_s17 + $0x68] sm:$0xff] %v5214_v7  ;;  %v5232_v2 = vadd.f32 %v7170_v52, %v5063_v34  ;;  %v5080_v0 = vpop.f32.mrf.mxu0  ;;  %5326 = vst [vmem:[%s10179_s27 + $0x48] sm:$0xff] (%p7365_p9), %v5325_v22  ;;  %v5329_v52 = vld [vmem:[%s9859_s17 + $0x38] sm:$0xff] (%p7365_p9) }
 0x287   : > { %v5225_v45 = vpop.f32.mrf.mxu1  ;;  %v5081_v58 = vadd.f32 %v5080_v0, %v4890_v35  ;;  %v4906_v25 = vadd.f32 %v10095_v20, %v4706_v63  ;;  %v5317_v20 = vld [vmem:[%s9859_s17 + $0x8] sm:$0xff] (%p7365_p9)  ;;  %5328 = vst [vmem:[%s10179_s27 + $0x60] sm:$0xff] (%p7365_p9), %v5327_v54  ;;  %5330 = vst [vmem:[%s10179_s27 + $0x68] sm:$0xff] (%p7365_p9), %v5329_v52  ;;  %v5337_v48 = vld [vmem:[%s9859_s17 + $0x58] sm:$0xff] (%p7365_p9) }
 0x288   : > { %5280 = vst [vmem:[%s9859_s17 + $0x98] sm:$0xff] %v5232_v2  ;;  %v5226_v30 = vadd.f32 %v5225_v45, %v5057_v47  ;;  %v7139_v36 = vpop.f32.mrf.mxu0  ;;  %5318 = vst [vmem:[%s10179_s27 + $0x8] sm:$0xff] (%p7365_p9), %v5317_v20  ;;  %v5339_v47 = vld [vmem:[%s9859_s17 + $0x60] sm:$0xff] (%p7365_p9) }
 0x289   : > { %v7173_v28 = vpop.f32.mrf.mxu1  ;;  %v5099_v61 = vadd.f32 %v7139_v36, %v4914_v29  ;;  %v5333_v57 = vld [vmem:[%s9859_s17 + $0x48] sm:$0xff] (%p7365_p9)  ;;  %5338 = vst [vmem:[%s10179_s27 + $0xa8] sm:$0xff] (%p7365_p9), %v5337_v48  ;;  %5340 = vst [vmem:[%s10179_s27 + $0xc0] sm:$0xff] (%p7365_p9), %v5339_v47  ;;  %v5355_v45 = vld [vmem:[%s9859_s17 + $0xa0] sm:$0xff] (%p7365_p9) }
 0x28a   : > { %5279 = vst [vmem:[%s9859_s17 + $0x88] sm:$0xff] %v5226_v30  ;;  %v5244_v10 = vadd.f32 %v7173_v28, %v5075_v24  ;;  %v5092_v51 = vpop.f32.mrf.mxu0  ;;  %5334 = vst [vmem:[%s10179_s27 + $0x88] sm:$0xff] (%p7365_p9), %v5333_v57  ;;  %v5367_v30 = vld [vmem:[%s9859_s17 + $0xd0] sm:$0xff] (%p7365_p9) }
 0x28b   : > { %v5237_v11 = vpop.f32.mrf.mxu1  ;;  %v5093_v5 = vadd.f32 %v5092_v51, %v4906_v25  ;;  %v5345_v41 = vld [vmem:[%s9859_s17 + $0x78] sm:$0xff] (%p7365_p9)  ;;  %5356 = vst [vmem:[%s10179_s27 + $0x140] sm:$0xff] (%p7365_p9), %v5355_v45  ;;  %5368 = vst [vmem:[%s10179_s27 + $0x1a0] sm:$0xff] (%p7365_p9), %v5367_v30 }
 0x28c   : > { %5282 = vst [vmem:[%s9859_s17 + $0xb8] sm:$0xff] %v5244_v10  ;;  %v5238_v26 = vadd.f32 %v5237_v11, %v5069_v8  ;;  %5346 = vst [vmem:[%s10179_s27 + $0xe8] sm:$0xff] (%p7365_p9), %v5345_v41 }
 0x28d   : > { %v7176_v56 = vpop.f32.mrf.mxu1  ;;  %v5341_v2 = vld [vmem:[%s9859_s17 + $0x68] sm:$0xff] (%p7365_p9) }
 0x28e   : > { %5281 = vst [vmem:[%s9859_s17 + $0xa8] sm:$0xff] %v5238_v26  ;;  %v5256_v23 = vadd.f32 %v7176_v56, %v5087_v12  ;;  %5342 = vst [vmem:[%s10179_s27 + $0xc8] sm:$0xff] (%p7365_p9), %v5341_v2 }
 0x28f   : > { %v5249_v46 = vpop.f32.mrf.mxu1  ;;  %v5353_v0 = vld [vmem:[%s9859_s17 + $0x98] sm:$0xff] (%p7365_p9) }
 0x290   : > { %5284 = vst [vmem:[%s9859_s17 + $0xd8] sm:$0xff] %v5256_v23  ;;  %v5250_v9 = vadd.f32 %v5249_v46, %v5081_v58  ;;  %5354 = vst [vmem:[%s10179_s27 + $0x128] sm:$0xff] (%p7365_p9), %v5353_v0 }
 0x291   : > { %v7179_v18 = vpop.f32.mrf.mxu1  ;;  %v5349_v50 = vld [vmem:[%s9859_s17 + $0x88] sm:$0xff] (%p7365_p9) }
 0x292   : > { %5283 = vst [vmem:[%s9859_s17 + $0xc8] sm:$0xff] %v5250_v9  ;;  %v5268_v34 = vadd.f32 %v7179_v18, %v5099_v61  ;;  %5293 = sbr.rel (!%p7365_p9) target bundleno = 671 (0x29f), region = 32  ;;  %5350 = vst [vmem:[%s10179_s27 + $0x108] sm:$0xff] (%p7365_p9), %v5349_v50 }
 0x293   : > { %v5261_v7 = vpop.f32.mrf.mxu1  ;;  %v5361_v27 = vld [vmem:[%s9859_s17 + $0xb8] sm:$0xff] (%p7365_p9) }
 0x294   : > { %5286 = vst [vmem:[%s9859_s17 + $0xf8] sm:$0xff] %v5268_v34  ;;  %v5262_v37 = vadd.f32 %v5261_v7, %v5093_v5  ;;  %5362 = vst [vmem:[%s10179_s27 + $0x168] sm:$0xff] (%p7365_p9), %v5361_v27 }
 0x295   : > { %v5357_v49 = vld [vmem:[%s9859_s17 + $0xa8] sm:$0xff] (%p7365_p9) }
 0x296   : > { %5285 = vst [vmem:[%s9859_s17 + $0xe8] sm:$0xff] %v5262_v37  ;;  %5358 = vst [vmem:[%s10179_s27 + $0x148] sm:$0xff] (%p7365_p9), %v5357_v49 }
 0x297   : > { %v5369_v42 = vld [vmem:[%s9859_s17 + $0xd8] sm:$0xff] }
 0x298   : > { %5370 = vst [vmem:[%s10179_s27 + $0x1a8] sm:$0xff] %v5369_v42 }
 0x299   : > { %v5365_v24 = vld [vmem:[%s9859_s17 + $0xc8] sm:$0xff] }
 0x29a   : > { %5366 = vst [vmem:[%s10179_s27 + $0x188] sm:$0xff] %v5365_v24 }
 0x29b   : > { %v5377_v62 = vld [vmem:[%s9859_s17 + $0xf8] sm:$0xff] }
 0x29c   : > { %5378 = vst [vmem:[%s10179_s27 + $0x1e8] sm:$0xff] %v5377_v62 }
 0x29d   : > { %v5373_v3 = vld [vmem:[%s9859_s17 + $0xe8] sm:$0xff] }
 0x29e   : > { %5374 = vst [vmem:[%s10179_s27 + $0x1c8] sm:$0xff] %v5373_v3 }
 0x29f PF: > { %s14_s11 = sadd.s32 1, %s7295_s11   ;;  %s10937_s6 = smov %s7279_s7 }
 0x2a0   : > { %p11_p0 = scmp.ge.s32.totalorder %s14_s11, 4   ;;  %s10938_s7 = smov %s7283_s8 }
 0x2a1   : > { %s10939_s8 = smov %s7363_s18  ;;  %s10940_s9 = smov %s7291_s10 }
 0x2a2   : > { %s10941_s10 = smov %s10943_s13  ;;  %13 = sbr.rel (!%p11_p0) target bundleno = 4 (0x4), region = 95 }
 0x2a7   :  { %5394 = vsyncpa [#allocation3], 1 }
 0x2a8   :  { %5396 = vsyncpa [#allocation3 + $0x1], 1 }

</bundles_post_ra>
